<compile_context>
chip_gen: v6e
topology: v6e:2x2x1
jax: 0.10.0
libtpu: 0.0.40
codegen_flags: <defaults>
</compile_context>

<pallas_src>
import functools
import math

import numpy as np
import jax
import jax.numpy as jnp
from jax import lax
from jax.experimental import pallas as pl
from jax.experimental.pallas import tpu as pltpu

LANE = 128


# ----------------------------------------------------------------------------
# Small helpers (all padding / reshaping of weights happens once at init).
# ----------------------------------------------------------------------------
def _ceil_to(x, m):
    return -(-x // m) * m


def _pad2(a, rows, cols):
    a = jnp.asarray(a)
    return jnp.pad(a, ((0, rows - a.shape[0]), (0, cols - a.shape[1])))


def _choose_block_n(n, rows_per_image):
    """Images per grid step: ~<=512 conv1 rows per step, block rows % 8 == 0."""
    limit = max(1, 512 // max(1, rows_per_image))
    for bn in range(min(n, limit), 0, -1):
        if n % bn == 0 and (bn * rows_per_image) % 8 == 0:
            return bn
    return n  # single block == full array dims -> no divisibility constraint


def extract_patches(x_nhwc, kh, kw, stride):
    """(N,H,W,C) -> (N,Ho,Wo,C*kh*kw) as ONE fused XLA op (conv1 im2col)."""
    return lax.conv_general_dilated_patches(
        x_nhwc, filter_shape=(kh, kw), window_strides=(stride, stride),
        padding="VALID", dimension_numbers=("NHWC", "HWIO", "NHWC"))


# ----------------------------------------------------------------------------
# The single fused kernel.
# ----------------------------------------------------------------------------
def _dqn_kernel(x_ref, w1_ref, b1_ref,
                s2_ref, w2_ref, b2_ref,
                s3_ref, w3_ref, b3_ref,
                s4_ref, w4_ref, b4_ref,
                w5_ref, b5_ref, o_ref):
    f32 = jnp.float32

    # conv1: im2col patches (built in the wrapper) @ flattened weight, +b, ReLU
    h = jnp.dot(x_ref[...], w1_ref[...], preferred_element_type=f32) + b1_ref[...]
    h = jnp.maximum(h, 0.0).astype(jnp.bfloat16)

    # conv2, conv3 and fc1 (fc1 over the flatten == a conv with kernel h3 x w3):
    # each layer = sum over kernel offsets g of (S_g @ h) @ W_g, then +b, ReLU.
    # S_g are constant 0/1 row-selection matrices -> patch extraction is pure
    # MXU matmuls, no in-kernel gathers / strided slices / transposes.
    for s_ref, w_ref, b_ref in ((s2_ref, w2_ref, b2_ref),
                                (s3_ref, w3_ref, b3_ref),
                                (s4_ref, w4_ref, b4_ref)):
        n_off = w_ref.shape[0]
        acc = jnp.zeros((s_ref.shape[1], w_ref.shape[2]), f32)
        for g in range(n_off):
            sub = jnp.dot(s_ref[g], h, preferred_element_type=f32)
            acc = acc + jnp.dot(sub.astype(jnp.bfloat16), w_ref[g],
                                preferred_element_type=f32)
        h = jnp.maximum(acc + b_ref[...], 0.0).astype(jnp.bfloat16)

    # fc2 (no ReLU), lane-dense f32 output
    o_ref[...] = jnp.dot(h, w5_ref[...], preferred_element_type=f32) + b5_ref[...]


# ----------------------------------------------------------------------------
# One-time parameter preparation (padding / flattening / selections at init).
# ----------------------------------------------------------------------------
def _flatten_conv1_weight(w):
    """(Cout,Cin,kh,kw) -> (Cout, Cin*kh*kw), ordered exactly like
    conv_general_dilated_patches (same helper used on weights & activations)."""
    cout, cin, kh, kw = w.shape
    w_nhwc = jnp.transpose(w, (0, 2, 3, 1))
    return extract_patches(w_nhwc, kh, kw, 1).reshape(cout, cin * kh * kw)


def _offset_weight_stack(w, cin_pad, cout_pad):
    """(Cout,Cin,kh,kw) -> (kh*kw, cin_pad, cout_pad) bf16, g = dh*kw + dw."""
    cout, cin, kh, kw = w.shape
    wg = jnp.transpose(w, (2, 3, 1, 0)).reshape(kh * kw, cin, cout)
    out = jnp.zeros((kh * kw, cin_pad, cout_pad), jnp.float32)
    out = out.at[:, :cin, :cout].set(wg)
    return out.astype(jnp.bfloat16)


def _fc1_weight_stack(fc1_w, c3, h3, w3, cin_pad):
    """fc1 over the NCHW flatten of conv3 == a conv with kernel (h3,w3)."""
    hidden = fc1_w.shape[0]
    wr = fc1_w.reshape(hidden, c3, h3, w3)
    wg = jnp.transpose(wr, (2, 3, 1, 0)).reshape(h3 * w3, c3, hidden)
    out = jnp.zeros((h3 * w3, cin_pad, hidden), jnp.float32)
    out = out.at[:, :c3, :].set(wg)
    return out.astype(jnp.bfloat16)


def _conv_selection(nb, hin, win, kh, kw, stride, m_in, m_out):
    """0/1 selection matrices (kh*kw, m_out, m_in): for kernel offset (dh,dw),
    output row (n,ho,wo) picks input row (n, ho*s+dh, wo*s+dw)."""
    ho = (hin - kh) // stride + 1
    wo = (win - kw) // stride + 1
    sel = np.zeros((kh * kw, m_out, m_in), np.float32)
    for n in range(nb):
        for oh in range(ho):
            for ow in range(wo):
                r = n * ho * wo + oh * wo + ow
                for dh in range(kh):
                    for dw in range(kw):
                        rin = (n * hin * win + (oh * stride + dh) * win
                               + (ow * stride + dw))
                        sel[dh * kw + dw, r, rin] = 1.0
    return jnp.asarray(sel, jnp.bfloat16)


def prepare_params(raw, input_shape, num_actions, batch):
    cin, hin, win = input_shape
    ho1, wo1 = (hin - 8) // 4 + 1, (win - 8) // 4 + 1
    ho2, wo2 = (ho1 - 4) // 2 + 1, (wo1 - 4) // 2 + 1
    ho3, wo3 = (ho2 - 3) // 1 + 1, (wo2 - 3) // 1 + 1
    k1 = cin * 8 * 8
    c1p = c2p = c3p = LANE                     # pad all conv channels to 128
    hidden = raw["fc1_w"].shape[0]
    a_pad = _ceil_to(num_actions, LANE)

    block_n = _choose_block_n(batch, ho1 * wo1)
    m1b = block_n * ho1 * wo1
    m2p = _ceil_to(block_n * ho2 * wo2, 16)
    m3p = _ceil_to(block_n * ho3 * wo3, 16)
    out_rows_pb = _ceil_to(block_n, 8)

    w1 = _pad2(_flatten_conv1_weight(raw["conv1_w"]).T, k1, c1p).astype(jnp.bfloat16)
    b1 = _pad2(raw["conv1_b"].reshape(1, -1), 1, c1p).astype(jnp.float32)

    w2 = _offset_weight_stack(raw["conv2_w"], c1p, c2p)
    b2 = _pad2(raw["conv2_b"].reshape(1, -1), 1, c2p).astype(jnp.float32)
    s2 = _conv_selection(block_n, ho1, wo1, 4, 4, 2, m1b, m2p)

    w3 = _offset_weight_stack(raw["conv3_w"], c2p, c3p)
    b3 = _pad2(raw["conv3_b"].reshape(1, -1), 1, c3p).astype(jnp.float32)
    s3 = _conv_selection(block_n, ho2, wo2, 3, 3, 1, m2p, m3p)

    w4 = _fc1_weight_stack(raw["fc1_w"], raw["conv3_w"].shape[0], ho3, wo3, c3p)
    b4 = raw["fc1_b"].reshape(1, hidden).astype(jnp.float32)
    s4 = _conv_selection(block_n, ho3, wo3, ho3, wo3, 1, m3p, out_rows_pb)

    w5 = _pad2(raw["fc2_w"].T, hidden, a_pad).astype(jnp.bfloat16)
    b5 = _pad2(raw["fc2_b"].reshape(1, -1), 1, a_pad).astype(jnp.float32)

    kparams = dict(w1=w1, b1=b1, s2=s2, w2=w2, b2=b2, s3=s3, w3=w3, b3=b3,
                   s4=s4, w4=w4, b4=b4, w5=w5, b5=b5)
    cfg = dict(num_actions=num_actions, block_n=block_n, cin=cin, hin=hin,
               win=win, ho1=ho1, wo1=wo1, k1=k1, ksize1=8, stride1=4,
               out_rows_pb=out_rows_pb, a_pad=a_pad)
    return kparams, cfg


# ----------------------------------------------------------------------------
# Forward: one conv1-patches op + ONE pallas_call + output un-padding.
# ----------------------------------------------------------------------------
_PARAM_NAMES = ("w1", "b1", "s2", "w2", "b2", "s3", "w3", "b3",
                "s4", "w4", "b4", "w5", "b5")


def dqn_forward(x_nchw, kp, *, cfg):
    n, cin, hin, win = x_nchw.shape
    assert (cin, hin, win) == (cfg["cin"], cfg["hin"], cfg["win"])
    bn = cfg["block_n"]
    assert n % bn == 0, "batch must be a multiple of the prepared block size"
    n_blocks = n // bn
    m1b = bn * cfg["ho1"] * cfg["wo1"]
    k1, orp, a_pad = cfg["k1"], cfg["out_rows_pb"], cfg["a_pad"]

    # conv1 im2col on the raw input (one fused XLA op), reshape + bf16 cast.
    # K is passed unpadded as a full-extent block; no activation padding ops.
    x = jnp.transpose(x_nchw, (0, 2, 3, 1))
    xp = extract_patches(x, cfg["ksize1"], cfg["ksize1"], cfg["stride1"])
    xp = xp.reshape(n_blocks * m1b, k1).astype(jnp.bfloat16)

    def _const_spec(arr):
        zeros = (0,) * arr.ndim
        return pl.BlockSpec(arr.shape, lambda i, z=zeros: z)

    in_specs = [pl.BlockSpec((m1b, k1), lambda i: (i, 0))]
    in_specs += [_const_spec(kp[nm]) for nm in _PARAM_NAMES]
    operands = (xp,) + tuple(kp[nm] for nm in _PARAM_NAMES)

    # Advisory cost + right-sized VMEM limit from the actual per-step footprint.
    c1p = kp["w1"].shape[1]
    flops = 2 * m1b * k1 * c1p
    for s_nm, w_nm in (("s2", "w2"), ("s3", "w3"), ("s4", "w4")):
        g, mo, mi = kp[s_nm].shape
        ci, co = kp[w_nm].shape[1], kp[w_nm].shape[2]
        flops += 2 * g * (mo * mi * ci + mo * ci * co)
    flops += 2 * orp * kp["w5"].shape[0] * kp["w5"].shape[1]
    flops *= n_blocks
    const_bytes = sum(int(kp[nm].size) * kp[nm].dtype.itemsize
                      for nm in _PARAM_NAMES)
    out_bytes = n_blocks * orp * a_pad * 4
    step_bytes = m1b * k1 * 2 + const_bytes + orp * a_pad * 4
    vmem_limit = int(min(32 * 2**20, max(4 * 2**20, 2 * step_bytes + 2 * 2**20)))

    out = pl.pallas_call(
        _dqn_kernel,
        out_shape=jax.ShapeDtypeStruct((n_blocks * orp, a_pad), jnp.float32),
        grid=(n_blocks,),
        in_specs=in_specs,
        out_specs=pl.BlockSpec((orp, a_pad), lambda i: (i, 0)),
        compiler_params=pltpu.CompilerParams(
            dimension_semantics=("parallel",),
            vmem_limit_bytes=vmem_limit),
        cost_estimate=pl.CostEstimate(
            flops=flops, transcendentals=0,
            bytes_accessed=int(xp.size) * 2 + const_bytes + out_bytes),
    )(*operands)

    out = out.reshape(n_blocks, orp, a_pad)[:, :bn, :cfg["num_actions"]]
    return out.reshape(n, cfg["num_actions"])


# ----------------------------------------------------------------------------
# Parameter initialization (mirrors DQN.__init__ / NoisyLinear, training mode)
# ----------------------------------------------------------------------------
def _scale_noise(key, size):
    x = jax.random.normal(key, (size,), dtype=jnp.float32)
    return jnp.sign(x) * jnp.sqrt(jnp.abs(x))


def init_noisy_linear(key, in_features, out_features, std_init):
    k1, k2, k3, k4 = jax.random.split(key, 4)
    mu_range = 1.0 / math.sqrt(in_features)
    weight_mu = jax.random.uniform(k1, (out_features, in_features),
                                   minval=-mu_range, maxval=mu_range,
                                   dtype=jnp.float32)
    weight_sigma = jnp.full((out_features, in_features),
                            std_init / math.sqrt(in_features), jnp.float32)
    bias_mu = jax.random.uniform(k2, (out_features,),
                                 minval=-mu_range, maxval=mu_range,
                                 dtype=jnp.float32)
    bias_sigma = jnp.full((out_features,),
                          std_init / math.sqrt(out_features), jnp.float32)
    eps_in = _scale_noise(k3, in_features)
    eps_out = _scale_noise(k4, out_features)
    # training-mode effective parameters (PyTorch modules default to training)
    w_eff = weight_mu + weight_sigma * jnp.outer(eps_out, eps_in)
    b_eff = bias_mu + bias_sigma * eps_out
    return w_eff, b_eff


def init_conv(key, cout, cin, k):
    k1, k2 = jax.random.split(key)
    bound = 1.0 / math.sqrt(cin * k * k)
    w = jax.random.uniform(k1, (cout, cin, k, k),
                           minval=-bound, maxval=bound, dtype=jnp.float32)
    b = jax.random.uniform(k2, (cout,),
                           minval=-bound, maxval=bound, dtype=jnp.float32)
    return w, b


# ----------------------------------------------------------------------------
# Pure-JAX f32 reference (PyTorch semantics) for a sanity check
# ----------------------------------------------------------------------------
def reference_forward(x_nchw, raw):
    dn = ("NCHW", "OIHW", "NCHW")
    y = lax.conv_general_dilated(x_nchw, raw["conv1_w"], (4, 4), "VALID",
                                 dimension_numbers=dn)
    y = jnp.maximum(y + raw["conv1_b"][None, :, None, None], 0.0)
    y = lax.conv_general_dilated(y, raw["conv2_w"], (2, 2), "VALID",
                                 dimension_numbers=dn)
    y = jnp.maximum(y + raw["conv2_b"][None, :, None, None], 0.0)
    y = lax.conv_general_dilated(y, raw["conv3_w"], (1, 1), "VALID",
                                 dimension_numbers=dn)
    y = jnp.maximum(y + raw["conv3_b"][None, :, None, None], 0.0)
    y = y.reshape(y.shape[0], -1)
    y = jnp.maximum(y @ raw["fc1_w"].T + raw["fc1_b"], 0.0)
    return y @ raw["fc2_w"].T + raw["fc2_b"]


if __name__ == "__main__":
    # Smallest spatial size the conv stack supports: 36 -> 8 -> 3 -> 1.
    batch, in_ch, hw = 2, 4, 36
    num_actions = 6
    sigma_init = 0.5

    key = jax.random.PRNGKey(0)
    kx, kc1, kc2, kc3, kf1, kf2 = jax.random.split(key, 6)
    x = jax.random.normal(kx, (batch, in_ch, hw, hw), dtype=jnp.float32)

    h1 = (hw - 8) // 4 + 1
    h2 = (h1 - 4) // 2 + 1
    h3 = (h2 - 3) // 1 + 1
    feature_size = 64 * h3 * h3

    conv1_w, conv1_b = init_conv(kc1, 32, in_ch, 8)
    conv2_w, conv2_b = init_conv(kc2, 64, 32, 4)
    conv3_w, conv3_b = init_conv(kc3, 64, 64, 3)
    fc1_w, fc1_b = init_noisy_linear(kf1, feature_size, 512, sigma_init)
    fc2_w, fc2_b = init_noisy_linear(kf2, 512, num_actions, sigma_init)

    raw = dict(conv1_w=conv1_w, conv1_b=conv1_b, conv2_w=conv2_w,
               conv2_b=conv2_b, conv3_w=conv3_w, conv3_b=conv3_b,
               fc1_w=fc1_w, fc1_b=fc1_b, fc2_w=fc2_w, fc2_b=fc2_b)

    kparams, cfg = prepare_params(raw, (in_ch, hw, hw), num_actions, batch)

    forward = jax.jit(functools.partial(dqn_forward, cfg=cfg))
    out = jax.block_until_ready(forward(x, kparams))

    assert out.shape == (batch, num_actions), out.shape
    assert bool(jnp.all(jnp.isfinite(out)))

    ref = jax.block_until_ready(jax.jit(reference_forward)(x, raw))
    assert bool(jnp.allclose(out, ref, rtol=5e-2, atol=5e-2)), (
        float(jnp.max(jnp.abs(out - ref))))

    print("KERNEL_OK")
</pallas_src>

<mosaic_0001>
module attributes {stable_mosaic.version = 11 : i64} {
  func.func @_dqn_kernel(%arg0: i32, %arg1: memref<128x256xbf16, #tpu.memory_space<vmem>>, %arg2: memref<256x128xbf16, #tpu.memory_space<vmem>>, %arg3: memref<1x128xf32, #tpu.memory_space<vmem>>, %arg4: memref<16x32x128xbf16, #tpu.memory_space<vmem>>, %arg5: memref<16x128x128xbf16, #tpu.memory_space<vmem>>, %arg6: memref<1x128xf32, #tpu.memory_space<vmem>>, %arg7: memref<9x16x32xbf16, #tpu.memory_space<vmem>>, %arg8: memref<9x128x128xbf16, #tpu.memory_space<vmem>>, %arg9: memref<1x128xf32, #tpu.memory_space<vmem>>, %arg10: memref<1x8x16xbf16, #tpu.memory_space<vmem>>, %arg11: memref<1x128x512xbf16, #tpu.memory_space<vmem>>, %arg12: memref<1x512xf32, #tpu.memory_space<vmem>>, %arg13: memref<512x128xbf16, #tpu.memory_space<vmem>>, %arg14: memref<1x128xf32, #tpu.memory_space<vmem>>, %arg15: memref<8x128xf32, #tpu.memory_space<vmem>>) attributes {dimension_semantics = [#tpu.dimension_semantics<parallel>], iteration_bounds = array<i64: 1>, scalar_prefetch = 0 : i64, scratch_operands = 0 : i64, tpu.core_type = #tpu.core_type<tc>, window_params = [{transform_indices = @transform_0, window_bounds = array<i64: 128, 256>}, {pipeline_mode = #tpu.pipeline_mode<synchronous>, transform_indices = @transform_1, window_bounds = array<i64: 256, 128>}, {pipeline_mode = #tpu.pipeline_mode<synchronous>, transform_indices = @transform_2, window_bounds = array<i64: 1, 128>}, {pipeline_mode = #tpu.pipeline_mode<synchronous>, transform_indices = @transform_3, window_bounds = array<i64: 16, 32, 128>}, {pipeline_mode = #tpu.pipeline_mode<synchronous>, transform_indices = @transform_4, window_bounds = array<i64: 16, 128, 128>}, {pipeline_mode = #tpu.pipeline_mode<synchronous>, transform_indices = @transform_5, window_bounds = array<i64: 1, 128>}, {pipeline_mode = #tpu.pipeline_mode<synchronous>, transform_indices = @transform_6, window_bounds = array<i64: 9, 16, 32>}, {pipeline_mode = #tpu.pipeline_mode<synchronous>, transform_indices = @transform_7, window_bounds = array<i64: 9, 128, 128>}, {pipeline_mode = #tpu.pipeline_mode<synchronous>, transform_indices = @transform_8, window_bounds = array<i64: 1, 128>}, {pipeline_mode = #tpu.pipeline_mode<synchronous>, transform_indices = @transform_9, window_bounds = array<i64: 1, 8, 16>}, {pipeline_mode = #tpu.pipeline_mode<synchronous>, transform_indices = @transform_10, window_bounds = array<i64: 1, 128, 512>}, {pipeline_mode = #tpu.pipeline_mode<synchronous>, transform_indices = @transform_11, window_bounds = array<i64: 1, 512>}, {pipeline_mode = #tpu.pipeline_mode<synchronous>, transform_indices = @transform_12, window_bounds = array<i64: 512, 128>}, {pipeline_mode = #tpu.pipeline_mode<synchronous>, transform_indices = @transform_13, window_bounds = array<i64: 1, 128>}, {transform_indices = @transform_14, window_bounds = array<i64: 8, 128>}]} {
    %c0 = arith.constant 0 : index
    %c0_0 = arith.constant 0 : index
    %0 = vector.load %arg1[%c0, %c0_0] : memref<128x256xbf16, #tpu.memory_space<vmem>>, vector<128x256xbf16>
    %c0_1 = arith.constant 0 : index
    %c0_2 = arith.constant 0 : index
    %1 = vector.load %arg2[%c0_1, %c0_2] : memref<256x128xbf16, #tpu.memory_space<vmem>>, vector<256x128xbf16>
    %cst = arith.constant dense<0.000000e+00> : vector<128x128xf32>
    %2 = tpu.matmul %0, %1, %cst {dimension_numbers = #tpu.dot_dimension_numbers<[1], [0], [0], [1], [0, 0, 1, 1], [], []>} : vector<128x256xbf16>, vector<256x128xbf16>, vector<128x128xf32> -> vector<128x128xf32>
    %c0_3 = arith.constant 0 : index
    %c0_4 = arith.constant 0 : index
    %3 = vector.load %arg3[%c0_3, %c0_4] : memref<1x128xf32, #tpu.memory_space<vmem>>, vector<1x128xf32>
    %4 = vector.broadcast %3 : vector<1x128xf32> to vector<128x128xf32>
    %5 = arith.addf %2, %4 : vector<128x128xf32>
    %cst_5 = arith.constant 0.000000e+00 : f32
    %6 = vector.broadcast %cst_5 : f32 to vector<128x128xf32>
    %7 = arith.maximumf %5, %6 : vector<128x128xf32>
    %8 = arith.truncf %7 : vector<128x128xf32> to vector<128x128xbf16>
    %cst_6 = arith.constant 0.000000e+00 : f32
    %9 = vector.broadcast %cst_6 : f32 to vector<32x128xf32>
    %c0_7 = arith.constant 0 : index
    %c0_8 = arith.constant 0 : index
    %c0_9 = arith.constant 0 : index
    %10 = vector.load %arg4[%c0_7, %c0_8, %c0_9] : memref<16x32x128xbf16, #tpu.memory_space<vmem>>, vector<1x32x128xbf16>
    %11 = vector.shape_cast %10 : vector<1x32x128xbf16> to vector<32x128xbf16>
    %cst_10 = arith.constant dense<0.000000e+00> : vector<32x128xf32>
    %12 = tpu.matmul %11, %8, %cst_10 {dimension_numbers = #tpu.dot_dimension_numbers<[1], [0], [0], [1], [0, 0, 1, 1], [], []>} : vector<32x128xbf16>, vector<128x128xbf16>, vector<32x128xf32> -> vector<32x128xf32>
    %13 = arith.truncf %12 : vector<32x128xf32> to vector<32x128xbf16>
    %c0_11 = arith.constant 0 : index
    %c0_12 = arith.constant 0 : index
    %c0_13 = arith.constant 0 : index
    %14 = vector.load %arg5[%c0_11, %c0_12, %c0_13] : memref<16x128x128xbf16, #tpu.memory_space<vmem>>, vector<1x128x128xbf16>
    %15 = vector.shape_cast %14 : vector<1x128x128xbf16> to vector<128x128xbf16>
    %cst_14 = arith.constant dense<0.000000e+00> : vector<32x128xf32>
    %16 = tpu.matmul %13, %15, %cst_14 {dimension_numbers = #tpu.dot_dimension_numbers<[1], [0], [0], [1], [0, 0, 1, 1], [], []>} : vector<32x128xbf16>, vector<128x128xbf16>, vector<32x128xf32> -> vector<32x128xf32>
    %17 = arith.addf %9, %16 : vector<32x128xf32>
    %c1 = arith.constant 1 : index
    %c0_15 = arith.constant 0 : index
    %c0_16 = arith.constant 0 : index
    %18 = vector.load %arg4[%c1, %c0_15, %c0_16] : memref<16x32x128xbf16, #tpu.memory_space<vmem>>, vector<1x32x128xbf16>
    %19 = vector.shape_cast %18 : vector<1x32x128xbf16> to vector<32x128xbf16>
    %cst_17 = arith.constant dense<0.000000e+00> : vector<32x128xf32>
    %20 = tpu.matmul %19, %8, %cst_17 {dimension_numbers = #tpu.dot_dimension_numbers<[1], [0], [0], [1], [0, 0, 1, 1], [], []>} : vector<32x128xbf16>, vector<128x128xbf16>, vector<32x128xf32> -> vector<32x128xf32>
    %21 = arith.truncf %20 : vector<32x128xf32> to vector<32x128xbf16>
    %c1_18 = arith.constant 1 : index
    %c0_19 = arith.constant 0 : index
    %c0_20 = arith.constant 0 : index
    %22 = vector.load %arg5[%c1_18, %c0_19, %c0_20] : memref<16x128x128xbf16, #tpu.memory_space<vmem>>, vector<1x128x128xbf16>
    %23 = vector.shape_cast %22 : vector<1x128x128xbf16> to vector<128x128xbf16>
    %cst_21 = arith.constant dense<0.000000e+00> : vector<32x128xf32>
    %24 = tpu.matmul %21, %23, %cst_21 {dimension_numbers = #tpu.dot_dimension_numbers<[1], [0], [0], [1], [0, 0, 1, 1], [], []>} : vector<32x128xbf16>, vector<128x128xbf16>, vector<32x128xf32> -> vector<32x128xf32>
    %25 = arith.addf %17, %24 : vector<32x128xf32>
    %c2 = arith.constant 2 : index
    %c0_22 = arith.constant 0 : index
    %c0_23 = arith.constant 0 : index
    %26 = vector.load %arg4[%c2, %c0_22, %c0_23] : memref<16x32x128xbf16, #tpu.memory_space<vmem>>, vector<1x32x128xbf16>
    %27 = vector.shape_cast %26 : vector<1x32x128xbf16> to vector<32x128xbf16>
    %cst_24 = arith.constant dense<0.000000e+00> : vector<32x128xf32>
    %28 = tpu.matmul %27, %8, %cst_24 {dimension_numbers = #tpu.dot_dimension_numbers<[1], [0], [0], [1], [0, 0, 1, 1], [], []>} : vector<32x128xbf16>, vector<128x128xbf16>, vector<32x128xf32> -> vector<32x128xf32>
    %29 = arith.truncf %28 : vector<32x128xf32> to vector<32x128xbf16>
    %c2_25 = arith.constant 2 : index
    %c0_26 = arith.constant 0 : index
    %c0_27 = arith.constant 0 : index
    %30 = vector.load %arg5[%c2_25, %c0_26, %c0_27] : memref<16x128x128xbf16, #tpu.memory_space<vmem>>, vector<1x128x128xbf16>
    %31 = vector.shape_cast %30 : vector<1x128x128xbf16> to vector<128x128xbf16>
    %cst_28 = arith.constant dense<0.000000e+00> : vector<32x128xf32>
    %32 = tpu.matmul %29, %31, %cst_28 {dimension_numbers = #tpu.dot_dimension_numbers<[1], [0], [0], [1], [0, 0, 1, 1], [], []>} : vector<32x128xbf16>, vector<128x128xbf16>, vector<32x128xf32> -> vector<32x128xf32>
    %33 = arith.addf %25, %32 : vector<32x128xf32>
    %c3 = arith.constant 3 : index
    %c0_29 = arith.constant 0 : index
    %c0_30 = arith.constant 0 : index
    %34 = vector.load %arg4[%c3, %c0_29, %c0_30] : memref<16x32x128xbf16, #tpu.memory_space<vmem>>, vector<1x32x128xbf16>
    %35 = vector.shape_cast %34 : vector<1x32x128xbf16> to vector<32x128xbf16>
    %cst_31 = arith.constant dense<0.000000e+00> : vector<32x128xf32>
    %36 = tpu.matmul %35, %8, %cst_31 {dimension_numbers = #tpu.dot_dimension_numbers<[1], [0], [0], [1], [0, 0, 1, 1], [], []>} : vector<32x128xbf16>, vector<128x128xbf16>, vector<32x128xf32> -> vector<32x128xf32>
    %37 = arith.truncf %36 : vector<32x128xf32> to vector<32x128xbf16>
    %c3_32 = arith.constant 3 : index
    %c0_33 = arith.constant 0 : index
    %c0_34 = arith.constant 0 : index
    %38 = vector.load %arg5[%c3_32, %c0_33, %c0_34] : memref<16x128x128xbf16, #tpu.memory_space<vmem>>, vector<1x128x128xbf16>
    %39 = vector.shape_cast %38 : vector<1x128x128xbf16> to vector<128x128xbf16>
    %cst_35 = arith.constant dense<0.000000e+00> : vector<32x128xf32>
    %40 = tpu.matmul %37, %39, %cst_35 {dimension_numbers = #tpu.dot_dimension_numbers<[1], [0], [0], [1], [0, 0, 1, 1], [], []>} : vector<32x128xbf16>, vector<128x128xbf16>, vector<32x128xf32> -> vector<32x128xf32>
    %41 = arith.addf %33, %40 : vector<32x128xf32>
    %c4 = arith.constant 4 : index
    %c0_36 = arith.constant 0 : index
    %c0_37 = arith.constant 0 : index
    %42 = vector.load %arg4[%c4, %c0_36, %c0_37] : memref<16x32x128xbf16, #tpu.memory_space<vmem>>, vector<1x32x128xbf16>
    %43 = vector.shape_cast %42 : vector<1x32x128xbf16> to vector<32x128xbf16>
    %cst_38 = arith.constant dense<0.000000e+00> : vector<32x128xf32>
    %44 = tpu.matmul %43, %8, %cst_38 {dimension_numbers = #tpu.dot_dimension_numbers<[1], [0], [0], [1], [0, 0, 1, 1], [], []>} : vector<32x128xbf16>, vector<128x128xbf16>, vector<32x128xf32> -> vector<32x128xf32>
    %45 = arith.truncf %44 : vector<32x128xf32> to vector<32x128xbf16>
    %c4_39 = arith.constant 4 : index
    %c0_40 = arith.constant 0 : index
    %c0_41 = arith.constant 0 : index
    %46 = vector.load %arg5[%c4_39, %c0_40, %c0_41] : memref<16x128x128xbf16, #tpu.memory_space<vmem>>, vector<1x128x128xbf16>
    %47 = vector.shape_cast %46 : vector<1x128x128xbf16> to vector<128x128xbf16>
    %cst_42 = arith.constant dense<0.000000e+00> : vector<32x128xf32>
    %48 = tpu.matmul %45, %47, %cst_42 {dimension_numbers = #tpu.dot_dimension_numbers<[1], [0], [0], [1], [0, 0, 1, 1], [], []>} : vector<32x128xbf16>, vector<128x128xbf16>, vector<32x128xf32> -> vector<32x128xf32>
    %49 = arith.addf %41, %48 : vector<32x128xf32>
    %c5 = arith.constant 5 : index
    %c0_43 = arith.constant 0 : index
    %c0_44 = arith.constant 0 : index
    %50 = vector.load %arg4[%c5, %c0_43, %c0_44] : memref<16x32x128xbf16, #tpu.memory_space<vmem>>, vector<1x32x128xbf16>
    %51 = vector.shape_cast %50 : vector<1x32x128xbf16> to vector<32x128xbf16>
    %cst_45 = arith.constant dense<0.000000e+00> : vector<32x128xf32>
    %52 = tpu.matmul %51, %8, %cst_45 {dimension_numbers = #tpu.dot_dimension_numbers<[1], [0], [0], [1], [0, 0, 1, 1], [], []>} : vector<32x128xbf16>, vector<128x128xbf16>, vector<32x128xf32> -> vector<32x128xf32>
    %53 = arith.truncf %52 : vector<32x128xf32> to vector<32x128xbf16>
    %c5_46 = arith.constant 5 : index
    %c0_47 = arith.constant 0 : index
    %c0_48 = arith.constant 0 : index
    %54 = vector.load %arg5[%c5_46, %c0_47, %c0_48] : memref<16x128x128xbf16, #tpu.memory_space<vmem>>, vector<1x128x128xbf16>
    %55 = vector.shape_cast %54 : vector<1x128x128xbf16> to vector<128x128xbf16>
    %cst_49 = arith.constant dense<0.000000e+00> : vector<32x128xf32>
    %56 = tpu.matmul %53, %55, %cst_49 {dimension_numbers = #tpu.dot_dimension_numbers<[1], [0], [0], [1], [0, 0, 1, 1], [], []>} : vector<32x128xbf16>, vector<128x128xbf16>, vector<32x128xf32> -> vector<32x128xf32>
    %57 = arith.addf %49, %56 : vector<32x128xf32>
    %c6 = arith.constant 6 : index
    %c0_50 = arith.constant 0 : index
    %c0_51 = arith.constant 0 : index
    %58 = vector.load %arg4[%c6, %c0_50, %c0_51] : memref<16x32x128xbf16, #tpu.memory_space<vmem>>, vector<1x32x128xbf16>
    %59 = vector.shape_cast %58 : vector<1x32x128xbf16> to vector<32x128xbf16>
    %cst_52 = arith.constant dense<0.000000e+00> : vector<32x128xf32>
    %60 = tpu.matmul %59, %8, %cst_52 {dimension_numbers = #tpu.dot_dimension_numbers<[1], [0], [0], [1], [0, 0, 1, 1], [], []>} : vector<32x128xbf16>, vector<128x128xbf16>, vector<32x128xf32> -> vector<32x128xf32>
    %61 = arith.truncf %60 : vector<32x128xf32> to vector<32x128xbf16>
    %c6_53 = arith.constant 6 : index
    %c0_54 = arith.constant 0 : index
    %c0_55 = arith.constant 0 : index
    %62 = vector.load %arg5[%c6_53, %c0_54, %c0_55] : memref<16x128x128xbf16, #tpu.memory_space<vmem>>, vector<1x128x128xbf16>
    %63 = vector.shape_cast %62 : vector<1x128x128xbf16> to vector<128x128xbf16>
    %cst_56 = arith.constant dense<0.000000e+00> : vector<32x128xf32>
    %64 = tpu.matmul %61, %63, %cst_56 {dimension_numbers = #tpu.dot_dimension_numbers<[1], [0], [0], [1], [0, 0, 1, 1], [], []>} : vector<32x128xbf16>, vector<128x128xbf16>, vector<32x128xf32> -> vector<32x128xf32>
    %65 = arith.addf %57, %64 : vector<32x128xf32>
    %c7 = arith.constant 7 : index
    %c0_57 = arith.constant 0 : index
    %c0_58 = arith.constant 0 : index
    %66 = vector.load %arg4[%c7, %c0_57, %c0_58] : memref<16x32x128xbf16, #tpu.memory_space<vmem>>, vector<1x32x128xbf16>
    %67 = vector.shape_cast %66 : vector<1x32x128xbf16> to vector<32x128xbf16>
    %cst_59 = arith.constant dense<0.000000e+00> : vector<32x128xf32>
    %68 = tpu.matmul %67, %8, %cst_59 {dimension_numbers = #tpu.dot_dimension_numbers<[1], [0], [0], [1], [0, 0, 1, 1], [], []>} : vector<32x128xbf16>, vector<128x128xbf16>, vector<32x128xf32> -> vector<32x128xf32>
    %69 = arith.truncf %68 : vector<32x128xf32> to vector<32x128xbf16>
    %c7_60 = arith.constant 7 : index
    %c0_61 = arith.constant 0 : index
    %c0_62 = arith.constant 0 : index
    %70 = vector.load %arg5[%c7_60, %c0_61, %c0_62] : memref<16x128x128xbf16, #tpu.memory_space<vmem>>, vector<1x128x128xbf16>
    %71 = vector.shape_cast %70 : vector<1x128x128xbf16> to vector<128x128xbf16>
    %cst_63 = arith.constant dense<0.000000e+00> : vector<32x128xf32>
    %72 = tpu.matmul %69, %71, %cst_63 {dimension_numbers = #tpu.dot_dimension_numbers<[1], [0], [0], [1], [0, 0, 1, 1], [], []>} : vector<32x128xbf16>, vector<128x128xbf16>, vector<32x128xf32> -> vector<32x128xf32>
    %73 = arith.addf %65, %72 : vector<32x128xf32>
    %c8 = arith.constant 8 : index
    %c0_64 = arith.constant 0 : index
    %c0_65 = arith.constant 0 : index
    %74 = vector.load %arg4[%c8, %c0_64, %c0_65] : memref<16x32x128xbf16, #tpu.memory_space<vmem>>, vector<1x32x128xbf16>
    %75 = vector.shape_cast %74 : vector<1x32x128xbf16> to vector<32x128xbf16>
    %cst_66 = arith.constant dense<0.000000e+00> : vector<32x128xf32>
    %76 = tpu.matmul %75, %8, %cst_66 {dimension_numbers = #tpu.dot_dimension_numbers<[1], [0], [0], [1], [0, 0, 1, 1], [], []>} : vector<32x128xbf16>, vector<128x128xbf16>, vector<32x128xf32> -> vector<32x128xf32>
    %77 = arith.truncf %76 : vector<32x128xf32> to vector<32x128xbf16>
    %c8_67 = arith.constant 8 : index
    %c0_68 = arith.constant 0 : index
    %c0_69 = arith.constant 0 : index
    %78 = vector.load %arg5[%c8_67, %c0_68, %c0_69] : memref<16x128x128xbf16, #tpu.memory_space<vmem>>, vector<1x128x128xbf16>
    %79 = vector.shape_cast %78 : vector<1x128x128xbf16> to vector<128x128xbf16>
    %cst_70 = arith.constant dense<0.000000e+00> : vector<32x128xf32>
    %80 = tpu.matmul %77, %79, %cst_70 {dimension_numbers = #tpu.dot_dimension_numbers<[1], [0], [0], [1], [0, 0, 1, 1], [], []>} : vector<32x128xbf16>, vector<128x128xbf16>, vector<32x128xf32> -> vector<32x128xf32>
    %81 = arith.addf %73, %80 : vector<32x128xf32>
    %c9 = arith.constant 9 : index
    %c0_71 = arith.constant 0 : index
    %c0_72 = arith.constant 0 : index
    %82 = vector.load %arg4[%c9, %c0_71, %c0_72] : memref<16x32x128xbf16, #tpu.memory_space<vmem>>, vector<1x32x128xbf16>
    %83 = vector.shape_cast %82 : vector<1x32x128xbf16> to vector<32x128xbf16>
    %cst_73 = arith.constant dense<0.000000e+00> : vector<32x128xf32>
    %84 = tpu.matmul %83, %8, %cst_73 {dimension_numbers = #tpu.dot_dimension_numbers<[1], [0], [0], [1], [0, 0, 1, 1], [], []>} : vector<32x128xbf16>, vector<128x128xbf16>, vector<32x128xf32> -> vector<32x128xf32>
    %85 = arith.truncf %84 : vector<32x128xf32> to vector<32x128xbf16>
    %c9_74 = arith.constant 9 : index
    %c0_75 = arith.constant 0 : index
    %c0_76 = arith.constant 0 : index
    %86 = vector.load %arg5[%c9_74, %c0_75, %c0_76] : memref<16x128x128xbf16, #tpu.memory_space<vmem>>, vector<1x128x128xbf16>
    %87 = vector.shape_cast %86 : vector<1x128x128xbf16> to vector<128x128xbf16>
    %cst_77 = arith.constant dense<0.000000e+00> : vector<32x128xf32>
    %88 = tpu.matmul %85, %87, %cst_77 {dimension_numbers = #tpu.dot_dimension_numbers<[1], [0], [0], [1], [0, 0, 1, 1], [], []>} : vector<32x128xbf16>, vector<128x128xbf16>, vector<32x128xf32> -> vector<32x128xf32>
    %89 = arith.addf %81, %88 : vector<32x128xf32>
    %c10 = arith.constant 10 : index
    %c0_78 = arith.constant 0 : index
    %c0_79 = arith.constant 0 : index
    %90 = vector.load %arg4[%c10, %c0_78, %c0_79] : memref<16x32x128xbf16, #tpu.memory_space<vmem>>, vector<1x32x128xbf16>
    %91 = vector.shape_cast %90 : vector<1x32x128xbf16> to vector<32x128xbf16>
    %cst_80 = arith.constant dense<0.000000e+00> : vector<32x128xf32>
    %92 = tpu.matmul %91, %8, %cst_80 {dimension_numbers = #tpu.dot_dimension_numbers<[1], [0], [0], [1], [0, 0, 1, 1], [], []>} : vector<32x128xbf16>, vector<128x128xbf16>, vector<32x128xf32> -> vector<32x128xf32>
    %93 = arith.truncf %92 : vector<32x128xf32> to vector<32x128xbf16>
    %c10_81 = arith.constant 10 : index
    %c0_82 = arith.constant 0 : index
    %c0_83 = arith.constant 0 : index
    %94 = vector.load %arg5[%c10_81, %c0_82, %c0_83] : memref<16x128x128xbf16, #tpu.memory_space<vmem>>, vector<1x128x128xbf16>
    %95 = vector.shape_cast %94 : vector<1x128x128xbf16> to vector<128x128xbf16>
    %cst_84 = arith.constant dense<0.000000e+00> : vector<32x128xf32>
    %96 = tpu.matmul %93, %95, %cst_84 {dimension_numbers = #tpu.dot_dimension_numbers<[1], [0], [0], [1], [0, 0, 1, 1], [], []>} : vector<32x128xbf16>, vector<128x128xbf16>, vector<32x128xf32> -> vector<32x128xf32>
    %97 = arith.addf %89, %96 : vector<32x128xf32>
    %c11 = arith.constant 11 : index
    %c0_85 = arith.constant 0 : index
    %c0_86 = arith.constant 0 : index
    %98 = vector.load %arg4[%c11, %c0_85, %c0_86] : memref<16x32x128xbf16, #tpu.memory_space<vmem>>, vector<1x32x128xbf16>
    %99 = vector.shape_cast %98 : vector<1x32x128xbf16> to vector<32x128xbf16>
    %cst_87 = arith.constant dense<0.000000e+00> : vector<32x128xf32>
    %100 = tpu.matmul %99, %8, %cst_87 {dimension_numbers = #tpu.dot_dimension_numbers<[1], [0], [0], [1], [0, 0, 1, 1], [], []>} : vector<32x128xbf16>, vector<128x128xbf16>, vector<32x128xf32> -> vector<32x128xf32>
    %101 = arith.truncf %100 : vector<32x128xf32> to vector<32x128xbf16>
    %c11_88 = arith.constant 11 : index
    %c0_89 = arith.constant 0 : index
    %c0_90 = arith.constant 0 : index
    %102 = vector.load %arg5[%c11_88, %c0_89, %c0_90] : memref<16x128x128xbf16, #tpu.memory_space<vmem>>, vector<1x128x128xbf16>
    %103 = vector.shape_cast %102 : vector<1x128x128xbf16> to vector<128x128xbf16>
    %cst_91 = arith.constant dense<0.000000e+00> : vector<32x128xf32>
    %104 = tpu.matmul %101, %103, %cst_91 {dimension_numbers = #tpu.dot_dimension_numbers<[1], [0], [0], [1], [0, 0, 1, 1], [], []>} : vector<32x128xbf16>, vector<128x128xbf16>, vector<32x128xf32> -> vector<32x128xf32>
    %105 = arith.addf %97, %104 : vector<32x128xf32>
    %c12 = arith.constant 12 : index
    %c0_92 = arith.constant 0 : index
    %c0_93 = arith.constant 0 : index
    %106 = vector.load %arg4[%c12, %c0_92, %c0_93] : memref<16x32x128xbf16, #tpu.memory_space<vmem>>, vector<1x32x128xbf16>
    %107 = vector.shape_cast %106 : vector<1x32x128xbf16> to vector<32x128xbf16>
    %cst_94 = arith.constant dense<0.000000e+00> : vector<32x128xf32>
    %108 = tpu.matmul %107, %8, %cst_94 {dimension_numbers = #tpu.dot_dimension_numbers<[1], [0], [0], [1], [0, 0, 1, 1], [], []>} : vector<32x128xbf16>, vector<128x128xbf16>, vector<32x128xf32> -> vector<32x128xf32>
    %109 = arith.truncf %108 : vector<32x128xf32> to vector<32x128xbf16>
    %c12_95 = arith.constant 12 : index
    %c0_96 = arith.constant 0 : index
    %c0_97 = arith.constant 0 : index
    %110 = vector.load %arg5[%c12_95, %c0_96, %c0_97] : memref<16x128x128xbf16, #tpu.memory_space<vmem>>, vector<1x128x128xbf16>
    %111 = vector.shape_cast %110 : vector<1x128x128xbf16> to vector<128x128xbf16>
    %cst_98 = arith.constant dense<0.000000e+00> : vector<32x128xf32>
    %112 = tpu.matmul %109, %111, %cst_98 {dimension_numbers = #tpu.dot_dimension_numbers<[1], [0], [0], [1], [0, 0, 1, 1], [], []>} : vector<32x128xbf16>, vector<128x128xbf16>, vector<32x128xf32> -> vector<32x128xf32>
    %113 = arith.addf %105, %112 : vector<32x128xf32>
    %c13 = arith.constant 13 : index
    %c0_99 = arith.constant 0 : index
    %c0_100 = arith.constant 0 : index
    %114 = vector.load %arg4[%c13, %c0_99, %c0_100] : memref<16x32x128xbf16, #tpu.memory_space<vmem>>, vector<1x32x128xbf16>
    %115 = vector.shape_cast %114 : vector<1x32x128xbf16> to vector<32x128xbf16>
    %cst_101 = arith.constant dense<0.000000e+00> : vector<32x128xf32>
    %116 = tpu.matmul %115, %8, %cst_101 {dimension_numbers = #tpu.dot_dimension_numbers<[1], [0], [0], [1], [0, 0, 1, 1], [], []>} : vector<32x128xbf16>, vector<128x128xbf16>, vector<32x128xf32> -> vector<32x128xf32>
    %117 = arith.truncf %116 : vector<32x128xf32> to vector<32x128xbf16>
    %c13_102 = arith.constant 13 : index
    %c0_103 = arith.constant 0 : index
    %c0_104 = arith.constant 0 : index
    %118 = vector.load %arg5[%c13_102, %c0_103, %c0_104] : memref<16x128x128xbf16, #tpu.memory_space<vmem>>, vector<1x128x128xbf16>
    %119 = vector.shape_cast %118 : vector<1x128x128xbf16> to vector<128x128xbf16>
    %cst_105 = arith.constant dense<0.000000e+00> : vector<32x128xf32>
    %120 = tpu.matmul %117, %119, %cst_105 {dimension_numbers = #tpu.dot_dimension_numbers<[1], [0], [0], [1], [0, 0, 1, 1], [], []>} : vector<32x128xbf16>, vector<128x128xbf16>, vector<32x128xf32> -> vector<32x128xf32>
    %121 = arith.addf %113, %120 : vector<32x128xf32>
    %c14 = arith.constant 14 : index
    %c0_106 = arith.constant 0 : index
    %c0_107 = arith.constant 0 : index
    %122 = vector.load %arg4[%c14, %c0_106, %c0_107] : memref<16x32x128xbf16, #tpu.memory_space<vmem>>, vector<1x32x128xbf16>
    %123 = vector.shape_cast %122 : vector<1x32x128xbf16> to vector<32x128xbf16>
    %cst_108 = arith.constant dense<0.000000e+00> : vector<32x128xf32>
    %124 = tpu.matmul %123, %8, %cst_108 {dimension_numbers = #tpu.dot_dimension_numbers<[1], [0], [0], [1], [0, 0, 1, 1], [], []>} : vector<32x128xbf16>, vector<128x128xbf16>, vector<32x128xf32> -> vector<32x128xf32>
    %125 = arith.truncf %124 : vector<32x128xf32> to vector<32x128xbf16>
    %c14_109 = arith.constant 14 : index
    %c0_110 = arith.constant 0 : index
    %c0_111 = arith.constant 0 : index
    %126 = vector.load %arg5[%c14_109, %c0_110, %c0_111] : memref<16x128x128xbf16, #tpu.memory_space<vmem>>, vector<1x128x128xbf16>
    %127 = vector.shape_cast %126 : vector<1x128x128xbf16> to vector<128x128xbf16>
    %cst_112 = arith.constant dense<0.000000e+00> : vector<32x128xf32>
    %128 = tpu.matmul %125, %127, %cst_112 {dimension_numbers = #tpu.dot_dimension_numbers<[1], [0], [0], [1], [0, 0, 1, 1], [], []>} : vector<32x128xbf16>, vector<128x128xbf16>, vector<32x128xf32> -> vector<32x128xf32>
    %129 = arith.addf %121, %128 : vector<32x128xf32>
    %c15 = arith.constant 15 : index
    %c0_113 = arith.constant 0 : index
    %c0_114 = arith.constant 0 : index
    %130 = vector.load %arg4[%c15, %c0_113, %c0_114] : memref<16x32x128xbf16, #tpu.memory_space<vmem>>, vector<1x32x128xbf16>
    %131 = vector.shape_cast %130 : vector<1x32x128xbf16> to vector<32x128xbf16>
    %cst_115 = arith.constant dense<0.000000e+00> : vector<32x128xf32>
    %132 = tpu.matmul %131, %8, %cst_115 {dimension_numbers = #tpu.dot_dimension_numbers<[1], [0], [0], [1], [0, 0, 1, 1], [], []>} : vector<32x128xbf16>, vector<128x128xbf16>, vector<32x128xf32> -> vector<32x128xf32>
    %133 = arith.truncf %132 : vector<32x128xf32> to vector<32x128xbf16>
    %c15_116 = arith.constant 15 : index
    %c0_117 = arith.constant 0 : index
    %c0_118 = arith.constant 0 : index
    %134 = vector.load %arg5[%c15_116, %c0_117, %c0_118] : memref<16x128x128xbf16, #tpu.memory_space<vmem>>, vector<1x128x128xbf16>
    %135 = vector.shape_cast %134 : vector<1x128x128xbf16> to vector<128x128xbf16>
    %cst_119 = arith.constant dense<0.000000e+00> : vector<32x128xf32>
    %136 = tpu.matmul %133, %135, %cst_119 {dimension_numbers = #tpu.dot_dimension_numbers<[1], [0], [0], [1], [0, 0, 1, 1], [], []>} : vector<32x128xbf16>, vector<128x128xbf16>, vector<32x128xf32> -> vector<32x128xf32>
    %137 = arith.addf %129, %136 : vector<32x128xf32>
    %c0_120 = arith.constant 0 : index
    %c0_121 = arith.constant 0 : index
    %138 = vector.load %arg6[%c0_120, %c0_121] : memref<1x128xf32, #tpu.memory_space<vmem>>, vector<1x128xf32>
    %139 = vector.broadcast %138 : vector<1x128xf32> to vector<32x128xf32>
    %140 = arith.addf %137, %139 : vector<32x128xf32>
    %cst_122 = arith.constant 0.000000e+00 : f32
    %141 = vector.broadcast %cst_122 : f32 to vector<32x128xf32>
    %142 = arith.maximumf %140, %141 : vector<32x128xf32>
    %143 = arith.truncf %142 : vector<32x128xf32> to vector<32x128xbf16>
    %cst_123 = arith.constant 0.000000e+00 : f32
    %144 = vector.broadcast %cst_123 : f32 to vector<16x128xf32>
    %c0_124 = arith.constant 0 : index
    %c0_125 = arith.constant 0 : index
    %c0_126 = arith.constant 0 : index
    %145 = vector.load %arg7[%c0_124, %c0_125, %c0_126] : memref<9x16x32xbf16, #tpu.memory_space<vmem>>, vector<1x16x32xbf16>
    %146 = vector.shape_cast %145 : vector<1x16x32xbf16> to vector<16x32xbf16>
    %cst_127 = arith.constant dense<0.000000e+00> : vector<16x128xf32>
    %147 = tpu.matmul %146, %143, %cst_127 {dimension_numbers = #tpu.dot_dimension_numbers<[1], [0], [0], [1], [0, 0, 1, 1], [], []>} : vector<16x32xbf16>, vector<32x128xbf16>, vector<16x128xf32> -> vector<16x128xf32>
    %148 = arith.truncf %147 : vector<16x128xf32> to vector<16x128xbf16>
    %c0_128 = arith.constant 0 : index
    %c0_129 = arith.constant 0 : index
    %c0_130 = arith.constant 0 : index
    %149 = vector.load %arg8[%c0_128, %c0_129, %c0_130] : memref<9x128x128xbf16, #tpu.memory_space<vmem>>, vector<1x128x128xbf16>
    %150 = vector.shape_cast %149 : vector<1x128x128xbf16> to vector<128x128xbf16>
    %cst_131 = arith.constant dense<0.000000e+00> : vector<16x128xf32>
    %151 = tpu.matmul %148, %150, %cst_131 {dimension_numbers = #tpu.dot_dimension_numbers<[1], [0], [0], [1], [0, 0, 1, 1], [], []>} : vector<16x128xbf16>, vector<128x128xbf16>, vector<16x128xf32> -> vector<16x128xf32>
    %152 = arith.addf %144, %151 : vector<16x128xf32>
    %c1_132 = arith.constant 1 : index
    %c0_133 = arith.constant 0 : index
    %c0_134 = arith.constant 0 : index
    %153 = vector.load %arg7[%c1_132, %c0_133, %c0_134] : memref<9x16x32xbf16, #tpu.memory_space<vmem>>, vector<1x16x32xbf16>
    %154 = vector.shape_cast %153 : vector<1x16x32xbf16> to vector<16x32xbf16>
    %cst_135 = arith.constant dense<0.000000e+00> : vector<16x128xf32>
    %155 = tpu.matmul %154, %143, %cst_135 {dimension_numbers = #tpu.dot_dimension_numbers<[1], [0], [0], [1], [0, 0, 1, 1], [], []>} : vector<16x32xbf16>, vector<32x128xbf16>, vector<16x128xf32> -> vector<16x128xf32>
    %156 = arith.truncf %155 : vector<16x128xf32> to vector<16x128xbf16>
    %c1_136 = arith.constant 1 : index
    %c0_137 = arith.constant 0 : index
    %c0_138 = arith.constant 0 : index
    %157 = vector.load %arg8[%c1_136, %c0_137, %c0_138] : memref<9x128x128xbf16, #tpu.memory_space<vmem>>, vector<1x128x128xbf16>
    %158 = vector.shape_cast %157 : vector<1x128x128xbf16> to vector<128x128xbf16>
    %cst_139 = arith.constant dense<0.000000e+00> : vector<16x128xf32>
    %159 = tpu.matmul %156, %158, %cst_139 {dimension_numbers = #tpu.dot_dimension_numbers<[1], [0], [0], [1], [0, 0, 1, 1], [], []>} : vector<16x128xbf16>, vector<128x128xbf16>, vector<16x128xf32> -> vector<16x128xf32>
    %160 = arith.addf %152, %159 : vector<16x128xf32>
    %c2_140 = arith.constant 2 : index
    %c0_141 = arith.constant 0 : index
    %c0_142 = arith.constant 0 : index
    %161 = vector.load %arg7[%c2_140, %c0_141, %c0_142] : memref<9x16x32xbf16, #tpu.memory_space<vmem>>, vector<1x16x32xbf16>
    %162 = vector.shape_cast %161 : vector<1x16x32xbf16> to vector<16x32xbf16>
    %cst_143 = arith.constant dense<0.000000e+00> : vector<16x128xf32>
    %163 = tpu.matmul %162, %143, %cst_143 {dimension_numbers = #tpu.dot_dimension_numbers<[1], [0], [0], [1], [0, 0, 1, 1], [], []>} : vector<16x32xbf16>, vector<32x128xbf16>, vector<16x128xf32> -> vector<16x128xf32>
    %164 = arith.truncf %163 : vector<16x128xf32> to vector<16x128xbf16>
    %c2_144 = arith.constant 2 : index
    %c0_145 = arith.constant 0 : index
    %c0_146 = arith.constant 0 : index
    %165 = vector.load %arg8[%c2_144, %c0_145, %c0_146] : memref<9x128x128xbf16, #tpu.memory_space<vmem>>, vector<1x128x128xbf16>
    %166 = vector.shape_cast %165 : vector<1x128x128xbf16> to vector<128x128xbf16>
    %cst_147 = arith.constant dense<0.000000e+00> : vector<16x128xf32>
    %167 = tpu.matmul %164, %166, %cst_147 {dimension_numbers = #tpu.dot_dimension_numbers<[1], [0], [0], [1], [0, 0, 1, 1], [], []>} : vector<16x128xbf16>, vector<128x128xbf16>, vector<16x128xf32> -> vector<16x128xf32>
    %168 = arith.addf %160, %167 : vector<16x128xf32>
    %c3_148 = arith.constant 3 : index
    %c0_149 = arith.constant 0 : index
    %c0_150 = arith.constant 0 : index
    %169 = vector.load %arg7[%c3_148, %c0_149, %c0_150] : memref<9x16x32xbf16, #tpu.memory_space<vmem>>, vector<1x16x32xbf16>
    %170 = vector.shape_cast %169 : vector<1x16x32xbf16> to vector<16x32xbf16>
    %cst_151 = arith.constant dense<0.000000e+00> : vector<16x128xf32>
    %171 = tpu.matmul %170, %143, %cst_151 {dimension_numbers = #tpu.dot_dimension_numbers<[1], [0], [0], [1], [0, 0, 1, 1], [], []>} : vector<16x32xbf16>, vector<32x128xbf16>, vector<16x128xf32> -> vector<16x128xf32>
    %172 = arith.truncf %171 : vector<16x128xf32> to vector<16x128xbf16>
    %c3_152 = arith.constant 3 : index
    %c0_153 = arith.constant 0 : index
    %c0_154 = arith.constant 0 : index
    %173 = vector.load %arg8[%c3_152, %c0_153, %c0_154] : memref<9x128x128xbf16, #tpu.memory_space<vmem>>, vector<1x128x128xbf16>
    %174 = vector.shape_cast %173 : vector<1x128x128xbf16> to vector<128x128xbf16>
    %cst_155 = arith.constant dense<0.000000e+00> : vector<16x128xf32>
    %175 = tpu.matmul %172, %174, %cst_155 {dimension_numbers = #tpu.dot_dimension_numbers<[1], [0], [0], [1], [0, 0, 1, 1], [], []>} : vector<16x128xbf16>, vector<128x128xbf16>, vector<16x128xf32> -> vector<16x128xf32>
    %176 = arith.addf %168, %175 : vector<16x128xf32>
    %c4_156 = arith.constant 4 : index
    %c0_157 = arith.constant 0 : index
    %c0_158 = arith.constant 0 : index
    %177 = vector.load %arg7[%c4_156, %c0_157, %c0_158] : memref<9x16x32xbf16, #tpu.memory_space<vmem>>, vector<1x16x32xbf16>
    %178 = vector.shape_cast %177 : vector<1x16x32xbf16> to vector<16x32xbf16>
    %cst_159 = arith.constant dense<0.000000e+00> : vector<16x128xf32>
    %179 = tpu.matmul %178, %143, %cst_159 {dimension_numbers = #tpu.dot_dimension_numbers<[1], [0], [0], [1], [0, 0, 1, 1], [], []>} : vector<16x32xbf16>, vector<32x128xbf16>, vector<16x128xf32> -> vector<16x128xf32>
    %180 = arith.truncf %179 : vector<16x128xf32> to vector<16x128xbf16>
    %c4_160 = arith.constant 4 : index
    %c0_161 = arith.constant 0 : index
    %c0_162 = arith.constant 0 : index
    %181 = vector.load %arg8[%c4_160, %c0_161, %c0_162] : memref<9x128x128xbf16, #tpu.memory_space<vmem>>, vector<1x128x128xbf16>
    %182 = vector.shape_cast %181 : vector<1x128x128xbf16> to vector<128x128xbf16>
    %cst_163 = arith.constant dense<0.000000e+00> : vector<16x128xf32>
    %183 = tpu.matmul %180, %182, %cst_163 {dimension_numbers = #tpu.dot_dimension_numbers<[1], [0], [0], [1], [0, 0, 1, 1], [], []>} : vector<16x128xbf16>, vector<128x128xbf16>, vector<16x128xf32> -> vector<16x128xf32>
    %184 = arith.addf %176, %183 : vector<16x128xf32>
    %c5_164 = arith.constant 5 : index
    %c0_165 = arith.constant 0 : index
    %c0_166 = arith.constant 0 : index
    %185 = vector.load %arg7[%c5_164, %c0_165, %c0_166] : memref<9x16x32xbf16, #tpu.memory_space<vmem>>, vector<1x16x32xbf16>
    %186 = vector.shape_cast %185 : vector<1x16x32xbf16> to vector<16x32xbf16>
    %cst_167 = arith.constant dense<0.000000e+00> : vector<16x128xf32>
    %187 = tpu.matmul %186, %143, %cst_167 {dimension_numbers = #tpu.dot_dimension_numbers<[1], [0], [0], [1], [0, 0, 1, 1], [], []>} : vector<16x32xbf16>, vector<32x128xbf16>, vector<16x128xf32> -> vector<16x128xf32>
    %188 = arith.truncf %187 : vector<16x128xf32> to vector<16x128xbf16>
    %c5_168 = arith.constant 5 : index
    %c0_169 = arith.constant 0 : index
    %c0_170 = arith.constant 0 : index
    %189 = vector.load %arg8[%c5_168, %c0_169, %c0_170] : memref<9x128x128xbf16, #tpu.memory_space<vmem>>, vector<1x128x128xbf16>
    %190 = vector.shape_cast %189 : vector<1x128x128xbf16> to vector<128x128xbf16>
    %cst_171 = arith.constant dense<0.000000e+00> : vector<16x128xf32>
    %191 = tpu.matmul %188, %190, %cst_171 {dimension_numbers = #tpu.dot_dimension_numbers<[1], [0], [0], [1], [0, 0, 1, 1], [], []>} : vector<16x128xbf16>, vector<128x128xbf16>, vector<16x128xf32> -> vector<16x128xf32>
    %192 = arith.addf %184, %191 : vector<16x128xf32>
    %c6_172 = arith.constant 6 : index
    %c0_173 = arith.constant 0 : index
    %c0_174 = arith.constant 0 : index
    %193 = vector.load %arg7[%c6_172, %c0_173, %c0_174] : memref<9x16x32xbf16, #tpu.memory_space<vmem>>, vector<1x16x32xbf16>
    %194 = vector.shape_cast %193 : vector<1x16x32xbf16> to vector<16x32xbf16>
    %cst_175 = arith.constant dense<0.000000e+00> : vector<16x128xf32>
    %195 = tpu.matmul %194, %143, %cst_175 {dimension_numbers = #tpu.dot_dimension_numbers<[1], [0], [0], [1], [0, 0, 1, 1], [], []>} : vector<16x32xbf16>, vector<32x128xbf16>, vector<16x128xf32> -> vector<16x128xf32>
    %196 = arith.truncf %195 : vector<16x128xf32> to vector<16x128xbf16>
    %c6_176 = arith.constant 6 : index
    %c0_177 = arith.constant 0 : index
    %c0_178 = arith.constant 0 : index
    %197 = vector.load %arg8[%c6_176, %c0_177, %c0_178] : memref<9x128x128xbf16, #tpu.memory_space<vmem>>, vector<1x128x128xbf16>
    %198 = vector.shape_cast %197 : vector<1x128x128xbf16> to vector<128x128xbf16>
    %cst_179 = arith.constant dense<0.000000e+00> : vector<16x128xf32>
    %199 = tpu.matmul %196, %198, %cst_179 {dimension_numbers = #tpu.dot_dimension_numbers<[1], [0], [0], [1], [0, 0, 1, 1], [], []>} : vector<16x128xbf16>, vector<128x128xbf16>, vector<16x128xf32> -> vector<16x128xf32>
    %200 = arith.addf %192, %199 : vector<16x128xf32>
    %c7_180 = arith.constant 7 : index
    %c0_181 = arith.constant 0 : index
    %c0_182 = arith.constant 0 : index
    %201 = vector.load %arg7[%c7_180, %c0_181, %c0_182] : memref<9x16x32xbf16, #tpu.memory_space<vmem>>, vector<1x16x32xbf16>
    %202 = vector.shape_cast %201 : vector<1x16x32xbf16> to vector<16x32xbf16>
    %cst_183 = arith.constant dense<0.000000e+00> : vector<16x128xf32>
    %203 = tpu.matmul %202, %143, %cst_183 {dimension_numbers = #tpu.dot_dimension_numbers<[1], [0], [0], [1], [0, 0, 1, 1], [], []>} : vector<16x32xbf16>, vector<32x128xbf16>, vector<16x128xf32> -> vector<16x128xf32>
    %204 = arith.truncf %203 : vector<16x128xf32> to vector<16x128xbf16>
    %c7_184 = arith.constant 7 : index
    %c0_185 = arith.constant 0 : index
    %c0_186 = arith.constant 0 : index
    %205 = vector.load %arg8[%c7_184, %c0_185, %c0_186] : memref<9x128x128xbf16, #tpu.memory_space<vmem>>, vector<1x128x128xbf16>
    %206 = vector.shape_cast %205 : vector<1x128x128xbf16> to vector<128x128xbf16>
    %cst_187 = arith.constant dense<0.000000e+00> : vector<16x128xf32>
    %207 = tpu.matmul %204, %206, %cst_187 {dimension_numbers = #tpu.dot_dimension_numbers<[1], [0], [0], [1], [0, 0, 1, 1], [], []>} : vector<16x128xbf16>, vector<128x128xbf16>, vector<16x128xf32> -> vector<16x128xf32>
    %208 = arith.addf %200, %207 : vector<16x128xf32>
    %c8_188 = arith.constant 8 : index
    %c0_189 = arith.constant 0 : index
    %c0_190 = arith.constant 0 : index
    %209 = vector.load %arg7[%c8_188, %c0_189, %c0_190] : memref<9x16x32xbf16, #tpu.memory_space<vmem>>, vector<1x16x32xbf16>
    %210 = vector.shape_cast %209 : vector<1x16x32xbf16> to vector<16x32xbf16>
    %cst_191 = arith.constant dense<0.000000e+00> : vector<16x128xf32>
    %211 = tpu.matmul %210, %143, %cst_191 {dimension_numbers = #tpu.dot_dimension_numbers<[1], [0], [0], [1], [0, 0, 1, 1], [], []>} : vector<16x32xbf16>, vector<32x128xbf16>, vector<16x128xf32> -> vector<16x128xf32>
    %212 = arith.truncf %211 : vector<16x128xf32> to vector<16x128xbf16>
    %c8_192 = arith.constant 8 : index
    %c0_193 = arith.constant 0 : index
    %c0_194 = arith.constant 0 : index
    %213 = vector.load %arg8[%c8_192, %c0_193, %c0_194] : memref<9x128x128xbf16, #tpu.memory_space<vmem>>, vector<1x128x128xbf16>
    %214 = vector.shape_cast %213 : vector<1x128x128xbf16> to vector<128x128xbf16>
    %cst_195 = arith.constant dense<0.000000e+00> : vector<16x128xf32>
    %215 = tpu.matmul %212, %214, %cst_195 {dimension_numbers = #tpu.dot_dimension_numbers<[1], [0], [0], [1], [0, 0, 1, 1], [], []>} : vector<16x128xbf16>, vector<128x128xbf16>, vector<16x128xf32> -> vector<16x128xf32>
    %216 = arith.addf %208, %215 : vector<16x128xf32>
    %c0_196 = arith.constant 0 : index
    %c0_197 = arith.constant 0 : index
    %217 = vector.load %arg9[%c0_196, %c0_197] : memref<1x128xf32, #tpu.memory_space<vmem>>, vector<1x128xf32>
    %218 = vector.broadcast %217 : vector<1x128xf32> to vector<16x128xf32>
    %219 = arith.addf %216, %218 : vector<16x128xf32>
    %cst_198 = arith.constant 0.000000e+00 : f32
    %220 = vector.broadcast %cst_198 : f32 to vector<16x128xf32>
    %221 = arith.maximumf %219, %220 : vector<16x128xf32>
    %222 = arith.truncf %221 : vector<16x128xf32> to vector<16x128xbf16>
    %cst_199 = arith.constant 0.000000e+00 : f32
    %223 = vector.broadcast %cst_199 : f32 to vector<8x512xf32>
    %c0_200 = arith.constant 0 : index
    %c0_201 = arith.constant 0 : index
    %c0_202 = arith.constant 0 : index
    %224 = vector.load %arg10[%c0_200, %c0_201, %c0_202] : memref<1x8x16xbf16, #tpu.memory_space<vmem>>, vector<1x8x16xbf16>
    %225 = vector.shape_cast %224 : vector<1x8x16xbf16> to vector<8x16xbf16>
    %cst_203 = arith.constant dense<0.000000e+00> : vector<8x128xf32>
    %226 = tpu.matmul %225, %222, %cst_203 {dimension_numbers = #tpu.dot_dimension_numbers<[1], [0], [0], [1], [0, 0, 1, 1], [], []>} : vector<8x16xbf16>, vector<16x128xbf16>, vector<8x128xf32> -> vector<8x128xf32>
    %227 = arith.truncf %226 : vector<8x128xf32> to vector<8x128xbf16>
    %c0_204 = arith.constant 0 : index
    %c0_205 = arith.constant 0 : index
    %c0_206 = arith.constant 0 : index
    %228 = vector.load %arg11[%c0_204, %c0_205, %c0_206] : memref<1x128x512xbf16, #tpu.memory_space<vmem>>, vector<1x128x512xbf16>
    %229 = vector.shape_cast %228 : vector<1x128x512xbf16> to vector<128x512xbf16>
    %cst_207 = arith.constant dense<0.000000e+00> : vector<8x512xf32>
    %230 = tpu.matmul %227, %229, %cst_207 {dimension_numbers = #tpu.dot_dimension_numbers<[1], [0], [0], [1], [0, 0, 1, 1], [], []>} : vector<8x128xbf16>, vector<128x512xbf16>, vector<8x512xf32> -> vector<8x512xf32>
    %231 = arith.addf %223, %230 : vector<8x512xf32>
    %c0_208 = arith.constant 0 : index
    %c0_209 = arith.constant 0 : index
    %232 = vector.load %arg12[%c0_208, %c0_209] : memref<1x512xf32, #tpu.memory_space<vmem>>, vector<1x512xf32>
    %233 = vector.broadcast %232 : vector<1x512xf32> to vector<8x512xf32>
    %234 = arith.addf %231, %233 : vector<8x512xf32>
    %cst_210 = arith.constant 0.000000e+00 : f32
    %235 = vector.broadcast %cst_210 : f32 to vector<8x512xf32>
    %236 = arith.maximumf %234, %235 : vector<8x512xf32>
    %237 = arith.truncf %236 : vector<8x512xf32> to vector<8x512xbf16>
    %c0_211 = arith.constant 0 : index
    %c0_212 = arith.constant 0 : index
    %238 = vector.load %arg13[%c0_211, %c0_212] : memref<512x128xbf16, #tpu.memory_space<vmem>>, vector<512x128xbf16>
    %cst_213 = arith.constant dense<0.000000e+00> : vector<8x128xf32>
    %239 = tpu.matmul %237, %238, %cst_213 {dimension_numbers = #tpu.dot_dimension_numbers<[1], [0], [0], [1], [0, 0, 1, 1], [], []>} : vector<8x512xbf16>, vector<512x128xbf16>, vector<8x128xf32> -> vector<8x128xf32>
    %c0_214 = arith.constant 0 : index
    %c0_215 = arith.constant 0 : index
    %240 = vector.load %arg14[%c0_214, %c0_215] : memref<1x128xf32, #tpu.memory_space<vmem>>, vector<1x128xf32>
    %241 = vector.broadcast %240 : vector<1x128xf32> to vector<8x128xf32>
    %242 = arith.addf %239, %241 : vector<8x128xf32>
    %c0_216 = arith.constant 0 : index
    %c0_217 = arith.constant 0 : index
    %243 = vector.load %arg15[%c0_216, %c0_217] : memref<8x128xf32, #tpu.memory_space<vmem>>, vector<8x128xf32>
    tpu.vector_store %arg15[%c0_216, %c0_217], %242 {strides = array<i32>} : memref<8x128xf32, #tpu.memory_space<vmem>>, vector<8x128xf32>,
    return
  }
  func.func @transform_0(%arg0: i32) -> (i32, i32) {
    %c0_i32 = arith.constant 0 : i32
    %c0_i32_0 = arith.constant 0 : i32
    return %arg0, %c0_i32 : i32, i32
  }
  func.func @transform_1(%arg0: i32) -> (i32, i32) {
    %c0_i32 = arith.constant 0 : i32
    %c0_i32_0 = arith.constant 0 : i32
    %c0_i32_1 = arith.constant 0 : i32
    return %c0_i32, %c0_i32_0 : i32, i32
  }
  func.func @transform_2(%arg0: i32) -> (i32, i32) {
    %c0_i32 = arith.constant 0 : i32
    %c0_i32_0 = arith.constant 0 : i32
    %c0_i32_1 = arith.constant 0 : i32
    return %c0_i32, %c0_i32_0 : i32, i32
  }
  func.func @transform_3(%arg0: i32) -> (i32, i32, i32) {
    %c0_i32 = arith.constant 0 : i32
    %c0_i32_0 = arith.constant 0 : i32
    %c0_i32_1 = arith.constant 0 : i32
    %c0_i32_2 = arith.constant 0 : i32
    return %c0_i32, %c0_i32_0, %c0_i32_1 : i32, i32, i32
  }
  func.func @transform_4(%arg0: i32) -> (i32, i32, i32) {
    %c0_i32 = arith.constant 0 : i32
    %c0_i32_0 = arith.constant 0 : i32
    %c0_i32_1 = arith.constant 0 : i32
    %c0_i32_2 = arith.constant 0 : i32
    return %c0_i32, %c0_i32_0, %c0_i32_1 : i32, i32, i32
  }
  func.func @transform_5(%arg0: i32) -> (i32, i32) {
    %c0_i32 = arith.constant 0 : i32
    %c0_i32_0 = arith.constant 0 : i32
    %c0_i32_1 = arith.constant 0 : i32
    return %c0_i32, %c0_i32_0 : i32, i32
  }
  func.func @transform_6(%arg0: i32) -> (i32, i32, i32) {
    %c0_i32 = arith.constant 0 : i32
    %c0_i32_0 = arith.constant 0 : i32
    %c0_i32_1 = arith.constant 0 : i32
    %c0_i32_2 = arith.constant 0 : i32
    return %c0_i32, %c0_i32_0, %c0_i32_1 : i32, i32, i32
  }
  func.func @transform_7(%arg0: i32) -> (i32, i32, i32) {
    %c0_i32 = arith.constant 0 : i32
    %c0_i32_0 = arith.constant 0 : i32
    %c0_i32_1 = arith.constant 0 : i32
    %c0_i32_2 = arith.constant 0 : i32
    return %c0_i32, %c0_i32_0, %c0_i32_1 : i32, i32, i32
  }
  func.func @transform_8(%arg0: i32) -> (i32, i32) {
    %c0_i32 = arith.constant 0 : i32
    %c0_i32_0 = arith.constant 0 : i32
    %c0_i32_1 = arith.constant 0 : i32
    return %c0_i32, %c0_i32_0 : i32, i32
  }
  func.func @transform_9(%arg0: i32) -> (i32, i32, i32) {
    %c0_i32 = arith.constant 0 : i32
    %c0_i32_0 = arith.constant 0 : i32
    %c0_i32_1 = arith.constant 0 : i32
    %c0_i32_2 = arith.constant 0 : i32
    return %c0_i32, %c0_i32_0, %c0_i32_1 : i32, i32, i32
  }
  func.func @transform_10(%arg0: i32) -> (i32, i32, i32) {
    %c0_i32 = arith.constant 0 : i32
    %c0_i32_0 = arith.constant 0 : i32
    %c0_i32_1 = arith.constant 0 : i32
    %c0_i32_2 = arith.constant 0 : i32
    return %c0_i32, %c0_i32_0, %c0_i32_1 : i32, i32, i32
  }
  func.func @transform_11(%arg0: i32) -> (i32, i32) {
    %c0_i32 = arith.constant 0 : i32
    %c0_i32_0 = arith.constant 0 : i32
    %c0_i32_1 = arith.constant 0 : i32
    return %c0_i32, %c0_i32_0 : i32, i32
  }
  func.func @transform_12(%arg0: i32) -> (i32, i32) {
    %c0_i32 = arith.constant 0 : i32
    %c0_i32_0 = arith.constant 0 : i32
    %c0_i32_1 = arith.constant 0 : i32
    return %c0_i32, %c0_i32_0 : i32, i32
  }
  func.func @transform_13(%arg0: i32) -> (i32, i32) {
    %c0_i32 = arith.constant 0 : i32
    %c0_i32_0 = arith.constant 0 : i32
    %c0_i32_1 = arith.constant 0 : i32
    return %c0_i32, %c0_i32_0 : i32, i32
  }
  func.func @transform_14(%arg0: i32) -> (i32, i32) {
    %c0_i32 = arith.constant 0 : i32
    %c0_i32_0 = arith.constant 0 : i32
    return %arg0, %c0_i32 : i32, i32
  }
}

</mosaic_0001>

<bundles_post_ra>
// kernel: dqn_forward.1
= control target key start
LH: loop header
LB: loop body
LE: loop exit
PB: predicated region body
PF: predicated region fallthrough
CT: control target
= control target key end

     0   :  { %vm8133_vm0 = vmmov 0   ;;  %vm3390_vm1 = vcmask 261120   ;;  %vm4840_vm2 = vcmask 130048   ;;  %s9738_s1 = inlined_call_operand.vmem [shape: bf16[256,128], index: 1, kind: input, shape index: {}]   ;;  %s9739_s0 = inlined_call_operand.vmem [shape: bf16[128,256], index: 0, kind: input, shape index: {}]   ;;  %s9740_s4 = inlined_call_operand.vmem [shape: bf16[16,128,128], index: 4, kind: input, shape index: {}]   ;;  %s9741_s3 = inlined_call_operand.vmem [shape: bf16[16,32,128], index: 3, kind: input, shape index: {}]   ;;  %s9742_s2 = inlined_call_operand.vmem [shape: f32[1,128], index: 2, kind: input, shape index: {}]   ;;  %s9743_s6 = inlined_call_operand.vmem [shape: bf16[9,16,32], index: 6, kind: input, shape index: {}]   ;;  %s9744_s7 = inlined_call_operand.vmem [shape: bf16[9,128,128], index: 7, kind: input, shape index: {}]   ;;  %s9745_s5 = inlined_call_operand.vmem [shape: f32[1,128], index: 5, kind: input, shape index: {}]   ;;  %s9746_s10 = inlined_call_operand.vmem [shape: bf16[1,128,512], index: 10, kind: input, shape index: {}]   ;;  %s9747_s8 = inlined_call_operand.vmem [shape: f32[1,128], index: 8, kind: input, shape index: {}]   ;;  %s9748_s9 = inlined_call_operand.vmem [shape: bf16[1,8,16], index: 9, kind: input, shape index: {}]   ;;  %s9749_s12 = inlined_call_operand.vmem [shape: bf16[512,128], index: 12, kind: input, shape index: {}]   ;;  %s9750_s11 = inlined_call_operand.vmem [shape: f32[1,512], index: 11, kind: input, shape index: {}]   ;;  %s9751_s13 = inlined_call_operand.vmem [shape: f32[1,128], index: 13, kind: input, shape index: {}]   ;;  %s9752_s14 = inlined_call_operand.vmem [shape: f32[8,128], index: 14, kind: output, shape index: {}]  }
   0x1   :  { %v7771_v0 = vld [vmem:[%s9738_s1 + $0x78] sm:$0xff]   ;;  %v7773_v2 = vld [vmem:[%s9738_s1 + $0x70] sm:$0xff]   ;;  %v7775_v4 = vld [vmem:[%s9738_s1 + $0x68] sm:$0xff]  }
   0x2   :  { %v7772_v1 = vld [vmem:[%s9738_s1 + $0x38] sm:$0xff]   ;;  %6332 = vmatprep.subr.bf16.mxu0 %v7771_v0  ;;  %v7774_v3 = vld [vmem:[%s9738_s1 + $0x30] sm:$0xff]   ;;  %v7776_v5 = vld [vmem:[%s9738_s1 + $0x28] sm:$0xff]  }
   0x3   :  { %6333 = vmatpush3.bf16.msra.mxu0 %v7772_v1  ;;  %v7777_v6 = vld [vmem:[%s9738_s1 + $0x60] sm:$0xff]   ;;  %v7779_v8 = vld [vmem:[%s9738_s1 + $0x58] sm:$0xff]   ;;  %v7781_v10 = vld [vmem:[%s9738_s1 + $0x50] sm:$0xff]  }
   0x4   :  { %6334 = vmatprep.subr.bf16.mxu0 %v7773_v2  ;;  %v7778_v7 = vld [vmem:[%s9738_s1 + $0x20] sm:$0xff]   ;;  %v7780_v9 = vld [vmem:[%s9738_s1 + $0x18] sm:$0xff]   ;;  %v7782_v12 = vld [vmem:[%s9738_s1 + $0x10] sm:$0xff]  }
   0x5   :  { %v7789_v11 = vld [vmem:[%s9739_s0 + $0x4] ss:$8 sps:$4 sm:$0xff]   ;;  %v7787_v17 = vld [vmem:[%s9739_s0] ss:$8 sps:$4 sm:$0xff]   ;;  %v7790_v18 = vld [vmem:[%s9739_s0 + $0x14] ss:$8 sps:$4 sm:$0xff]  }
   0x6   :  { %311 = vmatprep.mubr.bf16.mxu0 %v7789_v11  ;;  %v7783_v13 = vld [vmem:[%s9738_s1 + $0x48] sm:$0xff]   ;;  %v7785_v15 = vld [vmem:[%s9738_s1 + $0x40] sm:$0xff]   ;;  %v7792_v19 = vld [vmem:[%s9739_s0 + $0x10] ss:$8 sps:$4 sm:$0xff]  }
   0x7   :  { %6335 = vmatpush3.bf16.msra.mxu0 %v7774_v3  ;;  %v7784_v14 = vld [vmem:[%s9738_s1 + $0x8] sm:$0xff]   ;;  %v7786_v16 = vld [vmem:[%s9738_s1] sm:$0xff]   ;;  %v7796_v22 = vld [vmem:[%s9739_s0 + $0x34] ss:$8 sps:$4 sm:$0xff]  }
   0x8   :  { %6336 = vmatprep.subr.bf16.mxu0 %v7775_v4  ;;  %v7793_v20 = vld [vmem:[%s9739_s0 + $0x24] ss:$8 sps:$4 sm:$0xff]   ;;  %v7795_v21 = vld [vmem:[%s9739_s0 + $0x20] ss:$8 sps:$4 sm:$0xff]   ;;  %v7798_v23 = vld [vmem:[%s9739_s0 + $0x30] ss:$8 sps:$4 sm:$0xff]  }
   0x9   :  { %v7799_v24 = vld [vmem:[%s9739_s0 + $0x44] ss:$8 sps:$4 sm:$0xff]   ;;  %v7801_v25 = vld [vmem:[%s9739_s0 + $0x40] ss:$8 sps:$4 sm:$0xff]   ;;  %v7802_v26 = vld [vmem:[%s9739_s0 + $0x54] ss:$8 sps:$4 sm:$0xff]  }
   0xa   :  { %v7804_v27 = vld [vmem:[%s9739_s0 + $0x50] ss:$8 sps:$4 sm:$0xff]   ;;  %v7805_v28 = vld [vmem:[%s9739_s0 + $0x64] ss:$8 sps:$4 sm:$0xff]   ;;  %v7807_v29 = vld [vmem:[%s9739_s0 + $0x60] ss:$8 sps:$4 sm:$0xff]  }
   0xb   :  { %6337 = vmatpush3.bf16.msra.mxu0 %v7776_v5  ;;  %v7808_v30 = vld [vmem:[%s9739_s0 + $0x74] ss:$8 sps:$4 sm:$0xff]   ;;  %v7810_v31 = vld [vmem:[%s9739_s0 + $0x70] ss:$8 sps:$4 sm:$0xff]   ;;  %v7813_v34 = vld [vmem:[%s9740_s4 + $0x68] sm:$0xff]  }
   0xc   :  { %6338 = vmatprep.subr.bf16.mxu0 %v7777_v6  ;;  %v7811_v32 = vld [vmem:[%s9740_s4 + $0x78] sm:$0xff]   ;;  %v7812_v33 = vld [vmem:[%s9740_s4 + $0x70] sm:$0xff]   ;;  %v7814_v35 = vld [vmem:[%s9740_s4 + $0x60] sm:$0xff]  }
   0xd   :  { %v7815_v36 = vld [vmem:[%s9740_s4 + $0x58] sm:$0xff]   ;;  %v7816_v37 = vld [vmem:[%s9740_s4 + $0x50] sm:$0xff]   ;;  %v7817_v38 = vld [vmem:[%s9740_s4 + $0x48] sm:$0xff]  }
   0xe   :  { %v7818_v39 = vld [vmem:[%s9740_s4 + $0x40] sm:$0xff]  }
   0xf   :  { %6339 = vmatpush3.bf16.msra.mxu0 %v7778_v7  ;;  %v7819_v40 = vld [vmem:[%s9741_s3] sm:$0xff]  }
  0x10   :  { %6340 = vmatprep.subr.bf16.mxu0 %v7779_v8  ;;  %6886 = vmatprep.mubr.bf16.mxu1 %v7819_v40  ;;  %v8336_v44 = vld [vmem:[%s9742_s2] ss:$0 sm:$0xff] }
  0x13   :  { %6341 = vmatpush3.bf16.msra.mxu0 %v7780_v9 }
  0x14   :  { %6342 = vmatprep.subr.bf16.mxu0 %v7781_v10 }
  0x17   :  { %6343 = vmatpush3.bf16.msra.mxu0 %v7782_v12 }
  0x18   :  { %6344 = vmatprep.subr.bf16.mxu0 %v7783_v13 }
  0x1b   :  { %6345 = vmatpush3.bf16.msra.mxu0 %v7784_v14 }
  0x1c   :  { %6346 = vmatprep.subr.bf16.mxu0 %v7785_v15 }
  0x1f   :  { %6347 = vmatpush3.bf16.msra.mxu0 %v7786_v16 }
  0x20   :  { %6910 = vmatprep.subr.bf16.mxu0 %v7811_v32 }
  0x22   :  { %312 = vmatmul.mubr.bf16.vlgmr.msra.gmra.mxu0 %v7787_v17 }
  0x23   :  { %319 = vmatprep.mubr.bf16.mxu0 %v7790_v18  ;;  %6911 = vmatpush3.bf16.msra.mxu0 %v7811_v32 }
  0x24   :  { %6912 = vmatprep.subr.bf16.mxu0 %v7812_v33 }
  0x27   :  { %6913 = vmatpush3.bf16.msra.mxu0 %v7812_v33 }
  0x28   :  { %6914 = vmatprep.subr.bf16.mxu0 %v7813_v34 }
  0x2a   :  { %320 = vmatmul.mubr.bf16.gmra.mxu0 %v7792_v19 }
  0x2b   :  { %327 = vmatprep.mubr.bf16.mxu0 %v7793_v20  ;;  %6915 = vmatpush3.bf16.msra.mxu0 %v7813_v34 }
  0x2c   :  { %6916 = vmatprep.subr.bf16.mxu0 %v7814_v35 }
  0x2f   :  { %6917 = vmatpush3.bf16.msra.mxu0 %v7814_v35 }
  0x30   :  { %6918 = vmatprep.subr.bf16.mxu0 %v7815_v36 }
  0x32   :  { %328 = vmatmul.mubr.bf16.gmra.mxu0 %v7795_v21 }
  0x33   :  { %335 = vmatprep.mubr.bf16.mxu0 %v7796_v22  ;;  %6919 = vmatpush3.bf16.msra.mxu0 %v7815_v36 }
  0x34   :  { %6920 = vmatprep.subr.bf16.mxu0 %v7816_v37 }
  0x37   :  { %6921 = vmatpush3.bf16.msra.mxu0 %v7816_v37 }
  0x38   :  { %6922 = vmatprep.subr.bf16.mxu0 %v7817_v38 }
  0x3a   :  { %336 = vmatmul.mubr.bf16.gmra.mxu0 %v7798_v23 }
  0x3b   :  { %343 = vmatprep.mubr.bf16.mxu0 %v7799_v24  ;;  %6923 = vmatpush3.bf16.msra.mxu0 %v7817_v38 }
  0x3c   :  { %6924 = vmatprep.subr.bf16.mxu0 %v7818_v39 }
  0x3f   :  { %6925 = vmatpush3.bf16.msra.mxu0 %v7818_v39 }
  0x42   :  { %344 = vmatmul.mubr.bf16.gmra.mxu0 %v7801_v25 }
  0x43   :  { %351 = vmatprep.mubr.bf16.mxu0 %v7802_v26 }
  0x4a   :  { %352 = vmatmul.mubr.bf16.gmra.mxu0 %v7804_v27 }
  0x4b   :  { %359 = vmatprep.mubr.bf16.mxu0 %v7805_v28 }
  0x52   :  { %360 = vmatmul.mubr.bf16.gmra.mxu0 %v7807_v29 }
  0x53   :  { %367 = vmatprep.mubr.bf16.mxu0 %v7808_v30 }
  0x5a   :  { %368 = vmatmul.mubr.bf16.gmra.mxu0 %v7810_v31 }
  0xe2   :  { %v6348_v41 = vpop.f32.mrf.mxu0 }
  0xe4   :  { %v6349_v42 = vpop.f32.mrf.mxu0 }
  0xe5   :  { %v6350_v43 = vadd.f32 %v6349_v42, %v6348_v41 }
  0xe6   :  { %v6351_v45 = vpop.f32.mrf.mxu0 }
  0xe7   :  { %v314_v47 = vadd.f32 %v6350_v43, %v8336_v44 }
  0xe8   :  { %v6352_v46 = vpop.f32.mrf.mxu0 }
  0xe9   :  { %v6353_v48 = vadd.f32 %v6352_v46, %v6351_v45  ;;  %v376_v52 = vmax.f32 %v314_v47, 0.0 }
  0xea   :  { %v6354_v49 = vpop.f32.mrf.mxu0 }
  0xeb   :  { %v317_v50 = vadd.f32 %v6353_v48, %v8336_v44 }
  0xec   :  { %v6355_v51 = vpop.f32.mrf.mxu0 }
  0xed   :  { %v377_v53 = vmax.f32 %v317_v50, 0.0  ;;  %v6356_v54 = vadd.f32 %v6355_v51, %v6354_v49 }
  0xee   :  { %v6357_v55 = vpop.f32.mrf.mxu0 }
  0xef   :  { %v8340_v56 = vpack.c.bf16 %v377_v53, %v376_v52  ;;  %v322_v58 = vadd.f32 %v6356_v54, %v8336_v44 }
  0xf0   :  { %v6358_v57 = vpop.f32.mrf.mxu0 }
  0xf1   :  { %v6359_v59 = vadd.f32 %v6358_v57, %v6357_v55  ;;  %v378_v63 = vmax.f32 %v322_v58, 0.0 }
  0xf2   :  { %v8343_v60 = vpop.f32.mrf.mxu0 }
  0xf3   :  { %v325_v61 = vadd.f32 %v6359_v59, %v8336_v44 }
  0xf4   :  { %v6361_v62 = vpop.f32.mrf.mxu0 }
  0xf5   :  { %v379_v0 = vmax.f32 %v325_v61, 0.0  ;;  %v6362_v55 = vadd.f32 %v6361_v62, %v8343_v60 }
  0xf6   :  { %v6363_v1 = vpop.f32.mrf.mxu0 }
  0xf7   :  { %v8346_v2 = vpack.c.bf16 %v379_v0, %v378_v63  ;;  %v330_v0 = vadd.f32 %v6362_v55, %v8336_v44 }
  0xf8   :  { %v6364_v3 = vpop.f32.mrf.mxu0 }
  0xf9   :  { %v6365_v51 = vadd.f32 %v6364_v3, %v6363_v1  ;;  %v380_v60 = vmax.f32 %v330_v0, 0.0 }
  0xfa   :  { %v6366_v4 = vpop.f32.mrf.mxu0 }
  0xfb   :  { %v333_v59 = vadd.f32 %v6365_v51, %v8336_v44  ;;  %v7842_v51 = vld [vmem:[%s9741_s3 + $0x78] sm:$0xff]  }
  0xfc   :  { %v6367_v5 = vpop.f32.mrf.mxu0 }
  0xfd   :  { %v6368_v48 = vadd.f32 %v6367_v5, %v6366_v4  ;;  %v381_v3 = vmax.f32 %v333_v59, 0.0  ;;  %v7821_v5 = vld [vmem:[%s9741_s3 + $0x10] sm:$0xff]  }
  0xfe   :  { %v6369_v6 = vpop.f32.mrf.mxu0 }
  0xff   :  { %v338_v57 = vadd.f32 %v6368_v48, %v8336_v44  ;;  %v8381_v62 = vpack.c.bf16 %v381_v3, %v380_v60  ;;  %v7840_v48 = vld [vmem:[%s9741_s3 + $0x68] sm:$0xff]   ;;  %v7859_v60 = vld [vmem:[%s9741_s3 + $0x90] sm:$0xff]  }
 0x100   :  { %v6370_v7 = vpop.f32.mrf.mxu0  ;;  %v7850_v3 = vld [vmem:[%s9741_s3 + $0x88] sm:$0xff]  }
 0x101   :  { %v6371_v43 = vadd.f32 %v6370_v7, %v6369_v6  ;;  %v382_v1 = vmax.f32 %v338_v57, 0.0  ;;  %v7823_v6 = vld [vmem:[%s9740_s4 + $0x38] sm:$0xff]  }
 0x102   :  { %v6372_v8 = vpop.f32.mrf.mxu0  ;;  %v7822_v7 = vld [vmem:[%s9741_s3 + $0x18] sm:$0xff]  }
 0x103   :  { %v341_v52 = vadd.f32 %v6371_v43, %v8336_v44  ;;  %v8539_v43 = vld [vmem:[%s9740_s4 + $0xf8] sm:$0xff]  }
 0x104   :  { %v6373_v9 = vpop.f32.mrf.mxu0 }
 0x105   :  { %v6374_v39 = vadd.f32 %v6373_v9, %v6372_v8  ;;  %v383_v61 = vmax.f32 %v341_v52, 0.0  ;;  %v7824_v8 = vld [vmem:[%s9740_s4 + $0x30] sm:$0xff]   ;;  %v7825_v9 = vld [vmem:[%s9740_s4 + $0x28] sm:$0xff]   ;;  %v7849_v52 = vld [vmem:[%s9741_s3 + $0x80] sm:$0xff]  }
 0x106   :  { %v6375_v10 = vpop.f32.mrf.mxu0 }
 0x107   :  { %v346_v49 = vadd.f32 %v6374_v39, %v8336_v44  ;;  %v8377_v4 = vpack.c.bf16 %v383_v61, %v382_v1  ;;  %v7837_v39 = vld [vmem:[%s9741_s3 + $0x50] sm:$0xff]  }
 0x108   :  { %v6376_v11 = vpop.f32.mrf.mxu0 }
 0x109   :  { %v6377_v34 = vadd.f32 %v6376_v11, %v6375_v10  ;;  %v384_v58 = vmax.f32 %v346_v49, 0.0  ;;  %v7826_v10 = vld [vmem:[%s9740_s4 + $0x20] sm:$0xff]   ;;  %v7827_v11 = vld [vmem:[%s9740_s4 + $0x18] sm:$0xff]   ;;  %v7841_v49 = vld [vmem:[%s9741_s3 + $0x70] sm:$0xff]  }
 0x10a   :  { %v6378_v12 = vpop.f32.mrf.mxu0 }
 0x10b   :  { %v349_v45 = vadd.f32 %v6377_v34, %v8336_v44  ;;  %v7845_v34 = vld [vmem:[%s9740_s4 + $0xa8] sm:$0xff]  }
 0x10c   :  { %v6379_v13 = vpop.f32.mrf.mxu0 }
 0x10d   :  { %v6380_v31 = vadd.f32 %v6379_v13, %v6378_v12  ;;  %v385_v53 = vmax.f32 %v349_v45, 0.0  ;;  %v7828_v12 = vld [vmem:[%s9740_s4 + $0x10] sm:$0xff]   ;;  %v7829_v13 = vld [vmem:[%s9740_s4 + $0x8] sm:$0xff]   ;;  %v7838_v45 = vld [vmem:[%s9741_s3 + $0x58] sm:$0xff]  }
 0x10e   :  { %v6381_v14 = vpop.f32.mrf.mxu0 }
 0x10f   :  { %v354_v40 = vadd.f32 %v6380_v31, %v8336_v44  ;;  %v8372_v63 = vpack.c.bf16 %v385_v53, %v384_v58  ;;  %v7835_v31 = vld [vmem:[%s9741_s3 + $0x40] sm:$0xff]  }
 0x110   :  { %v6382_v15 = vpop.f32.mrf.mxu0 }
 0x111   :  { %v6383_v27 = vadd.f32 %v6382_v15, %v6381_v14  ;;  %v386_v50 = vmax.f32 %v354_v40, 0.0  ;;  %v7830_v14 = vld [vmem:[%s9740_s4] sm:$0xff]   ;;  %v7851_v40 = vld [vmem:[%s9740_s4 + $0x88] sm:$0xff]  }
 0x112   :  { %v6384_v16 = vpop.f32.mrf.mxu0 }
 0x113   :  { %v357_v35 = vadd.f32 %v6383_v27, %v8336_v44 }
 0x114   :  { %v6385_v17 = vpop.f32.mrf.mxu0 }
 0x115   :  { %v6386_v25 = vadd.f32 %v6385_v17, %v6384_v16  ;;  %v387_v46 = vmax.f32 %v357_v35, 0.0  ;;  %v7846_v35 = vld [vmem:[%s9740_s4 + $0xa0] sm:$0xff]  }
 0x116   :  { %v6387_v18 = vpop.f32.mrf.mxu0 }
 0x117   :  { %v362_v32 = vadd.f32 %v6386_v25, %v8336_v44  ;;  %v8365_v54 = vpack.c.bf16 %v387_v46, %v386_v50  ;;  %v7839_v46 = vld [vmem:[%s9741_s3 + $0x60] sm:$0xff]  }
 0x118   :  { %v6388_v19 = vpop.f32.mrf.mxu0 }
 0x119   :  { %v6389_v22 = vadd.f32 %v6388_v19, %v6387_v18  ;;  %v388_v41 = vmax.f32 %v362_v32, 0.0  ;;  %v7843_v32 = vld [vmem:[%s9740_s4 + $0xb8] sm:$0xff]  }
 0x11a   :  { %v6390_v20 = vpop.f32.mrf.mxu0 }
 0x11b   :  { %v365_v28 = vadd.f32 %v6389_v22, %v8336_v44 }
 0x11c   :  { %v6391_v21 = vpop.f32.mrf.mxu0 }
 0x11d   :  { %v6392_v23 = vadd.f32 %v6391_v21, %v6390_v20  ;;  %v389_v36 = vmax.f32 %v365_v28, 0.0  ;;  %v7832_v28 = vld [vmem:[%s9741_s3 + $0x28] sm:$0xff]  }
 0x11e   :  { %v6393_v24 = vpop.f32.mrf.mxu0 }
 0x11f   :  { %v370_v29 = vadd.f32 %v6392_v23, %v8336_v44  ;;  %v8357_v47 = vpack.c.bf16 %v389_v36, %v388_v41  ;;  %v7847_v36 = vld [vmem:[%s9740_s4 + $0x98] sm:$0xff]   ;;  %v7852_v41 = vld [vmem:[%s9740_s4 + $0x80] sm:$0xff]  }
 0x120   :  { %v6394_v26 = vpop.f32.mrf.mxu0 }
 0x121   :  { %v6395_v30 = vadd.f32 %v6394_v26, %v6393_v24  ;;  %v390_v37 = vmax.f32 %v370_v29, 0.0  ;;  %v7831_v26 = vld [vmem:[%s9741_s3 + $0x20] sm:$0xff]   ;;  %v7833_v29 = vld [vmem:[%s9741_s3 + $0x30] sm:$0xff]  }
 0x123   :  { %v373_v33 = vadd.f32 %v6395_v30, %v8336_v44  ;;  %v7820_v44 = vld [vmem:[%s9741_s3 + $0x8] sm:$0xff]   ;;  %v7834_v30 = vld [vmem:[%s9741_s3 + $0x38] sm:$0xff]  }
 0x125   :  { %v391_v38 = vmax.f32 %v373_v33, 0.0  ;;  %v7844_v33 = vld [vmem:[%s9740_s4 + $0xb0] sm:$0xff]  }
 0x127   :  { %v8354_v42 = vpack.c.bf16 %v391_v38, %v390_v37  ;;  %v7836_v37 = vld [vmem:[%s9741_s3 + $0x48] sm:$0xff]   ;;  %v7848_v38 = vld [vmem:[%s9740_s4 + $0x90] sm:$0xff]  }
 0x129   :  { %6870 = vmatprep.subr.bf16.mxu1 %v8354_v42  ;;  %6950 = vmatprep.subr.bf16.mxu0 %v8354_v42 }
 0x12a   :  { %6871 = vmatpush3.bf16.msra.mxu1 %v8354_v42 }
 0x12b   :  { %6872 = vmatprep.subr.bf16.mxu1 %v8357_v47 }
 0x12e   :  { %6873 = vmatpush3.bf16.msra.mxu1 %v8357_v47 }
 0x12f   :  { %6874 = vmatprep.subr.bf16.mxu1 %v8365_v54 }
 0x132   :  { %6875 = vmatpush3.bf16.msra.mxu1 %v8365_v54 }
 0x133   :  { %6876 = vmatprep.subr.bf16.mxu1 %v8372_v63 }
 0x136   :  { %6877 = vmatpush3.bf16.msra.mxu1 %v8372_v63 }
 0x137   :  { %6878 = vmatprep.subr.bf16.mxu1 %v8377_v4 }
 0x13a   :  { %6879 = vmatpush3.bf16.msra.mxu1 %v8377_v4 }
 0x13b   :  { %6880 = vmatprep.subr.bf16.mxu1 %v8381_v62 }
 0x13e   :  { %6881 = vmatpush3.bf16.msra.mxu1 %v8381_v62 }
 0x13f   :  { %6882 = vmatprep.subr.bf16.mxu1 %v8346_v2 }
 0x142   :  { %6883 = vmatpush3.bf16.msra.mxu1 %v8346_v2 }
 0x143   :  { %6884 = vmatprep.subr.bf16.mxu1 %v8340_v56 }
 0x146   :  { %6885 = vmatpush3.bf16.msra.mxu1 %v8340_v56 }
 0x147   :  { %6890 = vmatprep.subr.bf16.mxu1 %v8354_v42 }
 0x149   :  { %6887 = vmatmul.mubr.bf16.vlgmr.msra.gmra.mxu1 %v7820_v44 }
 0x14a   :  { %6891 = vmatpush3.bf16.msra.mxu1 %v8354_v42  ;;  %6906 = vmatprep.mubr.bf16.mxu1 %v7821_v5 }
 0x14b   :  { %6892 = vmatprep.subr.bf16.mxu1 %v8357_v47 }
 0x14e   :  { %6893 = vmatpush3.bf16.msra.mxu1 %v8357_v47 }
 0x14f   :  { %6894 = vmatprep.subr.bf16.mxu1 %v8365_v54 }
 0x152   :  { %6895 = vmatpush3.bf16.msra.mxu1 %v8365_v54 }
 0x153   :  { %6896 = vmatprep.subr.bf16.mxu1 %v8372_v63 }
 0x156   :  { %6897 = vmatpush3.bf16.msra.mxu1 %v8372_v63 }
 0x157   :  { %6898 = vmatprep.subr.bf16.mxu1 %v8377_v4 }
 0x15a   :  { %6899 = vmatpush3.bf16.msra.mxu1 %v8377_v4 }
 0x15b   :  { %6900 = vmatprep.subr.bf16.mxu1 %v8381_v62 }
 0x15e   :  { %6901 = vmatpush3.bf16.msra.mxu1 %v8381_v62 }
 0x15f   :  { %6902 = vmatprep.subr.bf16.mxu1 %v8346_v2 }
 0x162   :  { %6903 = vmatpush3.bf16.msra.mxu1 %v8346_v2 }
 0x163   :  { %6904 = vmatprep.subr.bf16.mxu1 %v8340_v56 }
 0x166   :  { %6905 = vmatpush3.bf16.msra.mxu1 %v8340_v56 }
 0x167   :  { %6930 = vmatprep.subr.bf16.mxu1 %v7823_v6 }
 0x169   :  { %6907 = vmatmul.mubr.bf16.vlgmr.msra.gmra.mxu1 %v7822_v7 }
 0x16a   :  { %6931 = vmatpush3.bf16.msra.mxu1 %v7823_v6 }
 0x16b   :  { %6932 = vmatprep.subr.bf16.mxu1 %v7824_v8 }
 0x16e   :  { %6933 = vmatpush3.bf16.msra.mxu1 %v7824_v8 }
 0x16f   :  { %6934 = vmatprep.subr.bf16.mxu1 %v7825_v9 }
 0x172   :  { %6935 = vmatpush3.bf16.msra.mxu1 %v7825_v9 }
 0x173   :  { %6936 = vmatprep.subr.bf16.mxu1 %v7826_v10 }
 0x176   :  { %6937 = vmatpush3.bf16.msra.mxu1 %v7826_v10 }
 0x177   :  { %6938 = vmatprep.subr.bf16.mxu1 %v7827_v11 }
 0x17a   :  { %6939 = vmatpush3.bf16.msra.mxu1 %v7827_v11  ;;  %v7854_v11 = vld [vmem:[%s9740_s4 + $0xf0] sm:$0xff]  }
 0x17b   :  { %6940 = vmatprep.subr.bf16.mxu1 %v7828_v12 }
 0x17e   :  { %6941 = vmatpush3.bf16.msra.mxu1 %v7828_v12  ;;  %v7855_v12 = vld [vmem:[%s9740_s4 + $0xe8] sm:$0xff]  }
 0x17f   :  { %6942 = vmatprep.subr.bf16.mxu1 %v7829_v13 }
 0x182   :  { %6943 = vmatpush3.bf16.msra.mxu1 %v7829_v13  ;;  %v7856_v13 = vld [vmem:[%s9740_s4 + $0xe0] sm:$0xff]  }
 0x183   :  { %6944 = vmatprep.subr.bf16.mxu1 %v7830_v14 }
 0x186   :  { %6945 = vmatpush3.bf16.msra.mxu1 %v7830_v14  ;;  %v7857_v14 = vld [vmem:[%s9740_s4 + $0xd8] sm:$0xff]  }
 0x187   :  { %6970 = vmatprep.subr.bf16.mxu1 %v7843_v32 }
 0x209   :  { %v6888_v15 = vpop.f32.mrf.mxu1 }
 0x20b   :  { %v450_v16 = vpop.f32.mrf.mxu1 }
 0x20d   :  { %v6889_v17 = vpop.f32.mrf.mxu1 }
 0x20e   :  { %v466_v20 = vpack.c.bf16 %v6889_v17, %v6888_v15  ;;  %v7858_v15 = vld [vmem:[%s9740_s4 + $0xd0] sm:$0xff]   ;;  %v7861_v17 = vld [vmem:[%s9740_s4 + $0xc8] sm:$0xff]  }
 0x20f   :  { %v453_v18 = vpop.f32.mrf.mxu1 }
 0x210   :  { %v465_v19 = vpack.c.bf16 %v453_v18, %v450_v16  ;;  %v7860_v16 = vld [vmem:[%s9741_s3 + $0x98] sm:$0xff]   ;;  %v7869_v18 = vld [vmem:[%s9741_s3 + $0xa0] sm:$0xff]  }
 0x212   :  { %6946 = vmatprep.mubr.bf16.mxu1 %v465_v19 }
 0x213   :  { %6947 = vmatmul.mubr.bf16.vlgmr.msra.gmra.mxu1 %v466_v20  ;;  %v7862_v20 = vld [vmem:[%s9740_s4 + $0xc0] sm:$0xff]  }
 0x214   :  { %6971 = vmatpush3.bf16.msra.mxu1 %v7843_v32  ;;  %v7870_v32 = vld [vmem:[%s9741_s3 + $0xa8] sm:$0xff]  }
 0x215   :  { %6972 = vmatprep.subr.bf16.mxu1 %v7844_v33 }
 0x218   :  { %6973 = vmatpush3.bf16.msra.mxu1 %v7844_v33  ;;  %v7871_v33 = vld [vmem:[%s9740_s4 + $0x108] sm:$0xff]  }
 0x219   :  { %6974 = vmatprep.subr.bf16.mxu1 %v7845_v34 }
 0x21c   :  { %6975 = vmatpush3.bf16.msra.mxu1 %v7845_v34  ;;  %v7879_v34 = vld [vmem:[%s9741_s3 + $0xb0] sm:$0xff]  }
 0x21d   :  { %6976 = vmatprep.subr.bf16.mxu1 %v7846_v35 }
 0x220   :  { %6977 = vmatpush3.bf16.msra.mxu1 %v7846_v35 }
 0x221   :  { %6978 = vmatprep.subr.bf16.mxu1 %v7847_v36 }
 0x224   :  { %6979 = vmatpush3.bf16.msra.mxu1 %v7847_v36  ;;  %v7872_v36 = vld [vmem:[%s9740_s4 + $0x100] sm:$0xff]  }
 0x225   :  { %6980 = vmatprep.subr.bf16.mxu1 %v7848_v38 }
 0x228   :  { %6981 = vmatpush3.bf16.msra.mxu1 %v7848_v38 }
 0x229   :  { %v6908_v21 = vpop.f32.mrf.mxu1  ;;  %6982 = vmatprep.subr.bf16.mxu1 %v7851_v40 }
 0x22b   :  { %v534_v22 = vpop.f32.mrf.mxu1 }
 0x22c   :  { %6983 = vmatpush3.bf16.msra.mxu1 %v7851_v40 }
 0x22d   :  { %v6909_v23 = vpop.f32.mrf.mxu1  ;;  %6984 = vmatprep.subr.bf16.mxu1 %v7852_v41 }
 0x22e   :  { %v550_v27 = vpack.c.bf16 %v6909_v23, %v6908_v21  ;;  %v7863_v23 = vld [vmem:[%s9740_s4 + $0x138] sm:$0xff]  }
 0x22f   :  { %v537_v24 = vpop.f32.mrf.mxu1 }
 0x230   :  { %v549_v25 = vpack.c.bf16 %v537_v24, %v534_v22  ;;  %6985 = vmatpush3.bf16.msra.mxu1 %v7852_v41 }
 0x231   :  { %7010 = vmatprep.subr.bf16.mxu1 %v8539_v43 }
 0x232   :  { %6926 = vmatprep.mubr.bf16.mxu0 %v549_v25 }
 0x233   :  { %6927 = vmatmul.mubr.bf16.vlgmr.msra.gmra.mxu0 %v550_v27  ;;  %v7864_v27 = vld [vmem:[%s9740_s4 + $0x130] sm:$0xff]  }
 0x234   :  { %6951 = vmatpush3.bf16.msra.mxu0 %v8354_v42  ;;  %6966 = vmatprep.mubr.bf16.mxu0 %v7831_v26 }
 0x235   :  { %6952 = vmatprep.subr.bf16.mxu0 %v8357_v47 }
 0x238   :  { %6953 = vmatpush3.bf16.msra.mxu0 %v8357_v47 }
 0x239   :  { %6954 = vmatprep.subr.bf16.mxu0 %v8365_v54 }
 0x23c   :  { %6955 = vmatpush3.bf16.msra.mxu0 %v8365_v54 }
 0x23d   :  { %6956 = vmatprep.subr.bf16.mxu0 %v8372_v63 }
 0x240   :  { %6957 = vmatpush3.bf16.msra.mxu0 %v8372_v63 }
 0x241   :  { %6958 = vmatprep.subr.bf16.mxu0 %v8377_v4 }
 0x244   :  { %6959 = vmatpush3.bf16.msra.mxu0 %v8377_v4 }
 0x245   :  { %6960 = vmatprep.subr.bf16.mxu0 %v8381_v62 }
 0x248   :  { %6961 = vmatpush3.bf16.msra.mxu0 %v8381_v62 }
 0x249   :  { %6962 = vmatprep.subr.bf16.mxu0 %v8346_v2 }
 0x24c   :  { %6963 = vmatpush3.bf16.msra.mxu0 %v8346_v2 }
 0x24d   :  { %6964 = vmatprep.subr.bf16.mxu0 %v8340_v56 }
 0x250   :  { %6965 = vmatpush3.bf16.msra.mxu0 %v8340_v56 }
 0x251   :  { %6990 = vmatprep.subr.bf16.mxu0 %v8354_v42 }
 0x253   :  { %6967 = vmatmul.mubr.bf16.vlgmr.msra.gmra.mxu0 %v7832_v28  ;;  %v7865_v28 = vld [vmem:[%s9740_s4 + $0x128] sm:$0xff]  }
 0x254   :  { %6991 = vmatpush3.bf16.msra.mxu0 %v8354_v42  ;;  %7006 = vmatprep.mubr.bf16.mxu0 %v7833_v29  ;;  %v7866_v29 = vld [vmem:[%s9740_s4 + $0x120] sm:$0xff]  }
 0x255   :  { %6992 = vmatprep.subr.bf16.mxu0 %v8357_v47 }
 0x258   :  { %6993 = vmatpush3.bf16.msra.mxu0 %v8357_v47 }
 0x259   :  { %6994 = vmatprep.subr.bf16.mxu0 %v8365_v54 }
 0x25c   :  { %6995 = vmatpush3.bf16.msra.mxu0 %v8365_v54 }
 0x25d   :  { %6996 = vmatprep.subr.bf16.mxu0 %v8372_v63 }
 0x260   :  { %6997 = vmatpush3.bf16.msra.mxu0 %v8372_v63 }
 0x261   :  { %6998 = vmatprep.subr.bf16.mxu0 %v8377_v4 }
 0x264   :  { %6999 = vmatpush3.bf16.msra.mxu0 %v8377_v4 }
 0x265   :  { %7000 = vmatprep.subr.bf16.mxu0 %v8381_v62 }
 0x268   :  { %7001 = vmatpush3.bf16.msra.mxu0 %v8381_v62 }
 0x269   :  { %7002 = vmatprep.subr.bf16.mxu0 %v8346_v2 }
 0x26c   :  { %7003 = vmatpush3.bf16.msra.mxu0 %v8346_v2 }
 0x26d   :  { %7004 = vmatprep.subr.bf16.mxu0 %v8340_v56 }
 0x270   :  { %7005 = vmatpush3.bf16.msra.mxu0 %v8340_v56 }
 0x271   :  { %7030 = vmatprep.subr.bf16.mxu0 %v8354_v42 }
 0x273   :  { %7007 = vmatmul.mubr.bf16.vlgmr.msra.gmra.mxu0 %v7834_v30  ;;  %v7867_v30 = vld [vmem:[%s9740_s4 + $0x118] sm:$0xff]  }
 0x274   :  { %7031 = vmatpush3.bf16.msra.mxu0 %v8354_v42  ;;  %7046 = vmatprep.mubr.bf16.mxu0 %v7835_v31  ;;  %v7868_v31 = vld [vmem:[%s9740_s4 + $0x110] sm:$0xff]  }
 0x275   :  { %7032 = vmatprep.subr.bf16.mxu0 %v8357_v47 }
 0x278   :  { %7033 = vmatpush3.bf16.msra.mxu0 %v8357_v47 }
 0x279   :  { %7034 = vmatprep.subr.bf16.mxu0 %v8365_v54 }
 0x27c   :  { %7035 = vmatpush3.bf16.msra.mxu0 %v8365_v54 }
 0x27d   :  { %7036 = vmatprep.subr.bf16.mxu0 %v8372_v63 }
 0x280   :  { %7037 = vmatpush3.bf16.msra.mxu0 %v8372_v63 }
 0x281   :  { %7038 = vmatprep.subr.bf16.mxu0 %v8377_v4 }
 0x284   :  { %7039 = vmatpush3.bf16.msra.mxu0 %v8377_v4 }
 0x285   :  { %7040 = vmatprep.subr.bf16.mxu0 %v8381_v62 }
 0x288   :  { %7041 = vmatpush3.bf16.msra.mxu0 %v8381_v62 }
 0x289   :  { %7042 = vmatprep.subr.bf16.mxu0 %v8346_v2 }
 0x28c   :  { %7043 = vmatpush3.bf16.msra.mxu0 %v8346_v2 }
 0x28d   :  { %7044 = vmatprep.subr.bf16.mxu0 %v8340_v56 }
 0x290   :  { %7045 = vmatpush3.bf16.msra.mxu0 %v8340_v56 }
 0x291   :  { %7070 = vmatprep.subr.bf16.mxu0 %v8354_v42 }
 0x293   :  { %7047 = vmatmul.mubr.bf16.vlgmr.msra.gmra.mxu0 %v7836_v37 }
 0x294   :  { %7071 = vmatpush3.bf16.msra.mxu0 %v8354_v42  ;;  %7086 = vmatprep.mubr.bf16.mxu0 %v7837_v39  ;;  %v7873_v39 = vld [vmem:[%s9740_s4 + $0x178] sm:$0xff]  }
 0x295   :  { %7072 = vmatprep.subr.bf16.mxu0 %v8357_v47 }
 0x298   :  { %7073 = vmatpush3.bf16.msra.mxu0 %v8357_v47 }
 0x299   :  { %7074 = vmatprep.subr.bf16.mxu0 %v8365_v54 }
 0x29c   :  { %7075 = vmatpush3.bf16.msra.mxu0 %v8365_v54 }
 0x29d   :  { %7076 = vmatprep.subr.bf16.mxu0 %v8372_v63 }
 0x2a0   :  { %7077 = vmatpush3.bf16.msra.mxu0 %v8372_v63 }
 0x2a1   :  { %7078 = vmatprep.subr.bf16.mxu0 %v8377_v4 }
 0x2a4   :  { %7079 = vmatpush3.bf16.msra.mxu0 %v8377_v4 }
 0x2a5   :  { %7080 = vmatprep.subr.bf16.mxu0 %v8381_v62 }
 0x2a8   :  { %7081 = vmatpush3.bf16.msra.mxu0 %v8381_v62 }
 0x2a9   :  { %7082 = vmatprep.subr.bf16.mxu0 %v8346_v2 }
 0x2ac   :  { %7083 = vmatpush3.bf16.msra.mxu0 %v8346_v2 }
 0x2ad   :  { %7084 = vmatprep.subr.bf16.mxu0 %v8340_v56 }
 0x2b0   :  { %7085 = vmatpush3.bf16.msra.mxu0 %v8340_v56 }
 0x2b1   :  { %7110 = vmatprep.subr.bf16.mxu0 %v8354_v42 }
 0x2b3   :  { %7087 = vmatmul.mubr.bf16.vlgmr.msra.gmra.mxu0 %v7838_v45  ;;  %v7874_v45 = vld [vmem:[%s9740_s4 + $0x170] sm:$0xff]  }
 0x2b4   :  { %7111 = vmatpush3.bf16.msra.mxu0 %v8354_v42  ;;  %7126 = vmatprep.mubr.bf16.mxu0 %v7839_v46  ;;  %v7875_v46 = vld [vmem:[%s9740_s4 + $0x168] sm:$0xff]  }
 0x2b5   :  { %7112 = vmatprep.subr.bf16.mxu0 %v8357_v47 }
 0x2b8   :  { %7113 = vmatpush3.bf16.msra.mxu0 %v8357_v47 }
 0x2b9   :  { %7114 = vmatprep.subr.bf16.mxu0 %v8365_v54 }
 0x2bc   :  { %7115 = vmatpush3.bf16.msra.mxu0 %v8365_v54 }
 0x2bd   :  { %7116 = vmatprep.subr.bf16.mxu0 %v8372_v63 }
 0x2c0   :  { %7117 = vmatpush3.bf16.msra.mxu0 %v8372_v63 }
 0x2c1   :  { %7118 = vmatprep.subr.bf16.mxu0 %v8377_v4 }
 0x2c4   :  { %7119 = vmatpush3.bf16.msra.mxu0 %v8377_v4 }
 0x2c5   :  { %7120 = vmatprep.subr.bf16.mxu0 %v8381_v62 }
 0x2c8   :  { %7121 = vmatpush3.bf16.msra.mxu0 %v8381_v62 }
 0x2c9   :  { %7122 = vmatprep.subr.bf16.mxu0 %v8346_v2 }
 0x2cc   :  { %7123 = vmatpush3.bf16.msra.mxu0 %v8346_v2 }
 0x2cd   :  { %7124 = vmatprep.subr.bf16.mxu0 %v8340_v56 }
 0x2d0   :  { %7125 = vmatpush3.bf16.msra.mxu0 %v8340_v56 }
 0x2d1   :  { %7150 = vmatprep.subr.bf16.mxu0 %v8354_v42 }
 0x2d3   :  { %7127 = vmatmul.mubr.bf16.vlgmr.msra.gmra.mxu0 %v7840_v48  ;;  %v6948_v50 = vpop.f32.mrf.mxu1  ;;  %v7876_v48 = vld [vmem:[%s9740_s4 + $0x160] sm:$0xff]  }
 0x2d4   :  { %7151 = vmatpush3.bf16.msra.mxu0 %v8354_v42  ;;  %7166 = vmatprep.mubr.bf16.mxu0 %v7841_v49  ;;  %v7877_v49 = vld [vmem:[%s9740_s4 + $0x158] sm:$0xff]  }
 0x2d5   :  { %7152 = vmatprep.subr.bf16.mxu0 %v8357_v47  ;;  %v747_v53 = vpop.f32.mrf.mxu1 }
 0x2d7   :  { %v6949_v61 = vpop.f32.mrf.mxu1 }
 0x2d8   :  { %7153 = vmatpush3.bf16.msra.mxu0 %v8357_v47 }
 0x2d9   :  { %7154 = vmatprep.subr.bf16.mxu0 %v8365_v54 }
 0x2dc   :  { %7155 = vmatpush3.bf16.msra.mxu0 %v8365_v54 }
 0x2dd   :  { %7156 = vmatprep.subr.bf16.mxu0 %v8372_v63 }
 0x2e0   :  { %7157 = vmatpush3.bf16.msra.mxu0 %v8372_v63 }
 0x2e1   :  { %7158 = vmatprep.subr.bf16.mxu0 %v8377_v4 }
 0x2e4   :  { %7159 = vmatpush3.bf16.msra.mxu0 %v8377_v4 }
 0x2e5   :  { %7160 = vmatprep.subr.bf16.mxu0 %v8381_v62 }
 0x2e8   :  { %7161 = vmatpush3.bf16.msra.mxu0 %v8381_v62 }
 0x2e9   :  { %7162 = vmatprep.subr.bf16.mxu0 %v8346_v2 }
 0x2ec   :  { %7163 = vmatpush3.bf16.msra.mxu0 %v8346_v2 }
 0x2ed   :  { %7164 = vmatprep.subr.bf16.mxu0 %v8340_v56 }
 0x2f0   :  { %7165 = vmatpush3.bf16.msra.mxu0 %v8340_v56 }
 0x2f1   :  { %7190 = vmatprep.subr.bf16.mxu0 %v8354_v42 }
 0x2f3   :  { %7167 = vmatmul.mubr.bf16.vlgmr.msra.gmra.mxu0 %v7842_v51  ;;  %v6928_v55 = vpop.f32.mrf.mxu0  ;;  %v7880_v51 = vld [vmem:[%s9741_s3 + $0xb8] sm:$0xff]  }
 0x2f4   :  { %v8604_v57 = vadd.f32 %v6948_v50, %v6928_v55  ;;  %7191 = vmatpush3.bf16.msra.mxu0 %v8354_v42  ;;  %7206 = vmatprep.mubr.bf16.mxu0 %v7849_v52  ;;  %v7878_v50 = vld [vmem:[%s9740_s4 + $0x150] sm:$0xff]   ;;  %v7881_v52 = vld [vmem:[%s9740_s4 + $0x148] sm:$0xff]  }
 0x2f5   :  { %7192 = vmatprep.subr.bf16.mxu0 %v8357_v47  ;;  %v650_v58 = vpop.f32.mrf.mxu0 }
 0x2f6   :  { %v8608_v59 = vadd.f32 %v747_v53, %v650_v58  ;;  %v7889_v53 = vld [vmem:[%s9741_s3 + $0xc0] sm:$0xff]  }
 0x2f7   :  { %v6929_v0 = vpop.f32.mrf.mxu0  ;;  %v7882_v58 = vld [vmem:[%s9740_s4 + $0x140] sm:$0xff]  }
 0x2f8   :  { %v8610_v1 = vadd.f32 %v6949_v61, %v6929_v0  ;;  %7193 = vmatpush3.bf16.msra.mxu0 %v8357_v47 }
 0x2f9   :  { %7194 = vmatprep.subr.bf16.mxu0 %v8365_v54  ;;  %v8631_v44 = vpop.f32.mrf.mxu0 }
 0x2fc   :  { %7195 = vmatpush3.bf16.msra.mxu0 %v8365_v54 }
 0x2fd   :  { %7196 = vmatprep.subr.bf16.mxu0 %v8372_v63 }
 0x300   :  { %7197 = vmatpush3.bf16.msra.mxu0 %v8372_v63 }
 0x301   :  { %7198 = vmatprep.subr.bf16.mxu0 %v8377_v4 }
 0x304   :  { %7199 = vmatpush3.bf16.msra.mxu0 %v8377_v4 }
 0x305   :  { %7200 = vmatprep.subr.bf16.mxu0 %v8381_v62 }
 0x308   :  { %7201 = vmatpush3.bf16.msra.mxu0 %v8381_v62 }
 0x309   :  { %7202 = vmatprep.subr.bf16.mxu0 %v8346_v2 }
 0x30c   :  { %7203 = vmatpush3.bf16.msra.mxu0 %v8346_v2 }
 0x30d   :  { %7204 = vmatprep.subr.bf16.mxu0 %v8340_v56 }
 0x310   :  { %7205 = vmatpush3.bf16.msra.mxu0 %v8340_v56 }
 0x311   :  { %7230 = vmatprep.subr.bf16.mxu0 %v8354_v42 }
 0x313   :  { %v6968_v5 = vpop.f32.mrf.mxu0  ;;  %7207 = vmatmul.mubr.bf16.vlgmr.msra.gmra.mxu0 %v7850_v3  ;;  %v7883_v3 = vld [vmem:[%s9740_s4 + $0x1b8] sm:$0xff]  }
 0x314   :  { %7231 = vmatpush3.bf16.msra.mxu0 %v8354_v42  ;;  %7246 = vmatprep.mubr.bf16.mxu0 %v7859_v60 }
 0x315   :  { %v813_v6 = vpop.f32.mrf.mxu0  ;;  %7232 = vmatprep.subr.bf16.mxu0 %v8357_v47 }
 0x317   :  { %v6969_v7 = vpop.f32.mrf.mxu0 }
 0x318   :  { %7233 = vmatpush3.bf16.msra.mxu0 %v8357_v47  ;;  %v829_v10 = vpack.c.bf16 %v6969_v7, %v6968_v5  ;;  %v7884_v7 = vld [vmem:[%s9740_s4 + $0x1b0] sm:$0xff]  }
 0x319   :  { %v816_v8 = vpop.f32.mrf.mxu0  ;;  %7234 = vmatprep.subr.bf16.mxu0 %v8365_v54 }
 0x31a   :  { %v828_v9 = vpack.c.bf16 %v816_v8, %v813_v6  ;;  %v7885_v8 = vld [vmem:[%s9740_s4 + $0x1a8] sm:$0xff]  }
 0x31c   :  { %6986 = vmatprep.mubr.bf16.mxu1 %v828_v9  ;;  %7235 = vmatpush3.bf16.msra.mxu0 %v8365_v54  ;;  %v7886_v9 = vld [vmem:[%s9740_s4 + $0x1a0] sm:$0xff]  }
 0x31d   :  { %6987 = vmatmul.mubr.bf16.vlgmr.msra.gmra.mxu1 %v829_v10  ;;  %7236 = vmatprep.subr.bf16.mxu0 %v8372_v63  ;;  %v7887_v10 = vld [vmem:[%s9740_s4 + $0x198] sm:$0xff]  }
 0x31e   :  { %7011 = vmatpush3.bf16.msra.mxu1 %v8539_v43 }
 0x31f   :  { %7012 = vmatprep.subr.bf16.mxu1 %v7854_v11 }
 0x320   :  { %7237 = vmatpush3.bf16.msra.mxu0 %v8372_v63 }
 0x321   :  { %7238 = vmatprep.subr.bf16.mxu0 %v8377_v4 }
 0x322   :  { %7013 = vmatpush3.bf16.msra.mxu1 %v7854_v11  ;;  %v7888_v11 = vld [vmem:[%s9740_s4 + $0x190] sm:$0xff]  }
 0x323   :  { %7014 = vmatprep.subr.bf16.mxu1 %v7855_v12 }
 0x324   :  { %7239 = vmatpush3.bf16.msra.mxu0 %v8377_v4 }
 0x325   :  { %7240 = vmatprep.subr.bf16.mxu0 %v8381_v62 }
 0x326   :  { %7015 = vmatpush3.bf16.msra.mxu1 %v7855_v12  ;;  %v7890_v12 = vld [vmem:[%s9741_s3 + $0xc8] sm:$0xff]  }
 0x327   :  { %7016 = vmatprep.subr.bf16.mxu1 %v7856_v13 }
 0x328   :  { %7241 = vmatpush3.bf16.msra.mxu0 %v8381_v62 }
 0x329   :  { %7242 = vmatprep.subr.bf16.mxu0 %v8346_v2 }
 0x32a   :  { %7017 = vmatpush3.bf16.msra.mxu1 %v7856_v13  ;;  %v7891_v13 = vld [vmem:[%s9740_s4 + $0x188] sm:$0xff]  }
 0x32b   :  { %7018 = vmatprep.subr.bf16.mxu1 %v7857_v14 }
 0x32c   :  { %7243 = vmatpush3.bf16.msra.mxu0 %v8346_v2 }
 0x32d   :  { %7244 = vmatprep.subr.bf16.mxu0 %v8340_v56 }
 0x32e   :  { %7019 = vmatpush3.bf16.msra.mxu1 %v7857_v14  ;;  %v7899_v14 = vld [vmem:[%s9741_s3 + $0xd0] sm:$0xff]  }
 0x32f   :  { %7020 = vmatprep.subr.bf16.mxu1 %v7858_v15 }
 0x330   :  { %7245 = vmatpush3.bf16.msra.mxu0 %v8340_v56 }
 0x331   :  { %7270 = vmatprep.subr.bf16.mxu0 %v8354_v42 }
 0x332   :  { %7021 = vmatpush3.bf16.msra.mxu1 %v7858_v15 }
 0x333   :  { %v7008_v19 = vpop.f32.mrf.mxu0  ;;  %7247 = vmatmul.mubr.bf16.vlgmr.msra.gmra.mxu0 %v7860_v16  ;;  %7022 = vmatprep.subr.bf16.mxu1 %v7861_v17  ;;  %v7892_v16 = vld [vmem:[%s9740_s4 + $0x180] sm:$0xff]  }
 0x334   :  { %7271 = vmatpush3.bf16.msra.mxu0 %v8354_v42  ;;  %7286 = vmatprep.mubr.bf16.mxu0 %v7869_v18 }
 0x335   :  { %v999_v21 = vpop.f32.mrf.mxu0  ;;  %7272 = vmatprep.subr.bf16.mxu0 %v8357_v47 }
 0x336   :  { %7023 = vmatpush3.bf16.msra.mxu1 %v7861_v17 }
 0x337   :  { %v7009_v22 = vpop.f32.mrf.mxu0  ;;  %7024 = vmatprep.subr.bf16.mxu1 %v7862_v20 }
 0x338   :  { %7273 = vmatpush3.bf16.msra.mxu0 %v8357_v47  ;;  %v1015_v26 = vpack.c.bf16 %v7009_v22, %v7008_v19  ;;  %v7893_v19 = vld [vmem:[%s9740_s4 + $0x1f8] sm:$0xff]  }
 0x339   :  { %v1002_v24 = vpop.f32.mrf.mxu0  ;;  %7274 = vmatprep.subr.bf16.mxu0 %v8365_v54 }
 0x33a   :  { %v1014_v25 = vpack.c.bf16 %v1002_v24, %v999_v21  ;;  %7025 = vmatpush3.bf16.msra.mxu1 %v7862_v20  ;;  %v7895_v24 = vld [vmem:[%s9740_s4 + $0x1e8] sm:$0xff]  }
 0x33b   :  { %7050 = vmatprep.subr.bf16.mxu1 %v7863_v23 }
 0x33c   :  { %7026 = vmatprep.mubr.bf16.mxu1 %v1014_v25  ;;  %7275 = vmatpush3.bf16.msra.mxu0 %v8365_v54  ;;  %v7896_v25 = vld [vmem:[%s9740_s4 + $0x1e0] sm:$0xff]  }
 0x33d   :  { %7027 = vmatmul.mubr.bf16.vlgmr.msra.gmra.mxu1 %v1015_v26  ;;  %7276 = vmatprep.subr.bf16.mxu0 %v8372_v63  ;;  %v7897_v26 = vld [vmem:[%s9740_s4 + $0x1d8] sm:$0xff]  }
 0x33e   :  { %7051 = vmatpush3.bf16.msra.mxu1 %v7863_v23  ;;  %v7894_v23 = vld [vmem:[%s9740_s4 + $0x1f0] sm:$0xff]  }
 0x33f   :  { %7052 = vmatprep.subr.bf16.mxu1 %v7864_v27 }
 0x340   :  { %7277 = vmatpush3.bf16.msra.mxu0 %v8372_v63 }
 0x341   :  { %7278 = vmatprep.subr.bf16.mxu0 %v8377_v4 }
 0x342   :  { %7053 = vmatpush3.bf16.msra.mxu1 %v7864_v27  ;;  %v7898_v27 = vld [vmem:[%s9740_s4 + $0x1d0] sm:$0xff]  }
 0x343   :  { %7054 = vmatprep.subr.bf16.mxu1 %v7865_v28 }
 0x344   :  { %7279 = vmatpush3.bf16.msra.mxu0 %v8377_v4 }
 0x345   :  { %7280 = vmatprep.subr.bf16.mxu0 %v8381_v62 }
 0x346   :  { %7055 = vmatpush3.bf16.msra.mxu1 %v7865_v28  ;;  %v7900_v28 = vld [vmem:[%s9741_s3 + $0xd8] sm:$0xff]  }
 0x347   :  { %7056 = vmatprep.subr.bf16.mxu1 %v7866_v29 }
 0x348   :  { %7281 = vmatpush3.bf16.msra.mxu0 %v8381_v62 }
 0x349   :  { %7282 = vmatprep.subr.bf16.mxu0 %v8346_v2 }
 0x34a   :  { %7057 = vmatpush3.bf16.msra.mxu1 %v7866_v29  ;;  %v7901_v29 = vld [vmem:[%s9740_s4 + $0x1c8] sm:$0xff]  }
 0x34b   :  { %7058 = vmatprep.subr.bf16.mxu1 %v7867_v30 }
 0x34c   :  { %7283 = vmatpush3.bf16.msra.mxu0 %v8346_v2 }
 0x34d   :  { %7284 = vmatprep.subr.bf16.mxu0 %v8340_v56 }
 0x34e   :  { %7059 = vmatpush3.bf16.msra.mxu1 %v7867_v30  ;;  %v7909_v30 = vld [vmem:[%s9741_s3 + $0xe0] sm:$0xff]  }
 0x34f   :  { %7060 = vmatprep.subr.bf16.mxu1 %v7868_v31 }
 0x350   :  { %7285 = vmatpush3.bf16.msra.mxu0 %v8340_v56 }
 0x351   :  { %7310 = vmatprep.subr.bf16.mxu0 %v8354_v42 }
 0x352   :  { %7061 = vmatpush3.bf16.msra.mxu1 %v7868_v31 }
 0x353   :  { %v7048_v35 = vpop.f32.mrf.mxu0  ;;  %7287 = vmatmul.mubr.bf16.vlgmr.msra.gmra.mxu0 %v7870_v32  ;;  %7062 = vmatprep.subr.bf16.mxu1 %v7871_v33  ;;  %v7902_v32 = vld [vmem:[%s9740_s4 + $0x1c0] sm:$0xff]  }
 0x354   :  { %7311 = vmatpush3.bf16.msra.mxu0 %v8354_v42  ;;  %7326 = vmatprep.mubr.bf16.mxu0 %v7879_v34 }
 0x355   :  { %v1185_v37 = vpop.f32.mrf.mxu0  ;;  %7312 = vmatprep.subr.bf16.mxu0 %v8357_v47 }
 0x356   :  { %7063 = vmatpush3.bf16.msra.mxu1 %v7871_v33 }
 0x357   :  { %v7049_v38 = vpop.f32.mrf.mxu0  ;;  %7064 = vmatprep.subr.bf16.mxu1 %v7872_v36 }
 0x358   :  { %7313 = vmatpush3.bf16.msra.mxu0 %v8357_v47  ;;  %v1201_v43 = vpack.c.bf16 %v7049_v38, %v7048_v35  ;;  %v7903_v35 = vld [vmem:[%s9740_s4 + $0x238] sm:$0xff]  }
 0x359   :  { %v1188_v40 = vpop.f32.mrf.mxu0  ;;  %7314 = vmatprep.subr.bf16.mxu0 %v8365_v54 }
 0x35a   :  { %v1200_v41 = vpack.c.bf16 %v1188_v40, %v1185_v37  ;;  %7065 = vmatpush3.bf16.msra.mxu1 %v7872_v36  ;;  %v7905_v40 = vld [vmem:[%s9740_s4 + $0x228] sm:$0xff]  }
 0x35b   :  { %7090 = vmatprep.subr.bf16.mxu1 %v7873_v39 }
 0x35c   :  { %7066 = vmatprep.mubr.bf16.mxu1 %v1200_v41  ;;  %7315 = vmatpush3.bf16.msra.mxu0 %v8365_v54  ;;  %v7906_v41 = vld [vmem:[%s9740_s4 + $0x220] sm:$0xff]  }
 0x35d   :  { %7067 = vmatmul.mubr.bf16.vlgmr.msra.gmra.mxu1 %v1201_v43  ;;  %7316 = vmatprep.subr.bf16.mxu0 %v8372_v63  ;;  %v7907_v43 = vld [vmem:[%s9740_s4 + $0x218] sm:$0xff]  }
 0x35e   :  { %7091 = vmatpush3.bf16.msra.mxu1 %v7873_v39  ;;  %v7904_v39 = vld [vmem:[%s9740_s4 + $0x230] sm:$0xff]  }
 0x35f   :  { %7092 = vmatprep.subr.bf16.mxu1 %v7874_v45 }
 0x360   :  { %7317 = vmatpush3.bf16.msra.mxu0 %v8372_v63 }
 0x361   :  { %7318 = vmatprep.subr.bf16.mxu0 %v8377_v4 }
 0x362   :  { %7093 = vmatpush3.bf16.msra.mxu1 %v7874_v45  ;;  %v7908_v45 = vld [vmem:[%s9740_s4 + $0x210] sm:$0xff]  }
 0x363   :  { %7094 = vmatprep.subr.bf16.mxu1 %v7875_v46 }
 0x364   :  { %7319 = vmatpush3.bf16.msra.mxu0 %v8377_v4 }
 0x365   :  { %7320 = vmatprep.subr.bf16.mxu0 %v8381_v62 }
 0x366   :  { %7095 = vmatpush3.bf16.msra.mxu1 %v7875_v46  ;;  %v7910_v46 = vld [vmem:[%s9741_s3 + $0xe8] sm:$0xff]  }
 0x367   :  { %7096 = vmatprep.subr.bf16.mxu1 %v7876_v48 }
 0x368   :  { %7321 = vmatpush3.bf16.msra.mxu0 %v8381_v62 }
 0x369   :  { %7322 = vmatprep.subr.bf16.mxu0 %v8346_v2 }
 0x36a   :  { %7097 = vmatpush3.bf16.msra.mxu1 %v7876_v48  ;;  %v7911_v48 = vld [vmem:[%s9740_s4 + $0x208] sm:$0xff]  }
 0x36b   :  { %7098 = vmatprep.subr.bf16.mxu1 %v7877_v49 }
 0x36c   :  { %7323 = vmatpush3.bf16.msra.mxu0 %v8346_v2 }
 0x36d   :  { %7324 = vmatprep.subr.bf16.mxu0 %v8340_v56 }
 0x36e   :  { %7099 = vmatpush3.bf16.msra.mxu1 %v7877_v49  ;;  %v7919_v49 = vld [vmem:[%s9741_s3 + $0xf0] sm:$0xff]  }
 0x36f   :  { %7100 = vmatprep.subr.bf16.mxu1 %v7878_v50 }
 0x370   :  { %7325 = vmatpush3.bf16.msra.mxu0 %v8340_v56 }
 0x371   :  { %7350 = vmatprep.subr.bf16.mxu0 %v8354_v42 }
 0x372   :  { %7101 = vmatpush3.bf16.msra.mxu1 %v7878_v50 }
 0x373   :  { %v7088_v55 = vpop.f32.mrf.mxu0  ;;  %7327 = vmatmul.mubr.bf16.vlgmr.msra.gmra.mxu0 %v7880_v51  ;;  %7102 = vmatprep.subr.bf16.mxu1 %v7881_v52  ;;  %v7912_v51 = vld [vmem:[%s9740_s4 + $0x200] sm:$0xff]  }
 0x374   :  { %7351 = vmatpush3.bf16.msra.mxu0 %v8354_v42  ;;  %7366 = vmatprep.mubr.bf16.mxu0 %v7889_v53 }
 0x375   :  { %v1371_v61 = vpop.f32.mrf.mxu0  ;;  %7352 = vmatprep.subr.bf16.mxu0 %v8357_v47 }
 0x376   :  { %7103 = vmatpush3.bf16.msra.mxu1 %v7881_v52 }
 0x377   :  { %v7089_v0 = vpop.f32.mrf.mxu0  ;;  %7104 = vmatprep.subr.bf16.mxu1 %v7882_v58 }
 0x378   :  { %7353 = vmatpush3.bf16.msra.mxu0 %v8357_v47  ;;  %v1387_v6 = vpack.c.bf16 %v7089_v0, %v7088_v55  ;;  %v7913_v55 = vld [vmem:[%s9740_s4 + $0x278] sm:$0xff]   ;;  %v750_v0 = vpop.f32.mrf.mxu1 }
 0x379   :  { %v1374_v60 = vpop.f32.mrf.mxu0  ;;  %7354 = vmatprep.subr.bf16.mxu0 %v8365_v54 }
 0x37a   :  { %v1386_v5 = vpack.c.bf16 %v1374_v60, %v1371_v61  ;;  %7105 = vmatpush3.bf16.msra.mxu1 %v7882_v58 }
 0x37b   :  { %7130 = vmatprep.subr.bf16.mxu1 %v7883_v3 }
 0x37c   :  { %7106 = vmatprep.mubr.bf16.mxu1 %v1386_v5  ;;  %7355 = vmatpush3.bf16.msra.mxu0 %v8365_v54 }
 0x37d   :  { %7107 = vmatmul.mubr.bf16.vlgmr.msra.gmra.mxu1 %v1387_v6  ;;  %7356 = vmatprep.subr.bf16.mxu0 %v8372_v63  ;;  %v7915_v6 = vld [vmem:[%s9740_s4 + $0x268] sm:$0xff]  }
 0x37e   :  { %7131 = vmatpush3.bf16.msra.mxu1 %v7883_v3  ;;  %v7914_v3 = vld [vmem:[%s9740_s4 + $0x270] sm:$0xff]  }
 0x37f   :  { %7132 = vmatprep.subr.bf16.mxu1 %v7884_v7 }
 0x380   :  { %7357 = vmatpush3.bf16.msra.mxu0 %v8372_v63 }
 0x381   :  { %7358 = vmatprep.subr.bf16.mxu0 %v8377_v4 }
 0x382   :  { %7133 = vmatpush3.bf16.msra.mxu1 %v7884_v7 }
 0x383   :  { %7134 = vmatprep.subr.bf16.mxu1 %v7885_v8 }
 0x384   :  { %7359 = vmatpush3.bf16.msra.mxu0 %v8377_v4 }
 0x385   :  { %7360 = vmatprep.subr.bf16.mxu0 %v8381_v62 }
 0x386   :  { %7135 = vmatpush3.bf16.msra.mxu1 %v7885_v8 }
 0x387   :  { %7136 = vmatprep.subr.bf16.mxu1 %v7886_v9 }
 0x388   :  { %7361 = vmatpush3.bf16.msra.mxu0 %v8381_v62 }
 0x389   :  { %7362 = vmatprep.subr.bf16.mxu0 %v8346_v2 }
 0x38a   :  { %7137 = vmatpush3.bf16.msra.mxu1 %v7886_v9 }
 0x38b   :  { %7138 = vmatprep.subr.bf16.mxu1 %v7887_v10 }
 0x38c   :  { %7363 = vmatpush3.bf16.msra.mxu0 %v8346_v2 }
 0x38d   :  { %7364 = vmatprep.subr.bf16.mxu0 %v8340_v56 }
 0x38e   :  { %7139 = vmatpush3.bf16.msra.mxu1 %v7887_v10  ;;  %v7916_v10 = vld [vmem:[%s9740_s4 + $0x260] sm:$0xff]  }
 0x38f   :  { %7140 = vmatprep.subr.bf16.mxu1 %v7888_v11 }
 0x390   :  { %7365 = vmatpush3.bf16.msra.mxu0 %v8340_v56 }
 0x391   :  { %7390 = vmatprep.subr.bf16.mxu0 %v8354_v42 }
 0x392   :  { %7141 = vmatpush3.bf16.msra.mxu1 %v7888_v11 }
 0x393   :  { %v7128_v15 = vpop.f32.mrf.mxu0  ;;  %7367 = vmatmul.mubr.bf16.vlgmr.msra.gmra.mxu0 %v7890_v12  ;;  %7142 = vmatprep.subr.bf16.mxu1 %v7891_v13 }
 0x394   :  { %7391 = vmatpush3.bf16.msra.mxu0 %v8354_v42  ;;  %7406 = vmatprep.mubr.bf16.mxu0 %v7899_v14 }
 0x395   :  { %v1557_v17 = vpop.f32.mrf.mxu0  ;;  %7392 = vmatprep.subr.bf16.mxu0 %v8357_v47 }
 0x396   :  { %7143 = vmatpush3.bf16.msra.mxu1 %v7891_v13  ;;  %v7923_v13 = vld [vmem:[%s9740_s4 + $0x2b8] sm:$0xff]  }
 0x397   :  { %v7129_v18 = vpop.f32.mrf.mxu0  ;;  %7144 = vmatprep.subr.bf16.mxu1 %v7892_v16 }
 0x398   :  { %7393 = vmatpush3.bf16.msra.mxu0 %v8357_v47  ;;  %v1573_v22 = vpack.c.bf16 %v7129_v18, %v7128_v15 }
 0x399   :  { %v1560_v20 = vpop.f32.mrf.mxu0  ;;  %7394 = vmatprep.subr.bf16.mxu0 %v8365_v54 }
 0x39a   :  { %v1572_v21 = vpack.c.bf16 %v1560_v20, %v1557_v17  ;;  %7145 = vmatpush3.bf16.msra.mxu1 %v7892_v16  ;;  %v7924_v16 = vld [vmem:[%s9740_s4 + $0x2b0] sm:$0xff]   ;;  %v7925_v20 = vld [vmem:[%s9740_s4 + $0x2a8] sm:$0xff]  }
 0x39b   :  { %7170 = vmatprep.subr.bf16.mxu1 %v7893_v19 }
 0x39c   :  { %7146 = vmatprep.mubr.bf16.mxu1 %v1572_v21  ;;  %7395 = vmatpush3.bf16.msra.mxu0 %v8365_v54 }
 0x39d   :  { %7147 = vmatmul.mubr.bf16.vlgmr.msra.gmra.mxu1 %v1573_v22  ;;  %7396 = vmatprep.subr.bf16.mxu0 %v8372_v63 }
 0x39e   :  { %7171 = vmatpush3.bf16.msra.mxu1 %v7893_v19 }
 0x39f   :  { %7172 = vmatprep.subr.bf16.mxu1 %v7894_v23 }
 0x3a0   :  { %7397 = vmatpush3.bf16.msra.mxu0 %v8372_v63 }
 0x3a1   :  { %7398 = vmatprep.subr.bf16.mxu0 %v8377_v4 }
 0x3a2   :  { %7173 = vmatpush3.bf16.msra.mxu1 %v7894_v23 }
 0x3a3   :  { %7174 = vmatprep.subr.bf16.mxu1 %v7895_v24 }
 0x3a4   :  { %7399 = vmatpush3.bf16.msra.mxu0 %v8377_v4 }
 0x3a5   :  { %7400 = vmatprep.subr.bf16.mxu0 %v8381_v62 }
 0x3a6   :  { %7175 = vmatpush3.bf16.msra.mxu1 %v7895_v24 }
 0x3a7   :  { %7176 = vmatprep.subr.bf16.mxu1 %v7896_v25 }
 0x3a8   :  { %7401 = vmatpush3.bf16.msra.mxu0 %v8381_v62 }
 0x3a9   :  { %7402 = vmatprep.subr.bf16.mxu0 %v8346_v2 }
 0x3aa   :  { %7177 = vmatpush3.bf16.msra.mxu1 %v7896_v25  ;;  %v7926_v25 = vld [vmem:[%s9740_s4 + $0x2a0] sm:$0xff]  }
 0x3ab   :  { %7178 = vmatprep.subr.bf16.mxu1 %v7897_v26 }
 0x3ac   :  { %7403 = vmatpush3.bf16.msra.mxu0 %v8346_v2 }
 0x3ad   :  { %7404 = vmatprep.subr.bf16.mxu0 %v8340_v56 }
 0x3ae   :  { %7179 = vmatpush3.bf16.msra.mxu1 %v7897_v26 }
 0x3af   :  { %7180 = vmatprep.subr.bf16.mxu1 %v7898_v27 }
 0x3b0   :  { %7405 = vmatpush3.bf16.msra.mxu0 %v8340_v56 }
 0x3b1   :  { %7430 = vmatprep.subr.bf16.mxu0 %v8354_v42 }
 0x3b2   :  { %7181 = vmatpush3.bf16.msra.mxu1 %v7898_v27  ;;  %v7927_v27 = vld [vmem:[%s9740_s4 + $0x298] sm:$0xff]  }
 0x3b3   :  { %v7168_v31 = vpop.f32.mrf.mxu0  ;;  %7407 = vmatmul.mubr.bf16.vlgmr.msra.gmra.mxu0 %v7900_v28  ;;  %7182 = vmatprep.subr.bf16.mxu1 %v7901_v29  ;;  %v7928_v28 = vld [vmem:[%s9740_s4 + $0x290] sm:$0xff]  }
 0x3b4   :  { %7431 = vmatpush3.bf16.msra.mxu0 %v8354_v42  ;;  %7446 = vmatprep.mubr.bf16.mxu0 %v7909_v30 }
 0x3b5   :  { %v1743_v33 = vpop.f32.mrf.mxu0  ;;  %7432 = vmatprep.subr.bf16.mxu0 %v8357_v47 }
 0x3b6   :  { %7183 = vmatpush3.bf16.msra.mxu1 %v7901_v29  ;;  %v7929_v29 = vld [vmem:[%s9740_s4 + $0x288] sm:$0xff]  }
 0x3b7   :  { %v7169_v34 = vpop.f32.mrf.mxu0  ;;  %7184 = vmatprep.subr.bf16.mxu1 %v7902_v32 }
 0x3b8   :  { %7433 = vmatpush3.bf16.msra.mxu0 %v8357_v47  ;;  %v1759_v38 = vpack.c.bf16 %v7169_v34, %v7168_v31  ;;  %v7930_v31 = vld [vmem:[%s9740_s4 + $0x280] sm:$0xff]   ;;  %v7931_v34 = vld [vmem:[%s9740_s4 + $0x2f8] sm:$0xff]  }
 0x3b9   :  { %v1746_v36 = vpop.f32.mrf.mxu0  ;;  %7434 = vmatprep.subr.bf16.mxu0 %v8365_v54 }
 0x3ba   :  { %v1758_v37 = vpack.c.bf16 %v1746_v36, %v1743_v33  ;;  %7185 = vmatpush3.bf16.msra.mxu1 %v7902_v32 }
 0x3bb   :  { %7210 = vmatprep.subr.bf16.mxu1 %v7903_v35 }
 0x3bc   :  { %7186 = vmatprep.mubr.bf16.mxu1 %v1758_v37  ;;  %7435 = vmatpush3.bf16.msra.mxu0 %v8365_v54 }
 0x3bd   :  { %7187 = vmatmul.mubr.bf16.vlgmr.msra.gmra.mxu1 %v1759_v38  ;;  %7436 = vmatprep.subr.bf16.mxu0 %v8372_v63  ;;  %v7932_v38 = vld [vmem:[%s9740_s4 + $0x2f0] sm:$0xff]  }
 0x3be   :  { %7211 = vmatpush3.bf16.msra.mxu1 %v7903_v35 }
 0x3bf   :  { %7212 = vmatprep.subr.bf16.mxu1 %v7904_v39 }
 0x3c0   :  { %7437 = vmatpush3.bf16.msra.mxu0 %v8372_v63 }
 0x3c1   :  { %7438 = vmatprep.subr.bf16.mxu0 %v8377_v4 }
 0x3c2   :  { %7213 = vmatpush3.bf16.msra.mxu1 %v7904_v39 }
 0x3c3   :  { %7214 = vmatprep.subr.bf16.mxu1 %v7905_v40 }
 0x3c4   :  { %7439 = vmatpush3.bf16.msra.mxu0 %v8377_v4 }
 0x3c5   :  { %7440 = vmatprep.subr.bf16.mxu0 %v8381_v62 }
 0x3c6   :  { %7215 = vmatpush3.bf16.msra.mxu1 %v7905_v40 }
 0x3c7   :  { %7216 = vmatprep.subr.bf16.mxu1 %v7906_v41 }
 0x3c8   :  { %7441 = vmatpush3.bf16.msra.mxu0 %v8381_v62 }
 0x3c9   :  { %7442 = vmatprep.subr.bf16.mxu0 %v8346_v2 }
 0x3ca   :  { %7217 = vmatpush3.bf16.msra.mxu1 %v7906_v41 }
 0x3cb   :  { %7218 = vmatprep.subr.bf16.mxu1 %v7907_v43 }
 0x3cc   :  { %7443 = vmatpush3.bf16.msra.mxu0 %v8346_v2 }
 0x3cd   :  { %7444 = vmatprep.subr.bf16.mxu0 %v8340_v56 }
 0x3ce   :  { %7219 = vmatpush3.bf16.msra.mxu1 %v7907_v43  ;;  %v7933_v43 = vld [vmem:[%s9740_s4 + $0x2e8] sm:$0xff]  }
 0x3cf   :  { %7220 = vmatprep.subr.bf16.mxu1 %v7908_v45 }
 0x3d0   :  { %7445 = vmatpush3.bf16.msra.mxu0 %v8340_v56 }
 0x3d1   :  { %7470 = vmatprep.subr.bf16.mxu0 %v8354_v42 }
 0x3d2   :  { %7221 = vmatpush3.bf16.msra.mxu1 %v7908_v45 }
 0x3d3   :  { %v7208_v50 = vpop.f32.mrf.mxu0  ;;  %7447 = vmatmul.mubr.bf16.vlgmr.msra.gmra.mxu0 %v7910_v46  ;;  %7222 = vmatprep.subr.bf16.mxu1 %v7911_v48 }
 0x3d4   :  { %7471 = vmatpush3.bf16.msra.mxu0 %v8354_v42  ;;  %7486 = vmatprep.mubr.bf16.mxu0 %v7919_v49 }
 0x3d5   :  { %v1929_v52 = vpop.f32.mrf.mxu0  ;;  %7472 = vmatprep.subr.bf16.mxu0 %v8357_v47 }
 0x3d6   :  { %7223 = vmatpush3.bf16.msra.mxu1 %v7911_v48 }
 0x3d7   :  { %v7209_v53 = vpop.f32.mrf.mxu0  ;;  %7224 = vmatprep.subr.bf16.mxu1 %v7912_v51 }
 0x3d8   :  { %7473 = vmatpush3.bf16.msra.mxu0 %v8357_v47  ;;  %v1945_v42 = vpack.c.bf16 %v7209_v53, %v7208_v50  ;;  %v7934_v50 = vld [vmem:[%s9740_s4 + $0x2e0] sm:$0xff]   ;;  %v7936_v53 = vld [vmem:[%s9740_s4 + $0x2d0] sm:$0xff]  }
 0x3d9   :  { %v1932_v58 = vpop.f32.mrf.mxu0  ;;  %7474 = vmatprep.subr.bf16.mxu0 %v8365_v54 }
 0x3da   :  { %v1944_v61 = vpack.c.bf16 %v1932_v58, %v1929_v52  ;;  %7225 = vmatpush3.bf16.msra.mxu1 %v7912_v51  ;;  %v7935_v52 = vld [vmem:[%s9740_s4 + $0x2d8] sm:$0xff]  }
 0x3db   :  { %7250 = vmatprep.subr.bf16.mxu1 %v7913_v55 }
 0x3dc   :  { %7226 = vmatprep.mubr.bf16.mxu1 %v1944_v61  ;;  %7475 = vmatpush3.bf16.msra.mxu0 %v8365_v54  ;;  %v751_v54 = vadd.f32 %v750_v0, %v8631_v44  ;;  %v7938_v61 = vld [vmem:[%s9740_s4 + $0x2c0] sm:$0xff]  }
 0x3dd   :  { %v6988_v60 = vpop.f32.mrf.mxu1  ;;  %7227 = vmatmul.mubr.bf16.vlgmr.msra.gmra.mxu1 %v1945_v42  ;;  %7476 = vmatprep.subr.bf16.mxu0 %v8372_v63 }
 0x3de   :  { %v946_v47 = vadd.f32 %v6988_v60, %v8604_v57  ;;  %7251 = vmatpush3.bf16.msra.mxu1 %v7913_v55  ;;  %v7937_v55 = vld [vmem:[%s9740_s4 + $0x2c8] sm:$0xff]  }
 0x3df   :  { %v929_v5 = vpop.f32.mrf.mxu1  ;;  %7252 = vmatprep.subr.bf16.mxu1 %v7914_v3 }
 0x3e0   :  { %v944_v7 = vadd.f32 %v929_v5, %v8608_v59  ;;  %7477 = vmatpush3.bf16.msra.mxu0 %v8372_v63  ;;  %v7917_v63 = vld [vmem:[%s9740_s4 + $0x258] sm:$0xff]   ;;  %v7918_v59 = vld [vmem:[%s9740_s4 + $0x250] sm:$0xff]  }
 0x3e1   :  { %v6989_v8 = vpop.f32.mrf.mxu1  ;;  %7478 = vmatprep.subr.bf16.mxu0 %v8377_v4 }
 0x3e2   :  { %v947_v9 = vadd.f32 %v6989_v8, %v8610_v1  ;;  %7253 = vmatpush3.bf16.msra.mxu1 %v7914_v3  ;;  %v7939_v3 = vld [vmem:[%s9740_s4 + $0x338] sm:$0xff]  }
 0x3e3   :  { %v932_v57 = vpop.f32.mrf.mxu1  ;;  %7254 = vmatprep.subr.bf16.mxu1 %v7915_v6 }
 0x3e4   :  { %v945_v11 = vadd.f32 %v932_v57, %v751_v54  ;;  %7479 = vmatpush3.bf16.msra.mxu0 %v8377_v4  ;;  %v7920_v4 = vld [vmem:[%s9741_s3 + $0xf8] sm:$0xff]  }
 0x3e5   :  { %7480 = vmatprep.subr.bf16.mxu0 %v8381_v62 }
 0x3e6   :  { %7255 = vmatpush3.bf16.msra.mxu1 %v7915_v6  ;;  %v7940_v6 = vld [vmem:[%s9740_s4 + $0x330] sm:$0xff]  }
 0x3e7   :  { %7256 = vmatprep.subr.bf16.mxu1 %v7916_v10 }
 0x3e8   :  { %7481 = vmatpush3.bf16.msra.mxu0 %v8381_v62  ;;  %v7921_v62 = vld [vmem:[%s9740_s4 + $0x248] sm:$0xff]  }
 0x3e9   :  { %7482 = vmatprep.subr.bf16.mxu0 %v8346_v2 }
 0x3ea   :  { %7257 = vmatpush3.bf16.msra.mxu1 %v7916_v10  ;;  %v7942_v10 = vld [vmem:[%s9740_s4 + $0x320] sm:$0xff]  }
 0x3eb   :  { %7258 = vmatprep.subr.bf16.mxu1 %v7917_v63 }
 0x3ec   :  { %7483 = vmatpush3.bf16.msra.mxu0 %v8346_v2  ;;  %v7922_v2 = vld [vmem:[%s9740_s4 + $0x240] sm:$0xff]  }
 0x3ed   :  { %7484 = vmatprep.subr.bf16.mxu0 %v8340_v56 }
 0x3ee   :  { %7259 = vmatpush3.bf16.msra.mxu1 %v7917_v63  ;;  %v7944_v63 = vld [vmem:[%s9740_s4 + $0x310] sm:$0xff]  }
 0x3ef   :  { %7260 = vmatprep.subr.bf16.mxu1 %v7918_v59 }
 0x3f0   :  { %7485 = vmatpush3.bf16.msra.mxu0 %v8340_v56 }
 0x3f2   :  { %7261 = vmatpush3.bf16.msra.mxu1 %v7918_v59  ;;  %v7945_v59 = vld [vmem:[%s9740_s4 + $0x308] sm:$0xff]  }
 0x3f3   :  { %v7248_v1 = vpop.f32.mrf.mxu0  ;;  %7487 = vmatmul.mubr.bf16.vlgmr.msra.gmra.mxu0 %v7920_v4  ;;  %7262 = vmatprep.subr.bf16.mxu1 %v7921_v62 }
 0x3f5   :  { %v2115_v44 = vpop.f32.mrf.mxu0 }
 0x3f6   :  { %7263 = vmatpush3.bf16.msra.mxu1 %v7921_v62  ;;  %v7946_v62 = vld [vmem:[%s9740_s4 + $0x300] sm:$0xff]  }
 0x3f7   :  { %v7249_v12 = vpop.f32.mrf.mxu0  ;;  %7264 = vmatprep.subr.bf16.mxu1 %v7922_v2 }
 0x3f8   :  { %v2131_v56 = vpack.c.bf16 %v7249_v12, %v7248_v1 }
 0x3f9   :  { %v2118_v14 = vpop.f32.mrf.mxu0 }
 0x3fa   :  { %v2130_v15 = vpack.c.bf16 %v2118_v14, %v2115_v44  ;;  %7265 = vmatpush3.bf16.msra.mxu1 %v7922_v2  ;;  %v7947_v44 = vld [vmem:[%s9740_s4 + $0x378] sm:$0xff]  }
 0x3fb   :  { %7290 = vmatprep.subr.bf16.mxu1 %v7923_v13 }
 0x3fc   :  { %7266 = vmatprep.mubr.bf16.mxu1 %v2130_v15  ;;  %v7948_v15 = vld [vmem:[%s9740_s4 + $0x370] sm:$0xff]  }
 0x3fd   :  { %v7028_v17 = vpop.f32.mrf.mxu1  ;;  %7267 = vmatmul.mubr.bf16.vlgmr.msra.gmra.mxu1 %v2131_v56  ;;  %v7949_v56 = vld [vmem:[%s9740_s4 + $0x368] sm:$0xff]  }
 0x3fe   :  { %v1132_v18 = vadd.f32 %v7028_v17, %v946_v47  ;;  %7291 = vmatpush3.bf16.msra.mxu1 %v7923_v13  ;;  %v7951_v17 = vld [vmem:[%s9740_s4 + $0x358] sm:$0xff]  }
 0x3ff   :  { %v1115_v19 = vpop.f32.mrf.mxu1  ;;  %7292 = vmatprep.subr.bf16.mxu1 %v7924_v16 }
 0x400   :  { %v1130_v21 = vadd.f32 %v1115_v19, %v944_v7  ;;  %v7953_v19 = vld [vmem:[%s9740_s4 + $0x348] sm:$0xff]  }
 0x401   :  { %v7029_v22 = vpop.f32.mrf.mxu1 }
 0x402   :  { %v1133_v23 = vadd.f32 %v7029_v22, %v947_v9  ;;  %7293 = vmatpush3.bf16.msra.mxu1 %v7924_v16  ;;  %v7941_v9 = vld [vmem:[%s9740_s4 + $0x328] sm:$0xff]   ;;  %v7950_v16 = vld [vmem:[%s9740_s4 + $0x360] sm:$0xff]  }
 0x403   :  { %v1118_v24 = vpop.f32.mrf.mxu1  ;;  %7294 = vmatprep.subr.bf16.mxu1 %v7925_v20 }
 0x404   :  { %v1131_v26 = vadd.f32 %v1118_v24, %v945_v11  ;;  %v7943_v11 = vld [vmem:[%s9740_s4 + $0x318] sm:$0xff]  }
 0x405   :  { %v7955_v24 = vld [vmem:[%s9740_s4 + $0x3b8] sm:$0xff]  }
 0x406   :  { %7295 = vmatpush3.bf16.msra.mxu1 %v7925_v20 }
 0x407   :  { %7296 = vmatprep.subr.bf16.mxu1 %v7926_v25 }
 0x40a   :  { %7297 = vmatpush3.bf16.msra.mxu1 %v7926_v25 }
 0x40b   :  { %7298 = vmatprep.subr.bf16.mxu1 %v7927_v27 }
 0x40e   :  { %7299 = vmatpush3.bf16.msra.mxu1 %v7927_v27 }
 0x40f   :  { %7300 = vmatprep.subr.bf16.mxu1 %v7928_v28 }
 0x412   :  { %7301 = vmatpush3.bf16.msra.mxu1 %v7928_v28  ;;  %v7956_v28 = vld [vmem:[%s9740_s4 + $0x3b0] sm:$0xff]  }
 0x413   :  { %v7288_v30 = vpop.f32.mrf.mxu0  ;;  %7302 = vmatprep.subr.bf16.mxu1 %v7929_v29 }
 0x415   :  { %v2301_v32 = vpop.f32.mrf.mxu0 }
 0x416   :  { %7303 = vmatpush3.bf16.msra.mxu1 %v7929_v29  ;;  %v7957_v29 = vld [vmem:[%s9740_s4 + $0x3a8] sm:$0xff]  }
 0x417   :  { %v7289_v33 = vpop.f32.mrf.mxu0  ;;  %7304 = vmatprep.subr.bf16.mxu1 %v7930_v31 }
 0x418   :  { %v2317_v37 = vpack.c.bf16 %v7289_v33, %v7288_v30  ;;  %v7958_v30 = vld [vmem:[%s9740_s4 + $0x3a0] sm:$0xff]   ;;  %v7961_v33 = vld [vmem:[%s9740_s4 + $0x388] sm:$0xff]  }
 0x419   :  { %v2304_v35 = vpop.f32.mrf.mxu0 }
 0x41a   :  { %v2316_v36 = vpack.c.bf16 %v2304_v35, %v2301_v32  ;;  %7305 = vmatpush3.bf16.msra.mxu1 %v7930_v31  ;;  %v7959_v31 = vld [vmem:[%s9740_s4 + $0x398] sm:$0xff]   ;;  %v7960_v32 = vld [vmem:[%s9740_s4 + $0x390] sm:$0xff]   ;;  %v7962_v35 = vld [vmem:[%s9740_s4 + $0x380] sm:$0xff]  }
 0x41b   :  { %7330 = vmatprep.subr.bf16.mxu1 %v7931_v34 }
 0x41c   :  { %7306 = vmatprep.mubr.bf16.mxu1 %v2316_v36 }
 0x41d   :  { %v7068_v39 = vpop.f32.mrf.mxu1  ;;  %7307 = vmatmul.mubr.bf16.vlgmr.msra.gmra.mxu1 %v2317_v37 }
 0x41e   :  { %v1318_v40 = vadd.f32 %v7068_v39, %v1132_v18  ;;  %7331 = vmatpush3.bf16.msra.mxu1 %v7931_v34  ;;  %v7952_v18 = vld [vmem:[%s9740_s4 + $0x350] sm:$0xff]  }
 0x41f   :  { %v1301_v41 = vpop.f32.mrf.mxu1  ;;  %7332 = vmatprep.subr.bf16.mxu1 %v7932_v38 }
 0x420   :  { %v1316_v45 = vadd.f32 %v1301_v41, %v1130_v21  ;;  %v7954_v21 = vld [vmem:[%s9740_s4 + $0x340] sm:$0xff]  }
 0x421   :  { %v7069_v46 = vpop.f32.mrf.mxu1 }
 0x422   :  { %v8987_v48 = vadd.f32 %v7069_v46, %v1133_v23  ;;  %7333 = vmatpush3.bf16.msra.mxu1 %v7932_v38  ;;  %v7963_v38 = vld [vmem:[%s9740_s4 + $0x3f8] sm:$0xff]   ;;  %v7966_v46 = vld [vmem:[%s9740_s4 + $0x3e0] sm:$0xff]  }
 0x423   :  { %v1304_v49 = vpop.f32.mrf.mxu1  ;;  %7334 = vmatprep.subr.bf16.mxu1 %v7933_v43 }
 0x424   :  { %v8992_v51 = vadd.f32 %v1304_v49, %v1131_v26  ;;  %v7967_v49 = vld [vmem:[%s9740_s4 + $0x3d8] sm:$0xff]  }
 0x426   :  { %7335 = vmatpush3.bf16.msra.mxu1 %v7933_v43  ;;  %v7964_v43 = vld [vmem:[%s9740_s4 + $0x3f0] sm:$0xff]  }
 0x427   :  { %7336 = vmatprep.subr.bf16.mxu1 %v7934_v50 }
 0x42a   :  { %7337 = vmatpush3.bf16.msra.mxu1 %v7934_v50  ;;  %v7968_v50 = vld [vmem:[%s9740_s4 + $0x3d0] sm:$0xff]  }
 0x42b   :  { %7338 = vmatprep.subr.bf16.mxu1 %v7935_v52 }
 0x42e   :  { %7339 = vmatpush3.bf16.msra.mxu1 %v7935_v52  ;;  %v7969_v52 = vld [vmem:[%s9740_s4 + $0x3c8] sm:$0xff]  }
 0x42f   :  { %7340 = vmatprep.subr.bf16.mxu1 %v7936_v53 }
 0x432   :  { %7341 = vmatpush3.bf16.msra.mxu1 %v7936_v53 }
 0x433   :  { %v7328_v58 = vpop.f32.mrf.mxu0  ;;  %7342 = vmatprep.subr.bf16.mxu1 %v7937_v55 }
 0x435   :  { %v2487_v0 = vpop.f32.mrf.mxu0 }
 0x436   :  { %7343 = vmatpush3.bf16.msra.mxu1 %v7937_v55  ;;  %v7970_v55 = vld [vmem:[%s9740_s4 + $0x3c0] sm:$0xff]  }
 0x437   :  { %v7329_v42 = vpop.f32.mrf.mxu0  ;;  %7344 = vmatprep.subr.bf16.mxu1 %v7938_v61 }
 0x438   :  { %v2503_v5 = vpack.c.bf16 %v7329_v42, %v7328_v58 }
 0x439   :  { %v2490_v60 = vpop.f32.mrf.mxu0 }
 0x43a   :  { %v2502_v47 = vpack.c.bf16 %v2490_v60, %v2487_v0  ;;  %7345 = vmatpush3.bf16.msra.mxu1 %v7938_v61 }
 0x43b   :  { %7370 = vmatprep.subr.bf16.mxu1 %v7939_v3 }
 0x43c   :  { %7346 = vmatprep.mubr.bf16.mxu1 %v2502_v47 }
 0x43d   :  { %v7108_v7 = vpop.f32.mrf.mxu1  ;;  %7347 = vmatmul.mubr.bf16.vlgmr.msra.gmra.mxu1 %v2503_v5 }
 0x43e   :  { %v9012_v8 = vadd.f32 %v7108_v7, %v1318_v40  ;;  %7371 = vmatpush3.bf16.msra.mxu1 %v7939_v3 }
 0x43f   :  { %v1487_v54 = vpop.f32.mrf.mxu1  ;;  %7372 = vmatprep.subr.bf16.mxu1 %v7940_v6 }
 0x440   :  { %v9017_v57 = vadd.f32 %v1487_v54, %v1316_v45  ;;  %v7965_v45 = vld [vmem:[%s9740_s4 + $0x3e8] sm:$0xff]   ;;  %v8132_v54 = vmov 0.0  }
 0x441   :  { %v7109_v60 = vpop.f32.mrf.mxu1  ;;  %7510 = vmatprep.subr.bf16.mxu0 %v8132_v54  ;;  %7514 = vmatprep.mubr.msk.bf16.mxu0 %vm8133_vm0, %v8132_v54 }
 0x442   :  { %7373 = vmatpush3.bf16.msra.mxu1 %v7940_v6 }
 0x443   :  { %7374 = vmatprep.subr.bf16.mxu1 %v7941_v9  ;;  %v9106_v47 = vpop.f32.mrf.mxu1 }
 0x446   :  { %7375 = vmatpush3.bf16.msra.mxu1 %v7941_v9 }
 0x447   :  { %7376 = vmatprep.subr.bf16.mxu1 %v7942_v10 }
 0x44a   :  { %7377 = vmatpush3.bf16.msra.mxu1 %v7942_v10 }
 0x44b   :  { %7378 = vmatprep.subr.bf16.mxu1 %v7943_v11 }
 0x44e   :  { %7379 = vmatpush3.bf16.msra.mxu1 %v7943_v11 }
 0x44f   :  { %7380 = vmatprep.subr.bf16.mxu1 %v7944_v63 }
 0x452   :  { %7381 = vmatpush3.bf16.msra.mxu1 %v7944_v63 }
 0x453   :  { %v7368_v4 = vpop.f32.mrf.mxu0  ;;  %7382 = vmatprep.subr.bf16.mxu1 %v7945_v59 }
 0x455   :  { %v2673_v1 = vpop.f32.mrf.mxu0 }
 0x456   :  { %7383 = vmatpush3.bf16.msra.mxu1 %v7945_v59 }
 0x457   :  { %v7369_v2 = vpop.f32.mrf.mxu0  ;;  %7384 = vmatprep.subr.bf16.mxu1 %v7946_v62 }
 0x458   :  { %v2689_v14 = vpack.c.bf16 %v7369_v2, %v7368_v4  ;;  %v7973_v4 = vld [vmem:[%s9744_s7 + $0x38] sm:$0xff]  }
 0x459   :  { %v2676_v12 = vpop.f32.mrf.mxu0 }
 0x45a   :  { %v2688_v13 = vpack.c.bf16 %v2676_v12, %v2673_v1  ;;  %7385 = vmatpush3.bf16.msra.mxu1 %v7946_v62  ;;  %v7974_v1 = vld [vmem:[%s9744_s7 + $0x30] sm:$0xff]  }
 0x45b   :  { %7410 = vmatprep.subr.bf16.mxu1 %v7947_v44 }
 0x45c   :  { %7386 = vmatprep.mubr.bf16.mxu1 %v2688_v13  ;;  %v7978_v13 = vld [vmem:[%s9744_s7 + $0x20] sm:$0xff]  }
 0x45d   :  { %7387 = vmatmul.mubr.bf16.vlgmr.msra.gmra.mxu1 %v2689_v14  ;;  %v7148_v5 = vpop.f32.mrf.mxu1 }
 0x45e   :  { %7411 = vmatpush3.bf16.msra.mxu1 %v7947_v44  ;;  %v7976_v44 = vld [vmem:[%s9744_s7 + $0x28] sm:$0xff]  }
 0x45f   :  { %7412 = vmatprep.subr.bf16.mxu1 %v7948_v15  ;;  %v1673_v6 = vpop.f32.mrf.mxu1 }
 0x461   :  { %v7149_v7 = vpop.f32.mrf.mxu1 }
 0x462   :  { %7413 = vmatpush3.bf16.msra.mxu1 %v7948_v15  ;;  %v7980_v15 = vld [vmem:[%s9744_s7 + $0x18] sm:$0xff]  }
 0x463   :  { %7414 = vmatprep.subr.bf16.mxu1 %v7949_v56  ;;  %v1676_v9 = vpop.f32.mrf.mxu1 }
 0x466   :  { %7415 = vmatpush3.bf16.msra.mxu1 %v7949_v56 }
 0x467   :  { %7416 = vmatprep.subr.bf16.mxu1 %v7950_v16 }
 0x46a   :  { %7417 = vmatpush3.bf16.msra.mxu1 %v7950_v16  ;;  %v7982_v16 = vld [vmem:[%s9744_s7 + $0x10] sm:$0xff]  }
 0x46b   :  { %7418 = vmatprep.subr.bf16.mxu1 %v7951_v17 }
 0x46e   :  { %7419 = vmatpush3.bf16.msra.mxu1 %v7951_v17 }
 0x46f   :  { %7420 = vmatprep.subr.bf16.mxu1 %v7952_v18 }
 0x472   :  { %7421 = vmatpush3.bf16.msra.mxu1 %v7952_v18 }
 0x473   :  { %v7408_v20 = vpop.f32.mrf.mxu0  ;;  %7422 = vmatprep.subr.bf16.mxu1 %v7953_v19 }
 0x475   :  { %v2859_v22 = vpop.f32.mrf.mxu0 }
 0x476   :  { %7423 = vmatpush3.bf16.msra.mxu1 %v7953_v19 }
 0x477   :  { %v7409_v23 = vpop.f32.mrf.mxu0  ;;  %7424 = vmatprep.subr.bf16.mxu1 %v7954_v21 }
 0x478   :  { %v2875_v27 = vpack.c.bf16 %v7409_v23, %v7408_v20 }
 0x479   :  { %v2862_v25 = vpop.f32.mrf.mxu0 }
 0x47a   :  { %v2874_v26 = vpack.c.bf16 %v2862_v25, %v2859_v22  ;;  %7425 = vmatpush3.bf16.msra.mxu1 %v7954_v21 }
 0x47b   :  { %7450 = vmatprep.subr.bf16.mxu1 %v7955_v24 }
 0x47c   :  { %7426 = vmatprep.mubr.bf16.mxu1 %v2874_v26 }
 0x47d   :  { %7427 = vmatmul.mubr.bf16.vlgmr.msra.gmra.mxu1 %v2875_v27  ;;  %v7188_v10 = vpop.f32.mrf.mxu1 }
 0x47e   :  { %7451 = vmatpush3.bf16.msra.mxu1 %v7955_v24 }
 0x47f   :  { %7452 = vmatprep.subr.bf16.mxu1 %v7956_v28  ;;  %v1859_v11 = vpop.f32.mrf.mxu1 }
 0x481   :  { %v7189_v63 = vpop.f32.mrf.mxu1 }
 0x482   :  { %7453 = vmatpush3.bf16.msra.mxu1 %v7956_v28 }
 0x483   :  { %7454 = vmatprep.subr.bf16.mxu1 %v7957_v29  ;;  %v1862_v59 = vpop.f32.mrf.mxu1 }
 0x486   :  { %7455 = vmatpush3.bf16.msra.mxu1 %v7957_v29 }
 0x487   :  { %7456 = vmatprep.subr.bf16.mxu1 %v7958_v30 }
 0x48a   :  { %7457 = vmatpush3.bf16.msra.mxu1 %v7958_v30 }
 0x48b   :  { %7458 = vmatprep.subr.bf16.mxu1 %v7959_v31 }
 0x48e   :  { %7459 = vmatpush3.bf16.msra.mxu1 %v7959_v31 }
 0x48f   :  { %7460 = vmatprep.subr.bf16.mxu1 %v7960_v32 }
 0x492   :  { %7461 = vmatpush3.bf16.msra.mxu1 %v7960_v32 }
 0x493   :  { %v7448_v34 = vpop.f32.mrf.mxu0  ;;  %7462 = vmatprep.subr.bf16.mxu1 %v7961_v33 }
 0x495   :  { %v3045_v36 = vpop.f32.mrf.mxu0 }
 0x496   :  { %7463 = vmatpush3.bf16.msra.mxu1 %v7961_v33 }
 0x497   :  { %v7449_v37 = vpop.f32.mrf.mxu0  ;;  %7464 = vmatprep.subr.bf16.mxu1 %v7962_v35 }
 0x498   :  { %v3061_v41 = vpack.c.bf16 %v7449_v37, %v7448_v34  ;;  %v1505_v37 = vadd.f32 %v7109_v60, %v8987_v48 }
 0x499   :  { %v3048_v39 = vpop.f32.mrf.mxu0 }
 0x49a   :  { %v3060_v40 = vpack.c.bf16 %v3048_v39, %v3045_v36  ;;  %7465 = vmatpush3.bf16.msra.mxu1 %v7962_v35  ;;  %v1690_v35 = vadd.f32 %v7148_v5, %v9012_v8 }
 0x49b   :  { %7490 = vmatprep.subr.bf16.mxu1 %v7963_v38 }
 0x49c   :  { %7466 = vmatprep.mubr.bf16.mxu1 %v3060_v40  ;;  %v1876_v39 = vadd.f32 %v7188_v10, %v1690_v35  ;;  %v7972_v35 = vld [vmem:[%s9743_s6 + $0x8] sm:$0xff]  }
 0x49d   :  { %7467 = vmatmul.mubr.bf16.vlgmr.msra.gmra.mxu1 %v3061_v41  ;;  %v7228_v62 = vpop.f32.mrf.mxu1  ;;  %v1503_v41 = vadd.f32 %v9106_v47, %v8992_v51 }
 0x49e   :  { %7491 = vmatpush3.bf16.msra.mxu1 %v7963_v38  ;;  %v1688_v38 = vadd.f32 %v1673_v6, %v9017_v57 }
 0x49f   :  { %7492 = vmatprep.subr.bf16.mxu1 %v7964_v43  ;;  %v2045_v2 = vpop.f32.mrf.mxu1 }
 0x4a1   :  { %v7229_v12 = vpop.f32.mrf.mxu1 }
 0x4a2   :  { %7493 = vmatpush3.bf16.msra.mxu1 %v7964_v43  ;;  %v1691_v43 = vadd.f32 %v7149_v7, %v1505_v37  ;;  %v7977_v37 = vld [vmem:[%s9744_s7 + $0x70] sm:$0xff]  }
 0x4a3   :  { %7494 = vmatprep.subr.bf16.mxu1 %v7965_v45  ;;  %v2048_v14 = vpop.f32.mrf.mxu1 }
 0x4a6   :  { %7495 = vmatpush3.bf16.msra.mxu1 %v7965_v45  ;;  %v1874_v45 = vadd.f32 %v1859_v11, %v1688_v38  ;;  %v7979_v38 = vld [vmem:[%s9744_s7 + $0x68] sm:$0xff]  }
 0x4a7   :  { %7496 = vmatprep.subr.bf16.mxu1 %v7966_v46 }
 0x4aa   :  { %7497 = vmatpush3.bf16.msra.mxu1 %v7966_v46  ;;  %v2062_v46 = vadd.f32 %v7228_v62, %v1876_v39  ;;  %v7981_v39 = vld [vmem:[%s9744_s7 + $0x60] sm:$0xff]  }
 0x4ab   :  { %7498 = vmatprep.subr.bf16.mxu1 %v7967_v49 }
 0x4ae   :  { %7499 = vmatpush3.bf16.msra.mxu1 %v7967_v49  ;;  %v1689_v49 = vadd.f32 %v1676_v9, %v1503_v41  ;;  %v7984_v41 = vld [vmem:[%s9744_s7 + $0x8] sm:$0xff]  }
 0x4af   :  { %7500 = vmatprep.subr.bf16.mxu1 %v7968_v50 }
 0x4b2   :  { %7501 = vmatpush3.bf16.msra.mxu1 %v7968_v50  ;;  %v1877_v50 = vadd.f32 %v7189_v63, %v1691_v43  ;;  %v7985_v43 = vld [vmem:[%s9744_s7 + $0x50] sm:$0xff]  }
 0x4b3   :  { %v7488_v53 = vpop.f32.mrf.mxu0  ;;  %7502 = vmatprep.subr.bf16.mxu1 %v7969_v52 }
 0x4b4   :  { %v2063_v8 = vadd.f32 %v7229_v12, %v1877_v50 }
 0x4b5   :  { %v3231_v58 = vpop.f32.mrf.mxu0 }
 0x4b6   :  { %7503 = vmatpush3.bf16.msra.mxu1 %v7969_v52  ;;  %v2060_v52 = vadd.f32 %v2045_v2, %v1874_v45  ;;  %v7986_v45 = vld [vmem:[%s9744_s7] sm:$0xff]  }
 0x4b7   :  { %v7489_v61 = vpop.f32.mrf.mxu0  ;;  %7504 = vmatprep.subr.bf16.mxu1 %v7970_v55 }
 0x4b8   :  { %v3247_v3 = vpack.c.bf16 %v7489_v61, %v7488_v53 }
 0x4b9   :  { %v3234_v0 = vpop.f32.mrf.mxu0 }
 0x4ba   :  { %v3246_v42 = vpack.c.bf16 %v3234_v0, %v3231_v58  ;;  %7505 = vmatpush3.bf16.msra.mxu1 %v7970_v55  ;;  %v1875_v58 = vadd.f32 %v1862_v59, %v1689_v49  ;;  %v7988_v49 = vld [vmem:[%s9744_s7 + $0x40] sm:$0xff]  }
 0x4bb   :  { %7546 = vmatprep.subr.bf16.mxu1 %v8132_v54 }
 0x4bc   :  { %7506 = vmatprep.mubr.bf16.mxu1 %v3246_v42  ;;  %v2061_v48 = vadd.f32 %v2048_v14, %v1875_v58 }
 0x4bd   :  { %7507 = vmatmul.mubr.bf16.vlgmr.msra.gmra.mxu1 %v3247_v3  ;;  %v7268_v56 = vpop.f32.mrf.mxu1 }
 0x4be   :  { %7562 = vmatprep.mubr.msk.bf16.mxu1 %vm8133_vm0, %v8132_v54  ;;  %7547 = vmatpush3.bf16.msra.mxu1 %v7973_v4  ;;  %v2248_v53 = vadd.f32 %v7268_v56, %v2062_v46  ;;  %v7987_v46 = vld [vmem:[%s9744_s7 + $0x48] sm:$0xff]  }
 0x4bf   :  { %7548 = vmatprep.subr.bf16.mxu1 %v8132_v54  ;;  %v2231_v17 = vpop.f32.mrf.mxu1 }
 0x4c0   :  { %v2246_v61 = vadd.f32 %v2231_v17, %v2060_v52 }
 0x4c1   :  { %v7269_v18 = vpop.f32.mrf.mxu1 }
 0x4c2   :  { %7549 = vmatpush3.bf16.msra.mxu1 %v7974_v1  ;;  %v2249_v42 = vadd.f32 %v7269_v18, %v2063_v8 }
 0x4c3   :  { %7550 = vmatprep.subr.bf16.mxu1 %v8132_v54  ;;  %v2234_v19 = vpop.f32.mrf.mxu1 }
 0x4c4   :  { %v2247_v5 = vadd.f32 %v2234_v19, %v2061_v48 }
 0x4c6   :  { %7551 = vmatpush3.bf16.msra.mxu1 %v7976_v44 }
 0x4c7   :  { %7552 = vmatprep.subr.bf16.mxu1 %v8132_v54 }
 0x4ca   :  { %7553 = vmatpush3.bf16.msra.mxu1 %v7978_v13 }
 0x4cb   :  { %7554 = vmatprep.subr.bf16.mxu1 %v8132_v54 }
 0x4ce   :  { %7555 = vmatpush3.bf16.msra.mxu1 %v7980_v15  ;;  %v6030_v15 = vld [vmem:[%s9745_s5] ss:$0 sm:$0xff] }
 0x4cf   :  { %7556 = vmatprep.subr.bf16.mxu1 %v8132_v54 }
 0x4d2   :  { %7557 = vmatpush3.bf16.msra.mxu1 %v7982_v16 }
 0x4d3   :  { %7558 = vmatprep.subr.bf16.mxu1 %v8132_v54 }
 0x4d6   :  { %7559 = vmatpush3.bf16.msra.mxu1 %v7984_v41  ;;  %v8016_v41 = vld [vmem:[%s9744_s7 + $0x168] sm:$0xff]  }
 0x4d7   :  { %7560 = vmatprep.subr.bf16.mxu1 %v8132_v54 }
 0x4da   :  { %7561 = vmatpush3.bf16.msra.mxu1 %v7986_v45  ;;  %v8017_v45 = vld [vmem:[%s9744_s7 + $0x110] sm:$0xff]  }
 0x4db   :  { %7574 = vmatprep.subr.bf16.mxu1 %v8132_v54 }
 0x4dd   :  { %v7308_v20 = vpop.f32.mrf.mxu1 }
 0x4de   :  { %v2434_v0 = vadd.f32 %v7308_v20, %v2248_v53 }
 0x4df   :  { %v2417_v21 = vpop.f32.mrf.mxu1 }
 0x4e0   :  { %v2432_v57 = vadd.f32 %v2417_v21, %v2246_v61 }
 0x4e1   :  { %v7309_v22 = vpop.f32.mrf.mxu1 }
 0x4e2   :  { %v2435_v6 = vadd.f32 %v7309_v22, %v2249_v42 }
 0x4e3   :  { %v2420_v23 = vpop.f32.mrf.mxu1 }
 0x4e4   :  { %v2433_v7 = vadd.f32 %v2420_v23, %v2247_v5  ;;  %v7989_v5 = vld [vmem:[%s9743_s6 + $0x10] sm:$0xff]  }
 0x4fd   :  { %v7348_v24 = vpop.f32.mrf.mxu1 }
 0x4fe   :  { %v2620_v3 = vadd.f32 %v7348_v24, %v2434_v0  ;;  %v7992_v0 = vld [vmem:[%s9744_s7 + $0xb0] sm:$0xff]  }
 0x4ff   :  { %v2603_v25 = vpop.f32.mrf.mxu1 }
 0x500   :  { %v2618_v51 = vadd.f32 %v2603_v25, %v2432_v57 }
 0x501   :  { %v7349_v26 = vpop.f32.mrf.mxu1 }
 0x502   :  { %v2621_v10 = vadd.f32 %v7349_v26, %v2435_v6  ;;  %v7990_v6 = vld [vmem:[%s9743_s6 + $0x18] sm:$0xff]  }
 0x503   :  { %v2606_v27 = vpop.f32.mrf.mxu1 }
 0x504   :  { %v2619_v4 = vadd.f32 %v2606_v27, %v2433_v7  ;;  %v7996_v7 = vld [vmem:[%s9744_s7 + $0xf0] sm:$0xff]  }
 0x51d   :  { %v7388_v28 = vpop.f32.mrf.mxu1 }
 0x51e   :  { %v2806_v47 = vadd.f32 %v7388_v28, %v2620_v3  ;;  %v7993_v3 = vld [vmem:[%s9744_s7 + $0xa8] sm:$0xff]  }
 0x51f   :  { %v2789_v29 = vpop.f32.mrf.mxu1 }
 0x520   :  { %v2804_v9 = vadd.f32 %v2789_v29, %v2618_v51  ;;  %v7994_v51 = vld [vmem:[%s9744_s7 + $0xf8] sm:$0xff]  }
 0x521   :  { %v7389_v30 = vpop.f32.mrf.mxu1 }
 0x522   :  { %v2807_v62 = vadd.f32 %v7389_v30, %v2621_v10  ;;  %v7997_v10 = vld [vmem:[%s9744_s7 + $0x98] sm:$0xff]  }
 0x523   :  { %v2792_v31 = vpop.f32.mrf.mxu1 }
 0x524   :  { %v2805_v44 = vadd.f32 %v2792_v31, %v2619_v4  ;;  %v8001_v4 = vld [vmem:[%s9744_s7 + $0x88] sm:$0xff]  }
 0x53d   :  { %v7428_v32 = vpop.f32.mrf.mxu1 }
 0x53e   :  { %v2992_v11 = vadd.f32 %v7428_v32, %v2806_v47  ;;  %v7995_v47 = vld [vmem:[%s9744_s7 + $0xa0] sm:$0xff]  }
 0x53f   :  { %v2975_v33 = vpop.f32.mrf.mxu1 }
 0x540   :  { %v2990_v59 = vadd.f32 %v2975_v33, %v2804_v9  ;;  %v7998_v9 = vld [vmem:[%s9744_s7 + $0xe8] sm:$0xff]  }
 0x541   :  { %v7429_v34 = vpop.f32.mrf.mxu1 }
 0x542   :  { %v2993_v12 = vadd.f32 %v7429_v34, %v2807_v62  ;;  %v7971_v34 = vld [vmem:[%s9743_s6] sm:$0xff]   ;;  %v8002_v62 = vld [vmem:[%s9744_s7 + $0xd8] sm:$0xff]  }
 0x543   :  { %v2978_v36 = vpop.f32.mrf.mxu1 }
 0x544   :  { %v2991_v16 = vadd.f32 %v2978_v36, %v2805_v44  ;;  %v7975_v36 = vld [vmem:[%s9744_s7 + $0x78] sm:$0xff]   ;;  %v8006_v44 = vld [vmem:[%s9744_s7 + $0xc0] sm:$0xff]  }
 0x55d   :  { %v7468_v40 = vpop.f32.mrf.mxu1 }
 0x55e   :  { %v3178_v1 = vadd.f32 %v7468_v40, %v2992_v11  ;;  %v7983_v40 = vld [vmem:[%s9744_s7 + $0x58] sm:$0xff]   ;;  %v7999_v11 = vld [vmem:[%s9744_s7 + $0x90] sm:$0xff]  }
 0x55f   :  { %v3161_v55 = vpop.f32.mrf.mxu1 }
 0x560   :  { %v3176_v13 = vadd.f32 %v3161_v55, %v2990_v59  ;;  %v7991_v55 = vld [vmem:[%s9744_s7 + $0xb8] sm:$0xff]   ;;  %v8003_v59 = vld [vmem:[%s9744_s7 + $0x80] sm:$0xff]  }
 0x561   :  { %v7469_v60 = vpop.f32.mrf.mxu1 }
 0x562   :  { %v3179_v17 = vadd.f32 %v7469_v60, %v2993_v12 }
 0x563   :  { %v3164_v63 = vpop.f32.mrf.mxu1 }
 0x564   :  { %v3177_v20 = vadd.f32 %v3164_v63, %v2991_v16  ;;  %v8000_v63 = vld [vmem:[%s9744_s7 + $0xe0] sm:$0xff]  }
 0x57d   :  { %v7508_v2 = vpop.f32.mrf.mxu1 }
 0x57e   :  { %v3364_v14 = vadd.f32 %v7508_v2, %v3178_v1  ;;  %v8004_v1 = vld [vmem:[%s9744_s7 + $0xd0] sm:$0xff]   ;;  %v8005_v2 = vld [vmem:[%s9744_s7 + $0xc8] sm:$0xff]  }
 0x57f   :  { %v3347_v56 = vpop.f32.mrf.mxu1 }
 0x580   :  { %v3362_v18 = vadd.f32 %v3347_v56, %v3176_v13  ;;  %v3375_v21 = vadd.f32 %v6030_v15, %v3364_v14 }
 0x581   :  { %v7509_v19 = vpop.f32.mrf.mxu1 }
 0x582   :  { %v3365_v22 = vadd.f32 %v7509_v19, %v3179_v17  ;;  %v3373_v24 = vadd.f32 %v6030_v15, %v3362_v18  ;;  %v3379_v27 = vmax.f32 %v3375_v21, 0.0 }
 0x583   :  { %v3350_v23 = vpop.f32.mrf.mxu1 }
 0x584   :  { %v3376_v25 = vadd.f32 %v6030_v15, %v3365_v22  ;;  %v3363_v26 = vadd.f32 %v3350_v23, %v3177_v20  ;;  %v3377_v30 = vmax.f32 %v3373_v24, 0.0 }
 0x586   :  { %v3380_v28 = vmax.f32 %v3376_v25, 0.0  ;;  %v3374_v29 = vadd.f32 %v6030_v15, %v3363_v26 }
 0x588   :  { %v9146_v31 = vpack.c.bf16 %v3380_v28, %v3379_v27  ;;  %v3378_v32 = vmax.f32 %v3374_v29, 0.0  ;;  %v8007_v28 = vld [vmem:[%s9743_s6 + $0x20] sm:$0xff]  }
 0x58a   :  { %v9148_v33 = vpack.c.bf16 %v3378_v32, %v3377_v30  ;;  %7511 = vmatpush3.bf16.msra.mxu0 %v9146_v31  ;;  %v8009_v32 = vld [vmem:[%s9744_s7 + $0x138] sm:$0xff]  }
 0x58b   :  { %7512 = vmatprep.subr.bf16.mxu0 %v8132_v54 }
 0x58e   :  { %7513 = vmatpush3.bf16.msra.mxu0 %v9148_v33 }
 0x58f   :  { %7518 = vmatprep.subr.bf16.mxu0 %v8132_v54 }
 0x591   :  { %7515 = vmatmul.mubr.msk.bf16.vlgmr.msra.gmra.mxu0 %vm3390_vm1, %v7971_v34 }
 0x592   :  { %7519 = vmatpush3.bf16.msra.mxu0 %v9146_v31  ;;  %7522 = vmatprep.mubr.msk.bf16.mxu0 %vm8133_vm0, %v8132_v54 }
 0x593   :  { %7520 = vmatprep.subr.bf16.mxu0 %v8132_v54 }
 0x596   :  { %7521 = vmatpush3.bf16.msra.mxu0 %v9148_v33 }
 0x597   :  { %7526 = vmatprep.subr.bf16.mxu0 %v8132_v54 }
 0x599   :  { %7523 = vmatmul.mubr.msk.bf16.vlgmr.msra.gmra.mxu0 %vm3390_vm1, %v7972_v35  ;;  %v8010_v35 = vld [vmem:[%s9744_s7 + $0x130] sm:$0xff]  }
 0x59a   :  { %7527 = vmatpush3.bf16.msra.mxu0 %v7975_v36  ;;  %7542 = vmatprep.mubr.msk.bf16.mxu0 %vm8133_vm0, %v8132_v54  ;;  %v8008_v36 = vld [vmem:[%s9743_s6 + $0x28] sm:$0xff]  }
 0x59b   :  { %7528 = vmatprep.subr.bf16.mxu0 %v8132_v54 }
 0x59e   :  { %7529 = vmatpush3.bf16.msra.mxu0 %v7977_v37  ;;  %v8012_v37 = vld [vmem:[%s9744_s7 + $0x178] sm:$0xff]  }
 0x59f   :  { %7530 = vmatprep.subr.bf16.mxu0 %v8132_v54 }
 0x5a2   :  { %7531 = vmatpush3.bf16.msra.mxu0 %v7979_v38  ;;  %v8011_v38 = vld [vmem:[%s9744_s7 + $0x128] sm:$0xff]  }
 0x5a3   :  { %7532 = vmatprep.subr.bf16.mxu0 %v8132_v54 }
 0x5a6   :  { %7533 = vmatpush3.bf16.msra.mxu0 %v7981_v39  ;;  %v8014_v39 = vld [vmem:[%s9744_s7 + $0x170] sm:$0xff]  }
 0x5a7   :  { %7534 = vmatprep.subr.bf16.mxu0 %v8132_v54 }
 0x5aa   :  { %7535 = vmatpush3.bf16.msra.mxu0 %v7983_v40  ;;  %v8013_v40 = vld [vmem:[%s9744_s7 + $0x120] sm:$0xff]  }
 0x5ab   :  { %7536 = vmatprep.subr.bf16.mxu0 %v8132_v54 }
 0x5ae   :  { %7537 = vmatpush3.bf16.msra.mxu0 %v7985_v43  ;;  %v8015_v43 = vld [vmem:[%s9744_s7 + $0x118] sm:$0xff]  }
 0x5af   :  { %7538 = vmatprep.subr.bf16.mxu0 %v8132_v54 }
 0x5b2   :  { %7539 = vmatpush3.bf16.msra.mxu0 %v7987_v46  ;;  %v8018_v46 = vld [vmem:[%s9744_s7 + $0x160] sm:$0xff]  }
 0x5b3   :  { %7540 = vmatprep.subr.bf16.mxu0 %v8132_v54 }
 0x5b6   :  { %7541 = vmatpush3.bf16.msra.mxu0 %v7988_v49  ;;  %v8019_v49 = vld [vmem:[%s9744_s7 + $0x108] sm:$0xff]  }
 0x5b7   :  { %7566 = vmatprep.subr.bf16.mxu0 %v8132_v54 }
 0x651   :  { %v3428_v50 = vpop.f32.mrf.mxu0 }
 0x653   :  { %v7516_v52 = vpop.f32.mrf.mxu0 }
 0x654   :  { %v8021_v52 = vld [vmem:[%s9744_s7 + $0x100] sm:$0xff]  }
 0x655   :  { %v3431_v53 = vpop.f32.mrf.mxu0 }
 0x656   :  { %v3435_v58 = vpack.c.bf16 %v3431_v53, %v3428_v50  ;;  %v8020_v50 = vld [vmem:[%s9744_s7 + $0x158] sm:$0xff]   ;;  %v8022_v53 = vld [vmem:[%s9744_s7 + $0x150] sm:$0xff]  }
 0x657   :  { %v7517_v8 = vpop.f32.mrf.mxu0 }
 0x658   :  { %7563 = vmatmul.mubr.bf16.vlgmr.msra.gmra.mxu1 %v3435_v58  ;;  %v8024_v58 = vld [vmem:[%s9744_s7 + $0x140] sm:$0xff]  }
 0x659   :  { %v3497_v61 = vpop.f32.mrf.mxu0  ;;  %7575 = vmatpush3.bf16.msra.mxu1 %v7991_v55  ;;  %7590 = vmatprep.mubr.msk.bf16.mxu1 %vm8133_vm0, %v8132_v54  ;;  %v8023_v55 = vld [vmem:[%s9744_s7 + $0x148] sm:$0xff]  }
 0x65a   :  { %7576 = vmatprep.subr.bf16.mxu1 %v8132_v54 }
 0x65b   :  { %v7524_v48 = vpop.f32.mrf.mxu0 }
 0x65d   :  { %v3500_v42 = vpop.f32.mrf.mxu0  ;;  %7577 = vmatpush3.bf16.msra.mxu1 %v7992_v0 }
 0x65e   :  { %v3504_v57 = vpack.c.bf16 %v3500_v42, %v3497_v61  ;;  %7578 = vmatprep.subr.bf16.mxu1 %v8132_v54 }
 0x65f   :  { %v7525_v60 = vpop.f32.mrf.mxu0 }
 0x660   :  { %7543 = vmatmul.mubr.bf16.vlgmr.msra.gmra.mxu0 %v3504_v57 }
 0x661   :  { %7567 = vmatpush3.bf16.msra.mxu0 %v9146_v31  ;;  %7570 = vmatprep.mubr.msk.bf16.mxu0 %vm8133_vm0, %v8132_v54 }
 0x662   :  { %7568 = vmatprep.subr.bf16.mxu0 %v8132_v54  ;;  %7579 = vmatpush3.bf16.msra.mxu1 %v7993_v3 }
 0x663   :  { %7580 = vmatprep.subr.bf16.mxu1 %v8132_v54 }
 0x665   :  { %7569 = vmatpush3.bf16.msra.mxu0 %v9148_v33 }
 0x666   :  { %7594 = vmatprep.subr.bf16.mxu0 %v8132_v54  ;;  %7581 = vmatpush3.bf16.msra.mxu1 %v7995_v47 }
 0x667   :  { %7582 = vmatprep.subr.bf16.mxu1 %v8132_v54 }
 0x668   :  { %7571 = vmatmul.mubr.msk.bf16.vlgmr.msra.gmra.mxu0 %vm3390_vm1, %v7989_v5 }
 0x669   :  { %7595 = vmatpush3.bf16.msra.mxu0 %v9146_v31  ;;  %7598 = vmatprep.mubr.msk.bf16.mxu0 %vm8133_vm0, %v8132_v54 }
 0x66a   :  { %7596 = vmatprep.subr.bf16.mxu0 %v8132_v54  ;;  %7583 = vmatpush3.bf16.msra.mxu1 %v7997_v10 }
 0x66b   :  { %7584 = vmatprep.subr.bf16.mxu1 %v8132_v54 }
 0x66d   :  { %7597 = vmatpush3.bf16.msra.mxu0 %v9148_v33 }
 0x66e   :  { %7602 = vmatprep.subr.bf16.mxu0 %v8132_v54  ;;  %7585 = vmatpush3.bf16.msra.mxu1 %v7999_v11 }
 0x66f   :  { %7586 = vmatprep.subr.bf16.mxu1 %v8132_v54 }
 0x670   :  { %7599 = vmatmul.mubr.msk.bf16.vlgmr.msra.gmra.mxu0 %vm3390_vm1, %v7990_v6 }
 0x671   :  { %7603 = vmatpush3.bf16.msra.mxu0 %v7994_v51  ;;  %7618 = vmatprep.mubr.msk.bf16.mxu0 %vm8133_vm0, %v8132_v54 }
 0x672   :  { %7604 = vmatprep.subr.bf16.mxu0 %v8132_v54  ;;  %7587 = vmatpush3.bf16.msra.mxu1 %v8001_v4 }
 0x673   :  { %7588 = vmatprep.subr.bf16.mxu1 %v8132_v54 }
 0x675   :  { %7605 = vmatpush3.bf16.msra.mxu0 %v7996_v7 }
 0x676   :  { %7606 = vmatprep.subr.bf16.mxu0 %v8132_v54  ;;  %7589 = vmatpush3.bf16.msra.mxu1 %v8003_v59  ;;  %v8025_v59 = vld [vmem:[%s9743_s6 + $0x30] sm:$0xff]  }
 0x677   :  { %7622 = vmatprep.subr.bf16.mxu1 %v8132_v54 }
 0x679   :  { %7607 = vmatpush3.bf16.msra.mxu0 %v7998_v9 }
 0x67a   :  { %7608 = vmatprep.subr.bf16.mxu0 %v8132_v54 }
 0x67d   :  { %7609 = vmatpush3.bf16.msra.mxu0 %v8000_v63 }
 0x67e   :  { %7610 = vmatprep.subr.bf16.mxu0 %v8132_v54 }
 0x681   :  { %7611 = vmatpush3.bf16.msra.mxu0 %v8002_v62 }
 0x682   :  { %7612 = vmatprep.subr.bf16.mxu0 %v8132_v54 }
 0x685   :  { %7613 = vmatpush3.bf16.msra.mxu0 %v8004_v1 }
 0x686   :  { %7614 = vmatprep.subr.bf16.mxu0 %v8132_v54 }
 0x689   :  { %7615 = vmatpush3.bf16.msra.mxu0 %v8005_v2 }
 0x68a   :  { %7616 = vmatprep.subr.bf16.mxu0 %v8132_v54 }
 0x68d   :  { %7617 = vmatpush3.bf16.msra.mxu0 %v8006_v44  ;;  %v8027_v44 = vld [vmem:[%s9744_s7 + $0x1b8] sm:$0xff]  }
 0x68e   :  { %7650 = vmatprep.subr.bf16.mxu0 %v8132_v54 }
 0x718   :  { %v3693_v12 = vpop.f32.mrf.mxu1 }
 0x71a   :  { %v7564_v13 = vpop.f32.mrf.mxu1 }
 0x71b   :  { %v8028_v13 = vld [vmem:[%s9744_s7 + $0x1b0] sm:$0xff]  }
 0x71c   :  { %v3696_v14 = vpop.f32.mrf.mxu1 }
 0x71e   :  { %v7565_v15 = vpop.f32.mrf.mxu1 }
 0x71f   :  { %v8030_v15 = vld [vmem:[%s9744_s7 + $0x1f8] sm:$0xff]  }
 0x720   :  { %v3604_v56 = vpop.f32.mrf.mxu0 }
 0x721   :  { %v9298_v16 = vadd.f32 %v3693_v12, %v3604_v56  ;;  %v8029_v56 = vld [vmem:[%s9744_s7 + $0x1a8] sm:$0xff]  }
 0x722   :  { %v7544_v17 = vpop.f32.mrf.mxu0 }
 0x723   :  { %v8031_v17 = vld [vmem:[%s9744_s7 + $0x1a0] sm:$0xff]  }
 0x724   :  { %v3607_v18 = vpop.f32.mrf.mxu0 }
 0x725   :  { %v9300_v19 = vadd.f32 %v3696_v14, %v3607_v18  ;;  %v8026_v14 = vld [vmem:[%s9743_s6 + $0x38] sm:$0xff]  }
 0x726   :  { %v7545_v20 = vpop.f32.mrf.mxu0  ;;  %v8033_v18 = vld [vmem:[%s9744_s7 + $0x198] sm:$0xff]  }
 0x727   :  { %v8035_v20 = vld [vmem:[%s9744_s7 + $0x190] sm:$0xff]  }
 0x728   :  { %v3745_v21 = vpop.f32.mrf.mxu0 }
 0x72a   :  { %v7572_v22 = vpop.f32.mrf.mxu0 }
 0x72b   :  { %v8037_v22 = vld [vmem:[%s9744_s7 + $0x188] sm:$0xff]  }
 0x72c   :  { %v3748_v23 = vpop.f32.mrf.mxu0 }
 0x72d   :  { %v3752_v24 = vpack.c.bf16 %v3748_v23, %v3745_v21  ;;  %v8036_v21 = vld [vmem:[%s9744_s7 + $0x1e0] sm:$0xff]   ;;  %v8038_v23 = vld [vmem:[%s9744_s7 + $0x1d8] sm:$0xff]  }
 0x72e   :  { %v7573_v25 = vpop.f32.mrf.mxu0 }
 0x72f   :  { %7591 = vmatmul.mubr.bf16.vlgmr.msra.gmra.mxu1 %v3752_v24  ;;  %v8039_v24 = vld [vmem:[%s9744_s7 + $0x180] sm:$0xff]   ;;  %v8040_v25 = vld [vmem:[%s9744_s7 + $0x1d0] sm:$0xff]  }
 0x730   :  { %7623 = vmatpush3.bf16.msra.mxu1 %v9146_v31  ;;  %v3906_v26 = vpop.f32.mrf.mxu0  ;;  %7626 = vmatprep.mubr.msk.bf16.mxu1 %vm8133_vm0, %v8132_v54 }
 0x731   :  { %7624 = vmatprep.subr.bf16.mxu1 %v8132_v54 }
 0x732   :  { %v7600_v27 = vpop.f32.mrf.mxu0 }
 0x733   :  { %v8042_v27 = vld [vmem:[%s9744_s7 + $0x1c0] sm:$0xff]  }
 0x734   :  { %7625 = vmatpush3.bf16.msra.mxu1 %v9148_v33  ;;  %v3909_v29 = vpop.f32.mrf.mxu0 }
 0x735   :  { %v3913_v30 = vpack.c.bf16 %v3909_v29, %v3906_v26  ;;  %7630 = vmatprep.subr.bf16.mxu1 %v8132_v54  ;;  %v8041_v26 = vld [vmem:[%s9744_s7 + $0x1c8] sm:$0xff]  }
 0x736   :  { %v7601_v34 = vpop.f32.mrf.mxu0 }
 0x737   :  { %7619 = vmatmul.mubr.bf16.vlgmr.msra.gmra.mxu0 %v3913_v30  ;;  %7627 = vmatmul.mubr.msk.bf16.vlgmr.msra.gmra.mxu1 %vm3390_vm1, %v8007_v28 }
 0x738   :  { %7651 = vmatpush3.bf16.msra.mxu0 %v9146_v31  ;;  %7654 = vmatprep.mubr.msk.bf16.mxu0 %vm8133_vm0, %v8132_v54 }
 0x739   :  { %7652 = vmatprep.subr.bf16.mxu0 %v8132_v54  ;;  %7631 = vmatpush3.bf16.msra.mxu1 %v8009_v32 }
 0x73a   :  { %7632 = vmatprep.subr.bf16.mxu1 %v8132_v54  ;;  %7646 = vmatprep.mubr.msk.bf16.mxu1 %vm8133_vm0, %v8132_v54 }
 0x73c   :  { %7653 = vmatpush3.bf16.msra.mxu0 %v9148_v33 }
 0x73d   :  { %7633 = vmatpush3.bf16.msra.mxu1 %v8010_v35  ;;  %7658 = vmatprep.subr.bf16.mxu0 %v8132_v54 }
 0x73e   :  { %7634 = vmatprep.subr.bf16.mxu1 %v8132_v54 }
 0x73f   :  { %7655 = vmatmul.mubr.msk.bf16.vlgmr.msra.gmra.mxu0 %vm3390_vm1, %v8008_v36 }
 0x740   :  { %7659 = vmatpush3.bf16.msra.mxu0 %v8012_v37  ;;  %7674 = vmatprep.mubr.msk.bf16.mxu0 %vm8133_vm0, %v8132_v54 }
 0x741   :  { %7635 = vmatpush3.bf16.msra.mxu1 %v8011_v38  ;;  %7660 = vmatprep.subr.bf16.mxu0 %v8132_v54 }
 0x742   :  { %7636 = vmatprep.subr.bf16.mxu1 %v8132_v54 }
 0x744   :  { %7661 = vmatpush3.bf16.msra.mxu0 %v8014_v39 }
 0x745   :  { %7637 = vmatpush3.bf16.msra.mxu1 %v8013_v40  ;;  %7662 = vmatprep.subr.bf16.mxu0 %v8132_v54 }
 0x746   :  { %7638 = vmatprep.subr.bf16.mxu1 %v8132_v54 }
 0x748   :  { %7663 = vmatpush3.bf16.msra.mxu0 %v8016_v41 }
 0x749   :  { %7639 = vmatpush3.bf16.msra.mxu1 %v8015_v43  ;;  %7664 = vmatprep.subr.bf16.mxu0 %v8132_v54 }
 0x74a   :  { %7640 = vmatprep.subr.bf16.mxu1 %v8132_v54 }
 0x74c   :  { %7665 = vmatpush3.bf16.msra.mxu0 %v8018_v46 }
 0x74d   :  { %7641 = vmatpush3.bf16.msra.mxu1 %v8017_v45  ;;  %7666 = vmatprep.subr.bf16.mxu0 %v8132_v54 }
 0x74e   :  { %7642 = vmatprep.subr.bf16.mxu1 %v8132_v54 }
 0x750   :  { %7667 = vmatpush3.bf16.msra.mxu0 %v8020_v50 }
 0x751   :  { %7643 = vmatpush3.bf16.msra.mxu1 %v8019_v49  ;;  %7668 = vmatprep.subr.bf16.mxu0 %v8132_v54 }
 0x752   :  { %7644 = vmatprep.subr.bf16.mxu1 %v8132_v54 }
 0x754   :  { %7669 = vmatpush3.bf16.msra.mxu0 %v8022_v53 }
 0x755   :  { %7645 = vmatpush3.bf16.msra.mxu1 %v8021_v52  ;;  %7670 = vmatprep.subr.bf16.mxu0 %v8132_v54 }
 0x756   :  { %7678 = vmatprep.subr.bf16.mxu1 %v8132_v54 }
 0x758   :  { %7671 = vmatpush3.bf16.msra.mxu0 %v8023_v55  ;;  %v8043_v55 = vld [vmem:[%s9743_s6 + $0x40] sm:$0xff]  }
 0x759   :  { %7672 = vmatprep.subr.bf16.mxu0 %v8132_v54 }
 0x75c   :  { %7673 = vmatpush3.bf16.msra.mxu0 %v8024_v58 }
 0x75d   :  { %7706 = vmatprep.subr.bf16.mxu0 %v8132_v54 }
 0x7ef   :  { %v3852_v8 = vpop.f32.mrf.mxu1 }
 0x7f0   :  { %v3859_v61 = vadd.f32 %v3852_v8, %v9298_v16  ;;  %v8032_v16 = vld [vmem:[%s9744_s7 + $0x1f0] sm:$0xff]   ;;  %v8044_v8 = vld [vmem:[%s9744_s7 + $0x238] sm:$0xff]  }
 0x7f1   :  { %v7592_v0 = vpop.f32.mrf.mxu1 }
 0x7f2   :  { %v8045_v0 = vld [vmem:[%s9744_s7 + $0x230] sm:$0xff]  }
 0x7f3   :  { %v3855_v48 = vpop.f32.mrf.mxu1 }
 0x7f4   :  { %v3860_v42 = vadd.f32 %v3855_v48, %v9300_v19  ;;  %v8034_v19 = vld [vmem:[%s9744_s7 + $0x1e8] sm:$0xff]   ;;  %v8047_v48 = vld [vmem:[%s9744_s7 + $0x220] sm:$0xff]  }
 0x7f5   :  { %v7593_v57 = vpop.f32.mrf.mxu1 }
 0x7f6   :  { %v8049_v57 = vld [vmem:[%s9744_s7 + $0x210] sm:$0xff]  }
 0x7f7   :  { %v4013_v3 = vpop.f32.mrf.mxu0  ;;  %v4067_v60 = vpop.f32.mrf.mxu1 }
 0x7f8   :  { %v9392_v5 = vadd.f32 %v4013_v3, %v3859_v61  ;;  %v8050_v3 = vld [vmem:[%s9744_s7 + $0x208] sm:$0xff]  }
 0x7f9   :  { %v7620_v6 = vpop.f32.mrf.mxu0  ;;  %v7628_v51 = vpop.f32.mrf.mxu1 }
 0x7fb   :  { %v4016_v47 = vpop.f32.mrf.mxu0  ;;  %v4070_v7 = vpop.f32.mrf.mxu1 }
 0x7fc   :  { %v9394_v10 = vadd.f32 %v4016_v47, %v3860_v42  ;;  %v4074_v9 = vpack.c.bf16 %v4070_v7, %v4067_v60  ;;  %v8048_v42 = vld [vmem:[%s9744_s7 + $0x218] sm:$0xff]   ;;  %v8051_v60 = vld [vmem:[%s9744_s7 + $0x200] sm:$0xff]  }
 0x7fd   :  { %v7621_v11 = vpop.f32.mrf.mxu0  ;;  %v7629_v63 = vpop.f32.mrf.mxu1 }
 0x7fe   :  { %7647 = vmatmul.mubr.bf16.vlgmr.msra.gmra.mxu1 %v4074_v9 }
 0x7ff   :  { %7679 = vmatpush3.bf16.msra.mxu1 %v9146_v31  ;;  %v4228_v4 = vpop.f32.mrf.mxu0  ;;  %7682 = vmatprep.mubr.msk.bf16.mxu1 %vm8133_vm0, %v8132_v54 }
 0x800   :  { %7680 = vmatprep.subr.bf16.mxu1 %v8132_v54 }
 0x801   :  { %v7656_v62 = vpop.f32.mrf.mxu0 }
 0x803   :  { %7681 = vmatpush3.bf16.msra.mxu1 %v9148_v33  ;;  %v4231_v1 = vpop.f32.mrf.mxu0 }
 0x804   :  { %v4235_v2 = vpack.c.bf16 %v4231_v1, %v4228_v4  ;;  %7686 = vmatprep.subr.bf16.mxu1 %v8132_v54 }
 0x805   :  { %v7657_v12 = vpop.f32.mrf.mxu0 }
 0x806   :  { %7675 = vmatmul.mubr.bf16.vlgmr.msra.gmra.mxu0 %v4235_v2  ;;  %7683 = vmatmul.mubr.msk.bf16.vlgmr.msra.gmra.mxu1 %vm3390_vm1, %v8025_v59 }
 0x807   :  { %7707 = vmatpush3.bf16.msra.mxu0 %v9146_v31  ;;  %7710 = vmatprep.mubr.msk.bf16.mxu0 %vm8133_vm0, %v8132_v54 }
 0x808   :  { %7708 = vmatprep.subr.bf16.mxu0 %v8132_v54  ;;  %7687 = vmatpush3.bf16.msra.mxu1 %v8027_v44 }
 0x809   :  { %7688 = vmatprep.subr.bf16.mxu1 %v8132_v54  ;;  %7702 = vmatprep.mubr.msk.bf16.mxu1 %vm8133_vm0, %v8132_v54 }
 0x80b   :  { %7709 = vmatpush3.bf16.msra.mxu0 %v9148_v33 }
 0x80c   :  { %7689 = vmatpush3.bf16.msra.mxu1 %v8028_v13  ;;  %7714 = vmatprep.subr.bf16.mxu0 %v8132_v54  ;;  %v8055_v13 = vld [vmem:[%s9746_s10 + $0xe8] ss:$16 sps:$4 sm:$0xff]  }
 0x80d   :  { %7690 = vmatprep.subr.bf16.mxu1 %v8132_v54 }
 0x80e   :  { %7711 = vmatmul.mubr.msk.bf16.vlgmr.msra.gmra.mxu0 %vm3390_vm1, %v8026_v14  ;;  %v8057_v14 = vld [vmem:[%s9746_s10 + $0xec] ss:$16 sps:$4 sm:$0xff]  }
 0x80f   :  { %7715 = vmatpush3.bf16.msra.mxu0 %v8030_v15  ;;  %7730 = vmatprep.mubr.msk.bf16.mxu0 %vm8133_vm0, %v8132_v54  ;;  %v8061_v15 = vld [vmem:[%s9746_s10 + $0xc8] ss:$16 sps:$4 sm:$0xff]  }
 0x810   :  { %7691 = vmatpush3.bf16.msra.mxu1 %v8029_v56  ;;  %7716 = vmatprep.subr.bf16.mxu0 %v8132_v54  ;;  %v8063_v56 = vld [vmem:[%s9746_s10 + $0xcc] ss:$16 sps:$4 sm:$0xff]  }
 0x811   :  { %7692 = vmatprep.subr.bf16.mxu1 %v8132_v54 }
 0x813   :  { %7717 = vmatpush3.bf16.msra.mxu0 %v8032_v16  ;;  %v8069_v16 = vld [vmem:[%s9746_s10 + $0xac] ss:$16 sps:$4 sm:$0xff]  }
 0x814   :  { %7693 = vmatpush3.bf16.msra.mxu1 %v8031_v17  ;;  %7718 = vmatprep.subr.bf16.mxu0 %v8132_v54  ;;  %v8067_v17 = vld [vmem:[%s9746_s10 + $0xa8] ss:$16 sps:$4 sm:$0xff]  }
 0x815   :  { %7694 = vmatprep.subr.bf16.mxu1 %v8132_v54 }
 0x817   :  { %7719 = vmatpush3.bf16.msra.mxu0 %v8034_v19  ;;  %v8073_v19 = vld [vmem:[%s9746_s10 + $0x88] ss:$16 sps:$4 sm:$0xff]  }
 0x818   :  { %7695 = vmatpush3.bf16.msra.mxu1 %v8033_v18  ;;  %7720 = vmatprep.subr.bf16.mxu0 %v8132_v54  ;;  %v8075_v18 = vld [vmem:[%s9746_s10 + $0x8c] ss:$16 sps:$4 sm:$0xff]  }
 0x819   :  { %7696 = vmatprep.subr.bf16.mxu1 %v8132_v54 }
 0x81b   :  { %7721 = vmatpush3.bf16.msra.mxu0 %v8036_v21  ;;  %v8079_v21 = vld [vmem:[%s9746_s10 + $0x68] ss:$16 sps:$4 sm:$0xff]  }
 0x81c   :  { %7697 = vmatpush3.bf16.msra.mxu1 %v8035_v20  ;;  %7722 = vmatprep.subr.bf16.mxu0 %v8132_v54  ;;  %v8081_v20 = vld [vmem:[%s9746_s10 + $0x6c] ss:$16 sps:$4 sm:$0xff]  }
 0x81d   :  { %7698 = vmatprep.subr.bf16.mxu1 %v8132_v54 }
 0x81f   :  { %7723 = vmatpush3.bf16.msra.mxu0 %v8038_v23  ;;  %v8085_v23 = vld [vmem:[%s9746_s10 + $0x48] ss:$16 sps:$4 sm:$0xff]  }
 0x820   :  { %7699 = vmatpush3.bf16.msra.mxu1 %v8037_v22  ;;  %7724 = vmatprep.subr.bf16.mxu0 %v8132_v54  ;;  %v8087_v22 = vld [vmem:[%s9746_s10 + $0x4c] ss:$16 sps:$4 sm:$0xff]  }
 0x821   :  { %7700 = vmatprep.subr.bf16.mxu1 %v8132_v54 }
 0x823   :  { %7725 = vmatpush3.bf16.msra.mxu0 %v8040_v25  ;;  %v8091_v25 = vld [vmem:[%s9746_s10 + $0x28] ss:$16 sps:$4 sm:$0xff]  }
 0x824   :  { %7701 = vmatpush3.bf16.msra.mxu1 %v8039_v24  ;;  %7726 = vmatprep.subr.bf16.mxu0 %v8132_v54  ;;  %v8093_v24 = vld [vmem:[%s9746_s10 + $0x2c] ss:$16 sps:$4 sm:$0xff]  }
 0x825   :  { %7734 = vmatprep.subr.bf16.mxu1 %v8132_v54 }
 0x827   :  { %7727 = vmatpush3.bf16.msra.mxu0 %v8041_v26  ;;  %v8099_v26 = vld [vmem:[%s9746_s10 + $0xc] ss:$16 sps:$4 sm:$0xff]  }
 0x828   :  { %7728 = vmatprep.subr.bf16.mxu0 %v8132_v54 }
 0x82b   :  { %7729 = vmatpush3.bf16.msra.mxu0 %v8042_v27  ;;  %v8097_v27 = vld [vmem:[%s9746_s10 + $0x8] ss:$16 sps:$4 sm:$0xff]  }
 0x82c   :  { %7762 = vmatprep.subr.bf16.mxu0 %v8132_v54 }
 0x8be   :  { %v4174_v28 = vpop.f32.mrf.mxu1 }
 0x8bf   :  { %v4181_v29 = vadd.f32 %v4174_v28, %v9392_v5 }
 0x8c0   :  { %v7648_v30 = vpop.f32.mrf.mxu1 }
 0x8c1   :  { %v6265_v30 = vld [vmem:[%s9747_s8] ss:$0 sm:$0xff] }
 0x8c2   :  { %v4177_v32 = vpop.f32.mrf.mxu1 }
 0x8c3   :  { %v4182_v34 = vadd.f32 %v4177_v32, %v9394_v10 }
 0x8c4   :  { %v7649_v35 = vpop.f32.mrf.mxu1 }
 0x8c6   :  { %v4335_v36 = vpop.f32.mrf.mxu0  ;;  %v4389_v37 = vpop.f32.mrf.mxu1 }
 0x8c7   :  { %v4342_v38 = vadd.f32 %v4335_v36, %v4181_v29 }
 0x8c8   :  { %v7676_v39 = vpop.f32.mrf.mxu0  ;;  %v7684_v40 = vpop.f32.mrf.mxu1 }
 0x8ca   :  { %v4338_v41 = vpop.f32.mrf.mxu0  ;;  %v4392_v43 = vpop.f32.mrf.mxu1 }
 0x8cb   :  { %v4343_v45 = vadd.f32 %v4338_v41, %v4182_v34  ;;  %v4396_v46 = vpack.c.bf16 %v4392_v43, %v4389_v37  ;;  %v8054_v41 = vld [vmem:[%s9746_s10 + $0xe4] ss:$16 sps:$4 sm:$0xff]  }
 0x8cc   :  { %v7677_v49 = vpop.f32.mrf.mxu0  ;;  %v7685_v50 = vpop.f32.mrf.mxu1 }
 0x8cd   :  { %7703 = vmatmul.mubr.bf16.vlgmr.msra.gmra.mxu1 %v4396_v46  ;;  %v8052_v46 = vld [vmem:[%s9746_s10 + $0xe0] ss:$16 sps:$4 sm:$0xff]   ;;  %v8060_v49 = vld [vmem:[%s9746_s10 + $0xc4] ss:$16 sps:$4 sm:$0xff]  }
 0x8ce   :  { %7735 = vmatpush3.bf16.msra.mxu1 %v9146_v31  ;;  %v4550_v52 = vpop.f32.mrf.mxu0  ;;  %7738 = vmatprep.mubr.msk.bf16.mxu1 %vm8133_vm0, %v8132_v54  ;;  %v8058_v50 = vld [vmem:[%s9746_s10 + $0xc0] ss:$16 sps:$4 sm:$0xff]  }
 0x8cf   :  { %7736 = vmatprep.subr.bf16.mxu1 %v8132_v54 }
 0x8d0   :  { %v7712_v53 = vpop.f32.mrf.mxu0 }
 0x8d1   :  { %v8064_v53 = vld [vmem:[%s9746_s10 + $0xa0] ss:$16 sps:$4 sm:$0xff]  }
 0x8d2   :  { %7737 = vmatpush3.bf16.msra.mxu1 %v9148_v33  ;;  %v4553_v58 = vpop.f32.mrf.mxu0  ;;  %v8046_v33 = vld [vmem:[%s9744_s7 + $0x228] sm:$0xff]  }
 0x8d3   :  { %v4557_v61 = vpack.c.bf16 %v4553_v58, %v4550_v52  ;;  %7742 = vmatprep.subr.bf16.mxu1 %v8132_v54  ;;  %v8066_v52 = vld [vmem:[%s9746_s10 + $0xa4] ss:$16 sps:$4 sm:$0xff]   ;;  %v8070_v58 = vld [vmem:[%s9746_s10 + $0x80] ss:$16 sps:$4 sm:$0xff]  }
 0x8d4   :  { %v7713_v31 = vpop.f32.mrf.mxu0 }
 0x8d5   :  { %7731 = vmatmul.mubr.bf16.vlgmr.msra.gmra.mxu0 %v4557_v61  ;;  %7739 = vmatmul.mubr.msk.bf16.vlgmr.msra.gmra.mxu1 %vm3390_vm1, %v8043_v55  ;;  %v8072_v55 = vld [vmem:[%s9746_s10 + $0x84] ss:$16 sps:$4 sm:$0xff]   ;;  %v8076_v61 = vld [vmem:[%s9746_s10 + $0x60] ss:$16 sps:$4 sm:$0xff]  }
 0x8d6   :  { %7743 = vmatpush3.bf16.msra.mxu1 %v8044_v8  ;;  %7758 = vmatprep.mubr.msk.bf16.mxu1 %vm8133_vm0, %v8132_v54  ;;  %v8078_v8 = vld [vmem:[%s9746_s10 + $0x64] ss:$16 sps:$4 sm:$0xff]  }
 0x8d7   :  { %7744 = vmatprep.subr.bf16.mxu1 %v8132_v54  ;;  %7764 = vmatprep.mubr.msk.bf16.mxu0 %vm8133_vm0, %v8132_v54  ;;  %v8084_v31 = vld [vmem:[%s9746_s10 + $0x44] ss:$16 sps:$4 sm:$0xff]  }
 0x8da   :  { %7745 = vmatpush3.bf16.msra.mxu1 %v8045_v0  ;;  %v8082_v0 = vld [vmem:[%s9746_s10 + $0x40] ss:$16 sps:$4 sm:$0xff]  }
 0x8db   :  { %7746 = vmatprep.subr.bf16.mxu1 %v8132_v54 }
 0x8de   :  { %7747 = vmatpush3.bf16.msra.mxu1 %v8046_v33  ;;  %v8090_v33 = vld [vmem:[%s9746_s10 + $0x24] ss:$16 sps:$4 sm:$0xff]  }
 0x8df   :  { %7748 = vmatprep.subr.bf16.mxu1 %v8132_v54 }
 0x8e2   :  { %7749 = vmatpush3.bf16.msra.mxu1 %v8047_v48  ;;  %v8088_v48 = vld [vmem:[%s9746_s10 + $0x20] ss:$16 sps:$4 sm:$0xff]  }
 0x8e3   :  { %7750 = vmatprep.subr.bf16.mxu1 %v8132_v54 }
 0x8e6   :  { %7751 = vmatpush3.bf16.msra.mxu1 %v8048_v42  ;;  %v8096_v42 = vld [vmem:[%s9746_s10 + $0x4] ss:$16 sps:$4 sm:$0xff]  }
 0x8e7   :  { %7752 = vmatprep.subr.bf16.mxu1 %v8132_v54 }
 0x8ea   :  { %7753 = vmatpush3.bf16.msra.mxu1 %v8049_v57  ;;  %v8094_v57 = vld [vmem:[%s9746_s10] ss:$16 sps:$4 sm:$0xff]  }
 0x8eb   :  { %7754 = vmatprep.subr.bf16.mxu1 %v8132_v54 }
 0x8ee   :  { %7755 = vmatpush3.bf16.msra.mxu1 %v8050_v3  ;;  %v8134_v3 = vmov 0  }
 0x8ef   :  { %7756 = vmatprep.subr.bf16.mxu1 %v8132_v54 }
 0x8f2   :  { %7757 = vmatpush3.bf16.msra.mxu1 %v8051_v60  ;;  %v8100_v60 = vld [vmem:[%s9749_s12 + $0x78] sm:$0xff]  }
 0x8f3   :  { %5140 = vmatprep.subr.bf16.mxu1 %v8057_v14  ;;  %v8114_v14 = vld [vmem:[%s9749_s12 + $0x20] sm:$0xff]  }
 0x98d   :  { %v4496_v5 = vpop.f32.mrf.mxu1 }
 0x98e   :  { %v4503_v6 = vadd.f32 %v4496_v5, %v4342_v38  ;;  %v8101_v5 = vld [vmem:[%s9749_s12 + $0xf8] sm:$0xff]  }
 0x98f   :  { %v7704_v51 = vpop.f32.mrf.mxu1 }
 0x990   :  { %v8102_v51 = vld [vmem:[%s9749_s12 + $0x38] sm:$0xff]  }
 0x991   :  { %v4499_v47 = vpop.f32.mrf.mxu1 }
 0x992   :  { %v4504_v7 = vadd.f32 %v4499_v47, %v4343_v45  ;;  %v4839_v45 = vld [vmem:[%s9748_s9] sm:$0xf]  ;;  %v8103_v47 = vld [vmem:[%s9749_s12 + $0xb8] sm:$0xff]  }
 0x993   :  { %v7705_v10 = vpop.f32.mrf.mxu1 }
 0x994   :  { %v8104_v10 = vld [vmem:[%s9749_s12 + $0x70] sm:$0xff]  }
 0x995   :  { %v4657_v9 = vpop.f32.mrf.mxu0  ;;  %v4711_v11 = vpop.f32.mrf.mxu1 }
 0x996   :  { %v4664_v63 = vadd.f32 %v4657_v9, %v4503_v6  ;;  %v8105_v9 = vld [vmem:[%s9749_s12 + $0xf0] sm:$0xff]  }
 0x997   :  { %v7732_v4 = vpop.f32.mrf.mxu0  ;;  %v7740_v62 = vpop.f32.mrf.mxu1 }
 0x998   :  { %v8106_v4 = vld [vmem:[%s9749_s12 + $0x30] sm:$0xff]  }
 0x999   :  { %v4660_v59 = vpop.f32.mrf.mxu0  ;;  %v4714_v1 = vpop.f32.mrf.mxu1  ;;  %v8107_v62 = vld [vmem:[%s9749_s12 + $0xb0] sm:$0xff]  }
 0x99a   :  { %v4665_v2 = vadd.f32 %v4660_v59, %v4504_v7  ;;  %v4718_v54 = vpack.c.bf16 %v4714_v1, %v4711_v11  ;;  %v8108_v59 = vld [vmem:[%s9749_s12 + $0x68] sm:$0xff]  }
 0x99b   :  { %v7741_v44 = vpop.f32.mrf.mxu1  ;;  %v7733_v12 = vpop.f32.mrf.mxu0  ;;  %v8109_v1 = vld [vmem:[%s9749_s12 + $0xe8] sm:$0xff]  }
 0x99c   :  { %7759 = vmatmul.mubr.bf16.vlgmr.msra.gmra.mxu1 %v4718_v54  ;;  %v8110_v54 = vld [vmem:[%s9749_s12 + $0x28] sm:$0xff]   ;;  %v8112_v12 = vld [vmem:[%s9749_s12 + $0x60] sm:$0xff]  }
 0x99d   :  { %5141 = vmatpush1.bf16.msra.mxu1 %v8055_v13  ;;  %5172 = vmatprep.mubr.bf16.mxu1 %v8134_v3  ;;  %v8111_v44 = vld [vmem:[%s9749_s12 + $0xa8] sm:$0xff]   ;;  %v8113_v13 = vld [vmem:[%s9749_s12 + $0xe0] sm:$0xff]  }
 0x99e   :  { %5142 = vmatprep.subr.bf16.mxu1 %v8063_v56  ;;  %v8116_v56 = vld [vmem:[%s9749_s12 + $0x58] sm:$0xff]  }
 0x9a1   :  { %5143 = vmatpush1.bf16.msra.mxu1 %v8061_v15  ;;  %v8115_v15 = vld [vmem:[%s9749_s12 + $0xa0] sm:$0xff]  }
 0x9a2   :  { %5144 = vmatprep.subr.bf16.mxu1 %v8069_v16  ;;  %v8117_v16 = vld [vmem:[%s9749_s12 + $0xd8] sm:$0xff]  }
 0x9a5   :  { %5145 = vmatpush1.bf16.msra.mxu1 %v8067_v17  ;;  %v8118_v17 = vld [vmem:[%s9749_s12 + $0x18] sm:$0xff]  }
 0x9a6   :  { %5146 = vmatprep.subr.bf16.mxu1 %v8075_v18  ;;  %v8119_v18 = vld [vmem:[%s9749_s12 + $0x98] sm:$0xff]  }
 0x9a9   :  { %5147 = vmatpush1.bf16.msra.mxu1 %v8073_v19  ;;  %v8120_v19 = vld [vmem:[%s9749_s12 + $0x50] sm:$0xff]  }
 0x9aa   :  { %5148 = vmatprep.subr.bf16.mxu1 %v8081_v20  ;;  %v8121_v20 = vld [vmem:[%s9749_s12 + $0xd0] sm:$0xff]  }
 0x9ad   :  { %5149 = vmatpush1.bf16.msra.mxu1 %v8079_v21  ;;  %v8122_v21 = vld [vmem:[%s9749_s12 + $0x10] sm:$0xff]  }
 0x9ae   :  { %5150 = vmatprep.subr.bf16.mxu1 %v8087_v22  ;;  %v8123_v22 = vld [vmem:[%s9749_s12 + $0x90] sm:$0xff]  }
 0x9b1   :  { %5151 = vmatpush1.bf16.msra.mxu1 %v8085_v23  ;;  %v8124_v23 = vld [vmem:[%s9749_s12 + $0x48] sm:$0xff]  }
 0x9b2   :  { %5152 = vmatprep.subr.bf16.mxu1 %v8093_v24  ;;  %v8125_v24 = vld [vmem:[%s9749_s12 + $0xc8] sm:$0xff]  }
 0x9b5   :  { %5153 = vmatpush1.bf16.msra.mxu1 %v8091_v25  ;;  %v8126_v25 = vld [vmem:[%s9749_s12 + $0x8] sm:$0xff]  }
 0x9b6   :  { %5154 = vmatprep.subr.bf16.mxu1 %v8099_v26  ;;  %v8127_v26 = vld [vmem:[%s9749_s12 + $0x88] sm:$0xff]  }
 0x9b9   :  { %5155 = vmatpush1.bf16.msra.mxu1 %v8097_v27  ;;  %v8128_v27 = vld [vmem:[%s9749_s12 + $0x40] sm:$0xff]  }
 0x9ba   :  { %6848 = vmatprep.subr.bf16.mxu1 %v8101_v5 }
 0xa5c   :  { %v4818_v28 = vpop.f32.mrf.mxu1 }
 0xa5d   :  { %v4825_v29 = vadd.f32 %v4818_v28, %v4664_v63  ;;  %v8129_v28 = vld [vmem:[%s9749_s12 + $0xc0] sm:$0xff]  }
 0xa5e   :  { %v7760_v32 = vpop.f32.mrf.mxu1 }
 0xa5f   :  { %v4834_v35 = vadd.f32 %v6265_v30, %v4825_v29  ;;  %v8130_v29 = vld [vmem:[%s9749_s12] sm:$0xff]   ;;  %v4919_v32 = vlaneseq }
 0xa60   :  { %v4821_v34 = vpop.f32.mrf.mxu1 }
 0xa61   :  { %v4826_v36 = vadd.f32 %v4821_v34, %v4665_v2  ;;  %v4836_v39 = vmax.f32 %v4834_v35, 0.0  ;;  %v4920_v34 = vshrl.u32 %v4919_v32, 7 }
 0xa62   :  { %v7761_v37 = vpop.f32.mrf.mxu1 }
 0xa63   :  { %v4835_v38 = vadd.f32 %v6265_v30, %v4826_v36  ;;  %v8131_v30 = vld [vmem:[%s9749_s12 + $0x80] sm:$0xff]   ;;  %v4921_v35 = vsub.s32 0, %v4920_v34  ;;  %v4929_v36 = vsub.s32 2, %v4920_v34 }
 0xa64   :  { %v4917_v37 = vld [vmem:[%s9750_s11] sm:$0xf] }
 0xa65   :  { %v4837_v40 = vmax.f32 %v4835_v38, 0.0  ;;  %v4925_v38 = vsub.s32 1, %v4920_v34 }
 0xa67   :  { %v4838_v43 = vpack.c.bf16 %v4837_v40, %v4836_v39  ;;  %v4933_v39 = vsub.s32 3, %v4920_v34  ;;  %v4922_v40 = vrot.slane %v4917_v37, %v4921_v35 }
 0xa69   :  { %7763 = vmatpush3.bf16.msra.mxu0 %v4838_v43  ;;  %v4926_v43 = vrot.slane %v4917_v37, %v4925_v38 }
 0xa6a   :  { %5099 = vmatprep.subr.bf16.mxu0 %v8054_v41  ;;  %v4930_v41 = vrot.slane %v4917_v37, %v4929_v36 }
 0xa6c   :  { %7765 = vmatmul.mubr.msk.bf16.vlgmr.msra.gmra.mxu0 %vm4840_vm2, %v4839_v45  ;;  %v4934_v45 = vrot.slane %v4917_v37, %v4933_v39 }
 0xa6d   :  { %5100 = vmatpush1.bf16.msra.mxu0 %v8052_v46  ;;  %5131 = vmatprep.mubr.bf16.mxu0 %v8134_v3 }
 0xa6e   :  { %5101 = vmatprep.subr.bf16.mxu0 %v8060_v49 }
 0xa71   :  { %5102 = vmatpush1.bf16.msra.mxu0 %v8058_v50 }
 0xa72   :  { %5103 = vmatprep.subr.bf16.mxu0 %v8066_v52 }
 0xa75   :  { %5104 = vmatpush1.bf16.msra.mxu0 %v8064_v53 }
 0xa76   :  { %5105 = vmatprep.subr.bf16.mxu0 %v8072_v55 }
 0xa79   :  { %5106 = vmatpush1.bf16.msra.mxu0 %v8070_v58 }
 0xa7a   :  { %5107 = vmatprep.subr.bf16.mxu0 %v8078_v8 }
 0xa7d   :  { %5108 = vmatpush1.bf16.msra.mxu0 %v8076_v61 }
 0xa7e   :  { %5109 = vmatprep.subr.bf16.mxu0 %v8084_v31 }
 0xa81   :  { %5110 = vmatpush1.bf16.msra.mxu0 %v8082_v0 }
 0xa82   :  { %5111 = vmatprep.subr.bf16.mxu0 %v8090_v33 }
 0xa85   :  { %5112 = vmatpush1.bf16.msra.mxu0 %v8088_v48 }
 0xa86   :  { %5113 = vmatprep.subr.bf16.mxu0 %v8096_v42 }
 0xa89   :  { %5114 = vmatpush1.bf16.msra.mxu0 %v8094_v57 }
 0xa8a   :  { %6826 = vmatprep.subr.bf16.mxu0 %v8100_v60 }
 0xb2c   :  { %v4878_v6 = vpop.f32.mrf.mxu0 }
 0xb2d   :  { %v4884_v7 = vpack.c.bf16 %v4878_v6, %v4878_v6 }
 0xb2e   :  { %v7766_v11 = vpop.f32.mrf.mxu0 }
 0xb2f   :  { %5132 = vmatmul.mubr.bf16.vlgmr.msra.gmra.mxu0 %v4884_v7  ;;  %5173 = vmatmul.mubr.bf16.vlgmr.msra.gmra.mxu1 %v4884_v7 }
 0xb30   :  { %v4881_v63 = vpop.f32.mrf.mxu0  ;;  %6827 = vmatpush3.bf16.msra.mxu0 %v8102_v51  ;;  %6849 = vmatpush3.bf16.msra.mxu1 %v8103_v47 }
 0xb31   :  { %6828 = vmatprep.subr.bf16.mxu0 %v8104_v10  ;;  %6850 = vmatprep.subr.bf16.mxu1 %v8105_v9  ;;  %v6299_v10 = vld [vmem:[%s9751_s13] ss:$0 sm:$0xff] }
 0xb32   :  { %v7767_v2 = vpop.f32.mrf.mxu0 }
 0xb34   :  { %6829 = vmatpush3.bf16.msra.mxu0 %v8106_v4  ;;  %6851 = vmatpush3.bf16.msra.mxu1 %v8107_v62 }
 0xb35   :  { %6830 = vmatprep.subr.bf16.mxu0 %v8108_v59  ;;  %6852 = vmatprep.subr.bf16.mxu1 %v8109_v1 }
 0xb38   :  { %6831 = vmatpush3.bf16.msra.mxu0 %v8110_v54  ;;  %6853 = vmatpush3.bf16.msra.mxu1 %v8111_v44 }
 0xb39   :  { %6832 = vmatprep.subr.bf16.mxu0 %v8112_v12  ;;  %6854 = vmatprep.subr.bf16.mxu1 %v8113_v13 }
 0xb3c   :  { %6833 = vmatpush3.bf16.msra.mxu0 %v8114_v14  ;;  %6855 = vmatpush3.bf16.msra.mxu1 %v8115_v15 }
 0xb3d   :  { %6834 = vmatprep.subr.bf16.mxu0 %v8116_v56  ;;  %6856 = vmatprep.subr.bf16.mxu1 %v8117_v16 }
 0xb40   :  { %6835 = vmatpush3.bf16.msra.mxu0 %v8118_v17  ;;  %6857 = vmatpush3.bf16.msra.mxu1 %v8119_v18 }
 0xb41   :  { %6836 = vmatprep.subr.bf16.mxu0 %v8120_v19  ;;  %6858 = vmatprep.subr.bf16.mxu1 %v8121_v20 }
 0xb44   :  { %6837 = vmatpush3.bf16.msra.mxu0 %v8122_v21  ;;  %6859 = vmatpush3.bf16.msra.mxu1 %v8123_v22 }
 0xb45   :  { %6838 = vmatprep.subr.bf16.mxu0 %v8124_v23  ;;  %6860 = vmatprep.subr.bf16.mxu1 %v8125_v24 }
 0xb48   :  { %6839 = vmatpush3.bf16.msra.mxu0 %v8126_v25  ;;  %6861 = vmatpush3.bf16.msra.mxu1 %v8127_v26 }
 0xb49   :  { %6840 = vmatprep.subr.bf16.mxu0 %v8128_v27  ;;  %6862 = vmatprep.subr.bf16.mxu1 %v8129_v28 }
 0xb4c   :  { %6841 = vmatpush3.bf16.msra.mxu0 %v8130_v29  ;;  %6863 = vmatpush3.bf16.msra.mxu1 %v8131_v30 }
 0xbef   :  { %v5133_v46 = vpop.f32.mrf.mxu0  ;;  %v5174_v49 = vpop.f32.mrf.mxu1 }
 0xbf0   :  { %v5134_v50 = vadd.f32 %v5133_v46, %v4922_v40  ;;  %v5175_v52 = vadd.f32 %v5174_v49, %v4930_v41 }
 0xbf1   :  { %v5135_v53 = vpop.f32.mrf.mxu0  ;;  %v5176_v55 = vpop.f32.mrf.mxu1 }
 0xbf2   :  { %v5136_v58 = vadd.f32 %v5135_v53, %v4926_v43  ;;  %v5177_v8 = vadd.f32 %v5176_v55, %v4934_v45  ;;  %v5181_v61 = vmax.f32 %v5134_v50, 0.0  ;;  %v5183_v31 = vmax.f32 %v5175_v52, 0.0 }
 0xbf3   :  { %v5137_v0 = vpop.f32.mrf.mxu0  ;;  %v5178_v33 = vpop.f32.mrf.mxu1 }
 0xbf4   :  { %v5182_v48 = vmax.f32 %v5136_v58, 0.0  ;;  %v5184_v42 = vmax.f32 %v5177_v8, 0.0  ;;  %v5185_v6 = vpack.c.bf16 %v5181_v61, %v5181_v61  ;;  %v5187_v51 = vpack.c.bf16 %v5183_v31, %v5183_v31 }
 0xbf5   :  { %v5138_v57 = vpop.f32.mrf.mxu0  ;;  %v5179_v3 = vpop.f32.mrf.mxu1 }
 0xbf6   :  { %v5186_v60 = vpack.c.bf16 %v5182_v48, %v5182_v48  ;;  %v5188_v5 = vpack.c.bf16 %v5184_v42, %v5184_v42 }
 0xbf8   :  { %5484 = vmatprep.mubr.bf16.mxu0 %v5186_v60  ;;  %5524 = vmatprep.mubr.bf16.mxu1 %v5188_v5 }
 0xbf9   :  { %5485 = vmatmul.mubr.bf16.vlgmr.msra.gmra.mxu0 %v5185_v6  ;;  %5525 = vmatmul.mubr.bf16.vlgmr.msra.gmra.mxu1 %v5187_v51 }
 0xcb9   :  { %v6842_v47 = vpop.f32.mrf.mxu0  ;;  %v6864_v7 = vpop.f32.mrf.mxu1 }
 0xcbb   :  { %v6843_v9 = vpop.f32.mrf.mxu0  ;;  %v6865_v11 = vpop.f32.mrf.mxu1 }
 0xcbc   :  { %v6844_v63 = vadd.f32 %v6843_v9, %v6842_v47  ;;  %v6866_v1 = vadd.f32 %v6865_v11, %v6864_v7 }
 0xcbd   :  { %v6845_v4 = vpop.f32.mrf.mxu0  ;;  %v6867_v62 = vpop.f32.mrf.mxu1 }
 0xcbe   :  { %v5487_v59 = vadd.f32 %v6844_v63, %v6299_v10 }
 0xcbf   :  { %v6846_v2 = vpop.f32.mrf.mxu0  ;;  %v6868_v54 = vpop.f32.mrf.mxu1 }
 0xcc0   :  { %v5527_v44 = vadd.f32 %v6866_v1, %v5487_v59 }
 0xcc2   :  { %5532 = vst [vmem:[%s9752_s14] sm:$0xff] %v5527_v44 }

</bundles_post_ra>
